<compile_context>
chip_gen: v7x
topology: tpu7x:2x2x1
jax: 0.10.0
libtpu: 0.0.40
codegen_flags: <defaults>
</compile_context>

<pallas_src>
import math
from typing import Dict, List

import jax
import jax.numpy as jnp
from jax.experimental import pallas as pl
from jax.experimental.pallas import tpu as pltpu

LN_EPS = 1e-5        # nn.LayerNorm default eps
L2_EPS = 1e-12       # F.normalize default eps
LANE = 128
SUBLANE = 8


def _round_up(x, m):
    return ((x + m - 1) // m) * m


# ------------------------------ in-kernel helpers ------------------------------

def _layer_norm(x, gamma, beta):
    mean = jnp.mean(x, axis=-1, keepdims=True)
    var = jnp.mean((x - mean) ** 2, axis=-1, keepdims=True)
    return (x - mean) * jax.lax.rsqrt(var + LN_EPS) * gamma + beta


def _gelu_exact(x):
    # nn.GELU() default: 0.5 * x * (1 + erf(x / sqrt(2)))
    return 0.5 * x * (1.0 + jax.lax.erf(x * (1.0 / math.sqrt(2.0))))


def _softmax_last(x):
    m = jnp.max(x, axis=-1, keepdims=True)
    e = jnp.exp(x - m)
    return e * pl.reciprocal(jnp.sum(e, axis=-1, keepdims=True), approx=True)


def _l2_normalize(x):
    # F.normalize(p=2, dim=-1): x / max(||x||, eps) == x * rsqrt(max(||x||^2, eps^2))
    ss = jnp.sum(x * x, axis=-1, keepdims=True)
    return x * jax.lax.rsqrt(jnp.maximum(ss, L2_EPS * L2_EPS))


def _dot_bf16(a_f32, w_bf16):
    # bf16 operands on the MXU, f32 accumulation.
    return jnp.dot(a_f32.astype(jnp.bfloat16), w_bf16, preferred_element_type=jnp.float32)


def _proj_apply(x, w_ref, v_ref, dims, normalize, lang=None):
    """EnhancedProjection on a 2-D input (self-attention / mean(dim=1) branches are dead).

    w_ref (bf16): [Rw, 4h] (or [n_lang, Rw, 4h]) rows: w_in | (w1, w2) * L | w_out.
    v_ref (f32) : [Rv, 4h] (or [n_lang, Rv, 4h]) rows:
                  b_in, ln1_g, ln1_b | (b1, b2, ln_g, ln_b) * L | b_out, lnf_g, lnf_b.
    All offsets are Python-static, so every slice is a static Ref slice (no relayout copies).
    """
    in_dim, hid, out_dim, num_layers = dims
    h4 = 4 * hid

    def W(r0, nrows, ncols):
        if lang is None:
            return w_ref[r0:r0 + nrows, 0:ncols]
        return w_ref[lang, r0:r0 + nrows, 0:ncols]

    def V(r, ncols):
        if lang is None:
            return v_ref[r:r + 1, 0:ncols]
        return v_ref[lang, r:r + 1, 0:ncols]

    wr = 0
    h = _dot_bf16(x, W(wr, in_dim, hid)) + V(0, hid)
    wr += in_dim
    h = _layer_norm(h, V(1, hid), V(2, hid))
    vr = 3
    for _ in range(num_layers):                       # static unroll
        resid = h
        t = _dot_bf16(h, W(wr, hid, h4)) + V(vr, h4)
        wr += hid
        t = _gelu_exact(t)
        t = _dot_bf16(t, W(wr, h4, hid)) + V(vr + 1, hid)
        wr += h4
        h = _layer_norm(t + resid, V(vr + 2, hid), V(vr + 3, hid))
        vr += 4
    o = _dot_bf16(h, W(wr, hid, out_dim)) + V(vr, out_dim)
    o = _layer_norm(o, V(vr + 1, out_dim), V(vr + 2, out_dim))
    if normalize:
        o = _l2_normalize(o)
    return o


# ----------------------------- fused forward kernel -----------------------------

def _make_fused_kernel(*, has_video, n_langs, batch, out_dim,
                       venc_dims=None, vproj_dims=None,
                       tenc_dims=None, tproj_dims=None):
    """Single-invocation kernel: video path + statically-unrolled language paths."""

    def kernel(*refs):
        o_ref = refs[-1]
        o_ref[...] = jnp.zeros_like(o_ref)            # zero the (8,128)-aligned output slab once
        idx = 0
        row = 0

        if has_video:
            vf_ref, vln_ref, vew_ref, vev_ref, vpw_ref, vpv_ref = refs[idx:idx + 6]
            idx += 6
            # VideoEncoder front: LayerNorm + clamp + global-context attention pooling
            x = _layer_norm(vf_ref[...], vln_ref[0:1, :], vln_ref[1:2, :])   # [B, T, D]
            x = jnp.clip(x, -1.0, 1.0)
            gc = jnp.mean(x, axis=1)                                         # [B, D]
            aw = jnp.sum(x * gc[:, None, :], axis=-1)                        # [B, T] (T on lanes)
            aw = _softmax_last(aw)
            # diversity_penalty.mean(dim=2) == aw * mean(aw) for the rank-1 case
            aw = _softmax_last(aw - 0.1 * aw * jnp.mean(aw, axis=-1, keepdims=True))
            pooled = jnp.sum(x * aw[:, :, None], axis=1)                     # [B, D]

            # VideoEncoder.projection (3 layers) + L2, then video_projection (2 layers) + L2
            e = _proj_apply(pooled, vew_ref, vev_ref, venc_dims, normalize=True)
            vemb = _proj_apply(e, vpw_ref, vpv_ref, vproj_dims, normalize=True)
            o_ref[0:batch, 0:out_dim] = vemb
            row = batch

        if n_langs:
            ids_ref, mask_ref, tbl_ref, tew_ref, tev_ref, tpw_ref, tpv_ref = refs[idx:idx + 7]
            vocab = tbl_ref.shape[1]
            for i in range(n_langs):                  # static unroll (single-TC friendly)
                ids_i = ids_ref[i]                    # [B, S] int32
                mask_i = mask_ref[i]                  # [B, S] f32
                # TODO(synk): HF BERT/XLM-R backbone replaced by masked-mean embedding stub.
                # Vectorized one-hot "gather": (B,S,V) compare, mask, sum over S -> [B, V].
                iota_v = jax.lax.broadcasted_iota(jnp.int32, ids_i.shape + (vocab,), 2)
                onehot = (iota_v == ids_i[:, :, None]).astype(jnp.float32) * mask_i[:, :, None]
                sel = jnp.sum(onehot, axis=1)                               # [B, V]
                cnt = jnp.maximum(jnp.sum(mask_i, axis=1, keepdims=True), 1.0)
                cls = _dot_bf16(sel, tbl_ref[i]) / cnt                      # [B, H] masked mean

                henc = _proj_apply(cls, tew_ref, tev_ref, tenc_dims,
                                   normalize=False, lang=i)
                temb = _proj_apply(henc, tpw_ref, tpv_ref, tproj_dims,
                                   normalize=True, lang=i)
                r0 = row + i * batch
                o_ref[r0:r0 + batch, 0:out_dim] = temb

    return kernel


def _fused_call(kernel, args, n_out_rows, out_dim):
    rpad = _round_up(max(n_out_rows, 1), SUBLANE)
    cpad = _round_up(out_dim, LANE)
    vmem = pl.BlockSpec(memory_space=pltpu.MemorySpace.VMEM)
    return pl.pallas_call(
        kernel,
        out_shape=jax.ShapeDtypeStruct((rpad, cpad), jnp.float32),
        in_specs=[vmem] * len(args),
        out_specs=vmem,
    )(*args)


# --------------------------------- param init -----------------------------------

def _kaiming_fan_out(key, fan_in, fan_out):
    # kaiming_normal_(mode='fan_out', nonlinearity='relu') -> std = sqrt(2 / fan_out)
    std = math.sqrt(2.0 / fan_out)
    return std * jax.random.normal(key, (fan_in, fan_out), jnp.float32)


def init_packed_projection(key, in_dim, hid, out_dim, num_layers) -> Dict:
    """Pack an EnhancedProjection into 2 slabs: bf16 weights [Rw, 4h], f32 vectors [Rv, 4h]."""
    h4 = 4 * hid
    cw = h4
    keys = jax.random.split(key, 2 * num_layers + 2)

    def pad_cols(m, width):
        return jnp.pad(m, ((0, 0), (0, cw - width))) if width < cw else m

    w_rows = [pad_cols(_kaiming_fan_out(keys[0], in_dim, hid), hid)]
    ki = 1
    for _ in range(num_layers):
        w_rows.append(pad_cols(_kaiming_fan_out(keys[ki], hid, h4), h4)); ki += 1
        w_rows.append(pad_cols(_kaiming_fan_out(keys[ki], h4, hid), hid)); ki += 1
    w_rows.append(pad_cols(_kaiming_fan_out(keys[ki], hid, out_dim), out_dim))
    W = jnp.concatenate(w_rows, axis=0).astype(jnp.bfloat16)

    def vrow(vec):
        return jnp.pad(vec, (0, cw - vec.shape[0]))[None, :]

    zh, oh = jnp.zeros((hid,), jnp.float32), jnp.ones((hid,), jnp.float32)
    zo, oo = jnp.zeros((out_dim,), jnp.float32), jnp.ones((out_dim,), jnp.float32)
    v_rows = [vrow(zh), vrow(oh), vrow(zh)]                       # b_in, ln1_g, ln1_b
    for _ in range(num_layers):
        v_rows += [vrow(jnp.zeros((h4,), jnp.float32)),           # b1
                   vrow(zh), vrow(oh), vrow(zh)]                  # b2, ln_g, ln_b
    v_rows += [vrow(zo), vrow(oo), vrow(zo)]                      # b_out, lnf_g, lnf_b
    V = jnp.concatenate(v_rows, axis=0)
    return {"W": W, "V": V, "dims": (in_dim, hid, out_dim, num_layers)}


# --------------------------------- full model -----------------------------------

class MultilingualDualEncoderPallas:
    def __init__(self, key, video_input_dim=64, text_input_dim=48, output_dim=32,
                 languages=("chinese", "german"), vocab_size=100):
        self.languages: List[str] = list(languages)
        if self.languages != ["chinese", "german"]:
            raise ValueError("This implementation only supports ['chinese', 'german']")
        self.output_dim = output_dim
        D = video_input_dim
        ks = jax.random.split(key, 2 + 3 * len(self.languages))

        # VideoEncoder.input_norm (rows: gamma, beta)
        self.video_ln = jnp.stack([jnp.ones((D,), jnp.float32), jnp.zeros((D,), jnp.float32)])
        # VideoEncoder.projection: in=D, hidden=2*out, out=out, 3 layers
        self.video_enc = init_packed_projection(ks[0], D, output_dim * 2, output_dim, 3)
        # top-level video_projection: out -> 2*out -> out, 2 layers
        self.video_proj = init_packed_projection(ks[1], output_dim, output_dim * 2, output_dim, 2)

        tbls, enc_list, proj_list = [], [], []
        for i in range(len(self.languages)):
            k0, k1, k2 = ks[2 + 3 * i], ks[3 + 3 * i], ks[4 + 3 * i]
            # TODO(synk): pretrained BERT/XLM-R backbone replaced by deterministic embedding stub.
            tbls.append(0.02 * jax.random.normal(k0, (vocab_size, text_input_dim), jnp.float32))
            # LanguageSpecificEncoder.projection: hidden == backbone hidden, 2 layers
            enc_list.append(init_packed_projection(k1, text_input_dim, text_input_dim,
                                                   output_dim, 2))
            # top-level text_projections[lang]
            proj_list.append(init_packed_projection(k2, output_dim, output_dim * 2,
                                                    output_dim, 2))

        # Stack language params on a leading axis (statically indexed inside the kernel).
        self.text_tbl = jnp.stack(tbls).astype(jnp.bfloat16)      # [n_lang, V, H] bf16
        self.text_enc = {"W": jnp.stack([d["W"] for d in enc_list]),
                         "V": jnp.stack([d["V"] for d in enc_list]),
                         "dims": enc_list[0]["dims"]}
        self.text_proj = {"W": jnp.stack([d["W"] for d in proj_list]),
                          "V": jnp.stack([d["V"] for d in proj_list]),
                          "dims": proj_list[0]["dims"]}

    # ---------- helpers ----------
    def _video_args(self, video_features):
        return [video_features.astype(jnp.float32), self.video_ln,
                self.video_enc["W"], self.video_enc["V"],
                self.video_proj["W"], self.video_proj["V"]]

    def _gather_text_inputs(self, langs, text_inputs):
        max_s = max(int(text_inputs[l]["input_ids"].shape[1]) for l in langs)
        ids_list, mask_list = [], []
        for l in langs:
            ii = jnp.asarray(text_inputs[l]["input_ids"], jnp.int32)
            mm = jnp.asarray(text_inputs[l]["attention_mask"], jnp.float32)
            pad = max_s - ii.shape[1]
            if pad:
                ii = jnp.pad(ii, ((0, 0), (0, pad)))
                mm = jnp.pad(mm, ((0, 0), (0, pad)))
            ids_list.append(ii)
            mask_list.append(mm)
        return jnp.stack(ids_list), jnp.stack(mask_list)           # [n,B,S] i32, [n,B,S] f32

    def _select_lang_params(self, langs):
        if langs == self.languages:
            return (self.text_tbl, self.text_enc["W"], self.text_enc["V"],
                    self.text_proj["W"], self.text_proj["V"])
        idx = jnp.asarray([self.languages.index(l) for l in langs], jnp.int32)
        take = lambda a: jnp.take(a, idx, axis=0)
        return (take(self.text_tbl), take(self.text_enc["W"]), take(self.text_enc["V"]),
                take(self.text_proj["W"]), take(self.text_proj["V"]))

    # ---------- public API (each path is ONE pallas_call) ----------
    def encode_video(self, video_features):
        B = video_features.shape[0]
        kernel = _make_fused_kernel(
            has_video=True, n_langs=0, batch=B, out_dim=self.output_dim,
            venc_dims=self.video_enc["dims"], vproj_dims=self.video_proj["dims"])
        out = _fused_call(kernel, self._video_args(video_features), B, self.output_dim)
        return out[0:B, :self.output_dim]

    def encode_texts(self, text_inputs):
        langs = [l for l in self.languages if l in text_inputs]
        if not langs:
            return {}
        ids, mask = self._gather_text_inputs(langs, text_inputs)
        n, B, _ = ids.shape
        tbl, tew, tev, tpw, tpv = self._select_lang_params(langs)
        kernel = _make_fused_kernel(
            has_video=False, n_langs=n, batch=B, out_dim=self.output_dim,
            tenc_dims=self.text_enc["dims"], tproj_dims=self.text_proj["dims"])
        out = _fused_call(kernel, [ids, mask, tbl, tew, tev, tpw, tpv], n * B, self.output_dim)
        return {lang: out[i * B:(i + 1) * B, :self.output_dim] for i, lang in enumerate(langs)}

    def encode_text(self, input_ids, attention_mask, language):
        return self.encode_texts(
            {language: {"input_ids": input_ids, "attention_mask": attention_mask}})[language]

    def __call__(self, video_features, text_inputs):
        langs = [l for l in self.languages if l in text_inputs]
        B = video_features.shape[0]
        if langs and int(jnp.asarray(text_inputs[langs[0]]["input_ids"]).shape[0]) != B:
            # Differing video/text batch sizes: fall back to two launches.
            return {"video_embeddings": self.encode_video(video_features),
                    "text_embeddings": self.encode_texts(text_inputs)}

        args = self._video_args(video_features)
        n = len(langs)
        if n:
            ids, mask = self._gather_text_inputs(langs, text_inputs)
            tbl, tew, tev, tpw, tpv = self._select_lang_params(langs)
            args += [ids, mask, tbl, tew, tev, tpw, tpv]
        kernel = _make_fused_kernel(
            has_video=True, n_langs=n, batch=B, out_dim=self.output_dim,
            venc_dims=self.video_enc["dims"], vproj_dims=self.video_proj["dims"],
            tenc_dims=self.text_enc["dims"], tproj_dims=self.text_proj["dims"])
        out = _fused_call(kernel, args, (1 + n) * B, self.output_dim)   # single launch

        video_emb = out[0:B, :self.output_dim]
        text_embs = {lang: out[B + i * B:B + (i + 1) * B, :self.output_dim]
                     for i, lang in enumerate(langs)}
        return {"video_embeddings": video_emb, "text_embeddings": text_embs}


# ------------------------------------- main --------------------------------------

if __name__ == "__main__":
    B, T, SEQ = 2, 8, 6
    VIDEO_DIM, TEXT_HID, OUT_DIM, VOCAB = 64, 48, 32, 100

    root = jax.random.PRNGKey(0)
    k_model, k_vid, k_zh, k_de = jax.random.split(root, 4)

    model = MultilingualDualEncoderPallas(
        k_model, video_input_dim=VIDEO_DIM, text_input_dim=TEXT_HID,
        output_dim=OUT_DIM, languages=("chinese", "german"), vocab_size=VOCAB)

    video_features = jax.random.normal(k_vid, (B, T, VIDEO_DIM), jnp.float32)
    text_inputs = {
        "chinese": {
            "input_ids": jax.random.randint(k_zh, (B, SEQ), 0, VOCAB, jnp.int32),
            "attention_mask": jnp.ones((B, SEQ), jnp.int32).at[:, -1].set(0),
        },
        "german": {
            "input_ids": jax.random.randint(k_de, (B, SEQ), 0, VOCAB, jnp.int32),
            "attention_mask": jnp.ones((B, SEQ), jnp.int32),
        },
    }

    out = model(video_features, text_inputs)
    out = jax.tree_util.tree_map(jax.block_until_ready, out)

    v = out["video_embeddings"]
    assert v.shape == (B, OUT_DIM)
    assert bool(jnp.all(jnp.isfinite(v)))
    assert bool(jnp.allclose(jnp.linalg.norm(v, axis=-1), 1.0, atol=1e-4))
    for lang in ("chinese", "german"):
        t = out["text_embeddings"][lang]
        assert t.shape == (B, OUT_DIM)
        assert bool(jnp.all(jnp.isfinite(t)))
        assert bool(jnp.allclose(jnp.linalg.norm(t, axis=-1), 1.0, atol=1e-4))

    print("KERNEL_OK")
</pallas_src>

<mosaic_0001>
module attributes {stable_mosaic.version = 11 : i64} {
  func.func @kernel(%arg0: memref<2x8x64xf32, #tpu.memory_space<vmem>>, %arg1: memref<2x64xf32, #tpu.memory_space<vmem>>, %arg2: memref<1088x256xbf16, #tpu.memory_space<vmem>>, %arg3: memref<18x256xf32, #tpu.memory_space<vmem>>, %arg4: memref<736x256xbf16, #tpu.memory_space<vmem>>, %arg5: memref<14x256xf32, #tpu.memory_space<vmem>>, %arg6: memref<2x2x6xi32, #tpu.memory_space<vmem>>, %arg7: memref<2x2x6xf32, #tpu.memory_space<vmem>>, %arg8: memref<2x100x48xbf16, #tpu.memory_space<vmem>>, %arg9: memref<2x576x192xbf16, #tpu.memory_space<vmem>>, %arg10: memref<2x14x192xf32, #tpu.memory_space<vmem>>, %arg11: memref<2x736x256xbf16, #tpu.memory_space<vmem>>, %arg12: memref<2x14x256xf32, #tpu.memory_space<vmem>>, %arg13: memref<8x128xf32, #tpu.memory_space<vmem>>) attributes {dimension_semantics = [], scalar_prefetch = 0 : i64, scratch_operands = 0 : i64, tpu.core_type = #tpu.core_type<tc>} {
    %cst = arith.constant 0.000000e+00 : f32
    %0 = vector.broadcast %cst : f32 to vector<8x128xf32>
    %c0 = arith.constant 0 : index
    %c0_0 = arith.constant 0 : index
    %1 = vector.load %arg13[%c0, %c0_0] : memref<8x128xf32, #tpu.memory_space<vmem>>, vector<8x128xf32>
    tpu.vector_store %arg13[%c0, %c0_0], %0 {strides = array<i32>} : memref<8x128xf32, #tpu.memory_space<vmem>>, vector<8x128xf32>,
    %c0_1 = arith.constant 0 : index
    %c0_2 = arith.constant 0 : index
    %c0_3 = arith.constant 0 : index
    %2 = vector.load %arg0[%c0_1, %c0_2, %c0_3] : memref<2x8x64xf32, #tpu.memory_space<vmem>>, vector<2x8x64xf32>
    %c0_4 = arith.constant 0 : index
    %c0_5 = arith.constant 0 : index
    %3 = vector.load %arg1[%c0_4, %c0_5] : memref<2x64xf32, #tpu.memory_space<vmem>>, vector<1x64xf32>
    %c1 = arith.constant 1 : index
    %c0_6 = arith.constant 0 : index
    %4 = vector.load %arg1[%c1, %c0_6] : memref<2x64xf32, #tpu.memory_space<vmem>>, vector<1x64xf32>
    %cst_7 = arith.constant dense<0.000000e+00> : vector<2x8xf32>
    %5 = vector.multi_reduction <add>, %2, %cst_7 [2] : vector<2x8x64xf32> to vector<2x8xf32>
    %6 = vector.shape_cast %5 : vector<2x8xf32> to vector<2x8x1xf32>
    %cst_8 = arith.constant 6.400000e+01 : f32
    %7 = vector.broadcast %cst_8 : f32 to vector<2x8x1xf32>
    %8 = arith.divf %6, %7 : vector<2x8x1xf32>
    %9 = vector.broadcast %8 : vector<2x8x1xf32> to vector<2x8x64xf32>
    %10 = arith.subf %2, %9 : vector<2x8x64xf32>
    %11 = arith.mulf %10, %10 : vector<2x8x64xf32>
    %cst_9 = arith.constant dense<0.000000e+00> : vector<2x8xf32>
    %12 = vector.multi_reduction <add>, %11, %cst_9 [2] : vector<2x8x64xf32> to vector<2x8xf32>
    %13 = vector.shape_cast %12 : vector<2x8xf32> to vector<2x8x1xf32>
    %cst_10 = arith.constant 6.400000e+01 : f32
    %14 = vector.broadcast %cst_10 : f32 to vector<2x8x1xf32>
    %15 = arith.divf %13, %14 : vector<2x8x1xf32>
    %16 = vector.broadcast %8 : vector<2x8x1xf32> to vector<2x8x64xf32>
    %17 = arith.subf %2, %16 : vector<2x8x64xf32>
    %cst_11 = arith.constant 9.99999974E-6 : f32
    %18 = vector.broadcast %cst_11 : f32 to vector<2x8x1xf32>
    %19 = arith.addf %15, %18 : vector<2x8x1xf32>
    %20 = math.rsqrt %19 : vector<2x8x1xf32>
    %21 = vector.broadcast %20 : vector<2x8x1xf32> to vector<2x8x64xf32>
    %22 = arith.mulf %17, %21 : vector<2x8x64xf32>
    %23 = vector.shape_cast %3 : vector<1x64xf32> to vector<1x1x64xf32>
    %24 = vector.broadcast %23 : vector<1x1x64xf32> to vector<2x8x64xf32>
    %25 = arith.mulf %22, %24 : vector<2x8x64xf32>
    %26 = vector.shape_cast %4 : vector<1x64xf32> to vector<1x1x64xf32>
    %27 = vector.broadcast %26 : vector<1x1x64xf32> to vector<2x8x64xf32>
    %28 = arith.addf %25, %27 : vector<2x8x64xf32>
    %cst_12 = arith.constant -1.000000e+00 : f32
    %cst_13 = arith.constant 1.000000e+00 : f32
    %29 = vector.broadcast %cst_12 : f32 to vector<2x8x64xf32>
    %30 = arith.maximumf %29, %28 : vector<2x8x64xf32>
    %31 = vector.broadcast %cst_13 : f32 to vector<2x8x64xf32>
    %32 = arith.minimumf %31, %30 : vector<2x8x64xf32>
    %cst_14 = arith.constant dense<0.000000e+00> : vector<2x64xf32>
    %33 = vector.multi_reduction <add>, %32, %cst_14 [1] : vector<2x8x64xf32> to vector<2x64xf32>
    %cst_15 = arith.constant 8.000000e+00 : f32
    %34 = vector.broadcast %cst_15 : f32 to vector<2x64xf32>
    %35 = arith.divf %33, %34 : vector<2x64xf32>
    %36 = vector.shape_cast %35 : vector<2x64xf32> to vector<2x1x64xf32>
    %37 = vector.broadcast %36 : vector<2x1x64xf32> to vector<2x8x64xf32>
    %38 = arith.mulf %32, %37 : vector<2x8x64xf32>
    %cst_16 = arith.constant dense<0.000000e+00> : vector<2x8xf32>
    %39 = vector.multi_reduction <add>, %38, %cst_16 [2] : vector<2x8x64xf32> to vector<2x8xf32>
    %cst_17 = arith.constant dense<0xFF800000> : vector<2xf32>
    %40 = vector.multi_reduction <maximumf>, %39, %cst_17 [1] : vector<2x8xf32> to vector<2xf32>
    %41 = vector.shape_cast %40 : vector<2xf32> to vector<2x1xf32>
    %42 = vector.broadcast %41 : vector<2x1xf32> to vector<2x8xf32>
    %43 = arith.subf %39, %42 : vector<2x8xf32>
    %44 = math.exp %43 : vector<2x8xf32>
    %cst_18 = arith.constant dense<0.000000e+00> : vector<2xf32>
    %45 = vector.multi_reduction <add>, %44, %cst_18 [1] : vector<2x8xf32> to vector<2xf32>
    %46 = vector.shape_cast %45 : vector<2xf32> to vector<2x1xf32>
    %47 = tpu.reciprocal %46 {approx = true} : vector<2x1xf32> -> vector<2x1xf32>
    %48 = vector.broadcast %47 : vector<2x1xf32> to vector<2x8xf32>
    %49 = arith.mulf %44, %48 : vector<2x8xf32>
    %cst_19 = arith.constant 1.000000e-01 : f32
    %50 = vector.broadcast %cst_19 : f32 to vector<2x8xf32>
    %51 = arith.mulf %50, %49 : vector<2x8xf32>
    %cst_20 = arith.constant dense<0.000000e+00> : vector<2xf32>
    %52 = vector.multi_reduction <add>, %49, %cst_20 [1] : vector<2x8xf32> to vector<2xf32>
    %53 = vector.shape_cast %52 : vector<2xf32> to vector<2x1xf32>
    %cst_21 = arith.constant 8.000000e+00 : f32
    %54 = vector.broadcast %cst_21 : f32 to vector<2x1xf32>
    %55 = arith.divf %53, %54 : vector<2x1xf32>
    %56 = vector.broadcast %55 : vector<2x1xf32> to vector<2x8xf32>
    %57 = arith.mulf %51, %56 : vector<2x8xf32>
    %58 = arith.subf %49, %57 : vector<2x8xf32>
    %cst_22 = arith.constant dense<0xFF800000> : vector<2xf32>
    %59 = vector.multi_reduction <maximumf>, %58, %cst_22 [1] : vector<2x8xf32> to vector<2xf32>
    %60 = vector.shape_cast %59 : vector<2xf32> to vector<2x1xf32>
    %61 = vector.broadcast %60 : vector<2x1xf32> to vector<2x8xf32>
    %62 = arith.subf %58, %61 : vector<2x8xf32>
    %63 = math.exp %62 : vector<2x8xf32>
    %cst_23 = arith.constant dense<0.000000e+00> : vector<2xf32>
    %64 = vector.multi_reduction <add>, %63, %cst_23 [1] : vector<2x8xf32> to vector<2xf32>
    %65 = vector.shape_cast %64 : vector<2xf32> to vector<2x1xf32>
    %66 = tpu.reciprocal %65 {approx = true} : vector<2x1xf32> -> vector<2x1xf32>
    %67 = vector.broadcast %66 : vector<2x1xf32> to vector<2x8xf32>
    %68 = arith.mulf %63, %67 : vector<2x8xf32>
    %69 = vector.shape_cast %68 : vector<2x8xf32> to vector<2x8x1xf32>
    %70 = vector.broadcast %69 : vector<2x8x1xf32> to vector<2x8x64xf32>
    %71 = arith.mulf %32, %70 : vector<2x8x64xf32>
    %cst_24 = arith.constant dense<0.000000e+00> : vector<2x64xf32>
    %72 = vector.multi_reduction <add>, %71, %cst_24 [1] : vector<2x8x64xf32> to vector<2x64xf32>
    %c0_25 = arith.constant 0 : index
    %c0_26 = arith.constant 0 : index
    %73 = vector.load %arg2[%c0_25, %c0_26] : memref<1088x256xbf16, #tpu.memory_space<vmem>>, vector<64x64xbf16>
    %74 = arith.truncf %72 : vector<2x64xf32> to vector<2x64xbf16>
    %cst_27 = arith.constant dense<0.000000e+00> : vector<2x64xf32>
    %75 = tpu.matmul %74, %73, %cst_27 {dimension_numbers = #tpu.dot_dimension_numbers<[1], [0], [0], [1], [0, 0, 1, 1], [], []>} : vector<2x64xbf16>, vector<64x64xbf16>, vector<2x64xf32> -> vector<2x64xf32>
    %c0_28 = arith.constant 0 : index
    %c0_29 = arith.constant 0 : index
    %76 = vector.load %arg3[%c0_28, %c0_29] : memref<18x256xf32, #tpu.memory_space<vmem>>, vector<1x64xf32>
    %77 = vector.broadcast %76 : vector<1x64xf32> to vector<2x64xf32>
    %78 = arith.addf %75, %77 : vector<2x64xf32>
    %c1_30 = arith.constant 1 : index
    %c0_31 = arith.constant 0 : index
    %79 = vector.load %arg3[%c1_30, %c0_31] : memref<18x256xf32, #tpu.memory_space<vmem>>, vector<1x64xf32>
    %c2 = arith.constant 2 : index
    %c0_32 = arith.constant 0 : index
    %80 = vector.load %arg3[%c2, %c0_32] : memref<18x256xf32, #tpu.memory_space<vmem>>, vector<1x64xf32>
    %cst_33 = arith.constant dense<0.000000e+00> : vector<2xf32>
    %81 = vector.multi_reduction <add>, %78, %cst_33 [1] : vector<2x64xf32> to vector<2xf32>
    %82 = vector.shape_cast %81 : vector<2xf32> to vector<2x1xf32>
    %cst_34 = arith.constant 6.400000e+01 : f32
    %83 = vector.broadcast %cst_34 : f32 to vector<2x1xf32>
    %84 = arith.divf %82, %83 : vector<2x1xf32>
    %85 = vector.broadcast %84 : vector<2x1xf32> to vector<2x64xf32>
    %86 = arith.subf %78, %85 : vector<2x64xf32>
    %87 = arith.mulf %86, %86 : vector<2x64xf32>
    %cst_35 = arith.constant dense<0.000000e+00> : vector<2xf32>
    %88 = vector.multi_reduction <add>, %87, %cst_35 [1] : vector<2x64xf32> to vector<2xf32>
    %89 = vector.shape_cast %88 : vector<2xf32> to vector<2x1xf32>
    %cst_36 = arith.constant 6.400000e+01 : f32
    %90 = vector.broadcast %cst_36 : f32 to vector<2x1xf32>
    %91 = arith.divf %89, %90 : vector<2x1xf32>
    %92 = vector.broadcast %84 : vector<2x1xf32> to vector<2x64xf32>
    %93 = arith.subf %78, %92 : vector<2x64xf32>
    %cst_37 = arith.constant 9.99999974E-6 : f32
    %94 = vector.broadcast %cst_37 : f32 to vector<2x1xf32>
    %95 = arith.addf %91, %94 : vector<2x1xf32>
    %96 = math.rsqrt %95 : vector<2x1xf32>
    %97 = vector.broadcast %96 : vector<2x1xf32> to vector<2x64xf32>
    %98 = arith.mulf %93, %97 : vector<2x64xf32>
    %99 = vector.broadcast %79 : vector<1x64xf32> to vector<2x64xf32>
    %100 = arith.mulf %98, %99 : vector<2x64xf32>
    %101 = vector.broadcast %80 : vector<1x64xf32> to vector<2x64xf32>
    %102 = arith.addf %100, %101 : vector<2x64xf32>
    %c64 = arith.constant 64 : index
    %c0_38 = arith.constant 0 : index
    %103 = vector.load %arg2[%c64, %c0_38] : memref<1088x256xbf16, #tpu.memory_space<vmem>>, vector<64x256xbf16>
    %104 = arith.truncf %102 : vector<2x64xf32> to vector<2x64xbf16>
    %cst_39 = arith.constant dense<0.000000e+00> : vector<2x256xf32>
    %105 = tpu.matmul %104, %103, %cst_39 {dimension_numbers = #tpu.dot_dimension_numbers<[1], [0], [0], [1], [0, 0, 1, 1], [], []>} : vector<2x64xbf16>, vector<64x256xbf16>, vector<2x256xf32> -> vector<2x256xf32>
    %c3 = arith.constant 3 : index
    %c0_40 = arith.constant 0 : index
    %106 = vector.load %arg3[%c3, %c0_40] : memref<18x256xf32, #tpu.memory_space<vmem>>, vector<1x256xf32>
    %107 = vector.broadcast %106 : vector<1x256xf32> to vector<2x256xf32>
    %108 = arith.addf %105, %107 : vector<2x256xf32>
    %cst_41 = arith.constant 5.000000e-01 : f32
    %109 = vector.broadcast %cst_41 : f32 to vector<2x256xf32>
    %110 = arith.mulf %109, %108 : vector<2x256xf32>
    %cst_42 = arith.constant 0.707106769 : f32
    %111 = vector.broadcast %cst_42 : f32 to vector<2x256xf32>
    %112 = arith.mulf %108, %111 : vector<2x256xf32>
    %113 = math.erf %112 : vector<2x256xf32>
    %cst_43 = arith.constant 1.000000e+00 : f32
    %114 = vector.broadcast %cst_43 : f32 to vector<2x256xf32>
    %115 = arith.addf %114, %113 : vector<2x256xf32>
    %116 = arith.mulf %110, %115 : vector<2x256xf32>
    %c128 = arith.constant 128 : index
    %c0_44 = arith.constant 0 : index
    %117 = vector.load %arg2[%c128, %c0_44] : memref<1088x256xbf16, #tpu.memory_space<vmem>>, vector<256x64xbf16>
    %118 = arith.truncf %116 : vector<2x256xf32> to vector<2x256xbf16>
    %cst_45 = arith.constant dense<0.000000e+00> : vector<2x64xf32>
    %119 = tpu.matmul %118, %117, %cst_45 {dimension_numbers = #tpu.dot_dimension_numbers<[1], [0], [0], [1], [0, 0, 1, 1], [], []>} : vector<2x256xbf16>, vector<256x64xbf16>, vector<2x64xf32> -> vector<2x64xf32>
    %c4 = arith.constant 4 : index
    %c0_46 = arith.constant 0 : index
    %120 = vector.load %arg3[%c4, %c0_46] : memref<18x256xf32, #tpu.memory_space<vmem>>, vector<1x64xf32>
    %121 = vector.broadcast %120 : vector<1x64xf32> to vector<2x64xf32>
    %122 = arith.addf %119, %121 : vector<2x64xf32>
    %123 = arith.addf %122, %102 : vector<2x64xf32>
    %c5 = arith.constant 5 : index
    %c0_47 = arith.constant 0 : index
    %124 = vector.load %arg3[%c5, %c0_47] : memref<18x256xf32, #tpu.memory_space<vmem>>, vector<1x64xf32>
    %c6 = arith.constant 6 : index
    %c0_48 = arith.constant 0 : index
    %125 = vector.load %arg3[%c6, %c0_48] : memref<18x256xf32, #tpu.memory_space<vmem>>, vector<1x64xf32>
    %cst_49 = arith.constant dense<0.000000e+00> : vector<2xf32>
    %126 = vector.multi_reduction <add>, %123, %cst_49 [1] : vector<2x64xf32> to vector<2xf32>
    %127 = vector.shape_cast %126 : vector<2xf32> to vector<2x1xf32>
    %cst_50 = arith.constant 6.400000e+01 : f32
    %128 = vector.broadcast %cst_50 : f32 to vector<2x1xf32>
    %129 = arith.divf %127, %128 : vector<2x1xf32>
    %130 = vector.broadcast %129 : vector<2x1xf32> to vector<2x64xf32>
    %131 = arith.subf %123, %130 : vector<2x64xf32>
    %132 = arith.mulf %131, %131 : vector<2x64xf32>
    %cst_51 = arith.constant dense<0.000000e+00> : vector<2xf32>
    %133 = vector.multi_reduction <add>, %132, %cst_51 [1] : vector<2x64xf32> to vector<2xf32>
    %134 = vector.shape_cast %133 : vector<2xf32> to vector<2x1xf32>
    %cst_52 = arith.constant 6.400000e+01 : f32
    %135 = vector.broadcast %cst_52 : f32 to vector<2x1xf32>
    %136 = arith.divf %134, %135 : vector<2x1xf32>
    %137 = vector.broadcast %129 : vector<2x1xf32> to vector<2x64xf32>
    %138 = arith.subf %123, %137 : vector<2x64xf32>
    %cst_53 = arith.constant 9.99999974E-6 : f32
    %139 = vector.broadcast %cst_53 : f32 to vector<2x1xf32>
    %140 = arith.addf %136, %139 : vector<2x1xf32>
    %141 = math.rsqrt %140 : vector<2x1xf32>
    %142 = vector.broadcast %141 : vector<2x1xf32> to vector<2x64xf32>
    %143 = arith.mulf %138, %142 : vector<2x64xf32>
    %144 = vector.broadcast %124 : vector<1x64xf32> to vector<2x64xf32>
    %145 = arith.mulf %143, %144 : vector<2x64xf32>
    %146 = vector.broadcast %125 : vector<1x64xf32> to vector<2x64xf32>
    %147 = arith.addf %145, %146 : vector<2x64xf32>
    %c384 = arith.constant 384 : index
    %c0_54 = arith.constant 0 : index
    %148 = vector.load %arg2[%c384, %c0_54] : memref<1088x256xbf16, #tpu.memory_space<vmem>>, vector<64x256xbf16>
    %149 = arith.truncf %147 : vector<2x64xf32> to vector<2x64xbf16>
    %cst_55 = arith.constant dense<0.000000e+00> : vector<2x256xf32>
    %150 = tpu.matmul %149, %148, %cst_55 {dimension_numbers = #tpu.dot_dimension_numbers<[1], [0], [0], [1], [0, 0, 1, 1], [], []>} : vector<2x64xbf16>, vector<64x256xbf16>, vector<2x256xf32> -> vector<2x256xf32>
    %c7 = arith.constant 7 : index
    %c0_56 = arith.constant 0 : index
    %151 = vector.load %arg3[%c7, %c0_56] : memref<18x256xf32, #tpu.memory_space<vmem>>, vector<1x256xf32>
    %152 = vector.broadcast %151 : vector<1x256xf32> to vector<2x256xf32>
    %153 = arith.addf %150, %152 : vector<2x256xf32>
    %cst_57 = arith.constant 5.000000e-01 : f32
    %154 = vector.broadcast %cst_57 : f32 to vector<2x256xf32>
    %155 = arith.mulf %154, %153 : vector<2x256xf32>
    %cst_58 = arith.constant 0.707106769 : f32
    %156 = vector.broadcast %cst_58 : f32 to vector<2x256xf32>
    %157 = arith.mulf %153, %156 : vector<2x256xf32>
    %158 = math.erf %157 : vector<2x256xf32>
    %cst_59 = arith.constant 1.000000e+00 : f32
    %159 = vector.broadcast %cst_59 : f32 to vector<2x256xf32>
    %160 = arith.addf %159, %158 : vector<2x256xf32>
    %161 = arith.mulf %155, %160 : vector<2x256xf32>
    %c448 = arith.constant 448 : index
    %c0_60 = arith.constant 0 : index
    %162 = vector.load %arg2[%c448, %c0_60] : memref<1088x256xbf16, #tpu.memory_space<vmem>>, vector<256x64xbf16>
    %163 = arith.truncf %161 : vector<2x256xf32> to vector<2x256xbf16>
    %cst_61 = arith.constant dense<0.000000e+00> : vector<2x64xf32>
    %164 = tpu.matmul %163, %162, %cst_61 {dimension_numbers = #tpu.dot_dimension_numbers<[1], [0], [0], [1], [0, 0, 1, 1], [], []>} : vector<2x256xbf16>, vector<256x64xbf16>, vector<2x64xf32> -> vector<2x64xf32>
    %c8 = arith.constant 8 : index
    %c0_62 = arith.constant 0 : index
    %165 = vector.load %arg3[%c8, %c0_62] : memref<18x256xf32, #tpu.memory_space<vmem>>, vector<1x64xf32>
    %166 = vector.broadcast %165 : vector<1x64xf32> to vector<2x64xf32>
    %167 = arith.addf %164, %166 : vector<2x64xf32>
    %168 = arith.addf %167, %147 : vector<2x64xf32>
    %c9 = arith.constant 9 : index
    %c0_63 = arith.constant 0 : index
    %169 = vector.load %arg3[%c9, %c0_63] : memref<18x256xf32, #tpu.memory_space<vmem>>, vector<1x64xf32>
    %c10 = arith.constant 10 : index
    %c0_64 = arith.constant 0 : index
    %170 = vector.load %arg3[%c10, %c0_64] : memref<18x256xf32, #tpu.memory_space<vmem>>, vector<1x64xf32>
    %cst_65 = arith.constant dense<0.000000e+00> : vector<2xf32>
    %171 = vector.multi_reduction <add>, %168, %cst_65 [1] : vector<2x64xf32> to vector<2xf32>
    %172 = vector.shape_cast %171 : vector<2xf32> to vector<2x1xf32>
    %cst_66 = arith.constant 6.400000e+01 : f32
    %173 = vector.broadcast %cst_66 : f32 to vector<2x1xf32>
    %174 = arith.divf %172, %173 : vector<2x1xf32>
    %175 = vector.broadcast %174 : vector<2x1xf32> to vector<2x64xf32>
    %176 = arith.subf %168, %175 : vector<2x64xf32>
    %177 = arith.mulf %176, %176 : vector<2x64xf32>
    %cst_67 = arith.constant dense<0.000000e+00> : vector<2xf32>
    %178 = vector.multi_reduction <add>, %177, %cst_67 [1] : vector<2x64xf32> to vector<2xf32>
    %179 = vector.shape_cast %178 : vector<2xf32> to vector<2x1xf32>
    %cst_68 = arith.constant 6.400000e+01 : f32
    %180 = vector.broadcast %cst_68 : f32 to vector<2x1xf32>
    %181 = arith.divf %179, %180 : vector<2x1xf32>
    %182 = vector.broadcast %174 : vector<2x1xf32> to vector<2x64xf32>
    %183 = arith.subf %168, %182 : vector<2x64xf32>
    %cst_69 = arith.constant 9.99999974E-6 : f32
    %184 = vector.broadcast %cst_69 : f32 to vector<2x1xf32>
    %185 = arith.addf %181, %184 : vector<2x1xf32>
    %186 = math.rsqrt %185 : vector<2x1xf32>
    %187 = vector.broadcast %186 : vector<2x1xf32> to vector<2x64xf32>
    %188 = arith.mulf %183, %187 : vector<2x64xf32>
    %189 = vector.broadcast %169 : vector<1x64xf32> to vector<2x64xf32>
    %190 = arith.mulf %188, %189 : vector<2x64xf32>
    %191 = vector.broadcast %170 : vector<1x64xf32> to vector<2x64xf32>
    %192 = arith.addf %190, %191 : vector<2x64xf32>
    %c704 = arith.constant 704 : index
    %c0_70 = arith.constant 0 : index
    %193 = vector.load %arg2[%c704, %c0_70] : memref<1088x256xbf16, #tpu.memory_space<vmem>>, vector<64x256xbf16>
    %194 = arith.truncf %192 : vector<2x64xf32> to vector<2x64xbf16>
    %cst_71 = arith.constant dense<0.000000e+00> : vector<2x256xf32>
    %195 = tpu.matmul %194, %193, %cst_71 {dimension_numbers = #tpu.dot_dimension_numbers<[1], [0], [0], [1], [0, 0, 1, 1], [], []>} : vector<2x64xbf16>, vector<64x256xbf16>, vector<2x256xf32> -> vector<2x256xf32>
    %c11 = arith.constant 11 : index
    %c0_72 = arith.constant 0 : index
    %196 = vector.load %arg3[%c11, %c0_72] : memref<18x256xf32, #tpu.memory_space<vmem>>, vector<1x256xf32>
    %197 = vector.broadcast %196 : vector<1x256xf32> to vector<2x256xf32>
    %198 = arith.addf %195, %197 : vector<2x256xf32>
    %cst_73 = arith.constant 5.000000e-01 : f32
    %199 = vector.broadcast %cst_73 : f32 to vector<2x256xf32>
    %200 = arith.mulf %199, %198 : vector<2x256xf32>
    %cst_74 = arith.constant 0.707106769 : f32
    %201 = vector.broadcast %cst_74 : f32 to vector<2x256xf32>
    %202 = arith.mulf %198, %201 : vector<2x256xf32>
    %203 = math.erf %202 : vector<2x256xf32>
    %cst_75 = arith.constant 1.000000e+00 : f32
    %204 = vector.broadcast %cst_75 : f32 to vector<2x256xf32>
    %205 = arith.addf %204, %203 : vector<2x256xf32>
    %206 = arith.mulf %200, %205 : vector<2x256xf32>
    %c768 = arith.constant 768 : index
    %c0_76 = arith.constant 0 : index
    %207 = vector.load %arg2[%c768, %c0_76] : memref<1088x256xbf16, #tpu.memory_space<vmem>>, vector<256x64xbf16>
    %208 = arith.truncf %206 : vector<2x256xf32> to vector<2x256xbf16>
    %cst_77 = arith.constant dense<0.000000e+00> : vector<2x64xf32>
    %209 = tpu.matmul %208, %207, %cst_77 {dimension_numbers = #tpu.dot_dimension_numbers<[1], [0], [0], [1], [0, 0, 1, 1], [], []>} : vector<2x256xbf16>, vector<256x64xbf16>, vector<2x64xf32> -> vector<2x64xf32>
    %c12 = arith.constant 12 : index
    %c0_78 = arith.constant 0 : index
    %210 = vector.load %arg3[%c12, %c0_78] : memref<18x256xf32, #tpu.memory_space<vmem>>, vector<1x64xf32>
    %211 = vector.broadcast %210 : vector<1x64xf32> to vector<2x64xf32>
    %212 = arith.addf %209, %211 : vector<2x64xf32>
    %213 = arith.addf %212, %192 : vector<2x64xf32>
    %c13 = arith.constant 13 : index
    %c0_79 = arith.constant 0 : index
    %214 = vector.load %arg3[%c13, %c0_79] : memref<18x256xf32, #tpu.memory_space<vmem>>, vector<1x64xf32>
    %c14 = arith.constant 14 : index
    %c0_80 = arith.constant 0 : index
    %215 = vector.load %arg3[%c14, %c0_80] : memref<18x256xf32, #tpu.memory_space<vmem>>, vector<1x64xf32>
    %cst_81 = arith.constant dense<0.000000e+00> : vector<2xf32>
    %216 = vector.multi_reduction <add>, %213, %cst_81 [1] : vector<2x64xf32> to vector<2xf32>
    %217 = vector.shape_cast %216 : vector<2xf32> to vector<2x1xf32>
    %cst_82 = arith.constant 6.400000e+01 : f32
    %218 = vector.broadcast %cst_82 : f32 to vector<2x1xf32>
    %219 = arith.divf %217, %218 : vector<2x1xf32>
    %220 = vector.broadcast %219 : vector<2x1xf32> to vector<2x64xf32>
    %221 = arith.subf %213, %220 : vector<2x64xf32>
    %222 = arith.mulf %221, %221 : vector<2x64xf32>
    %cst_83 = arith.constant dense<0.000000e+00> : vector<2xf32>
    %223 = vector.multi_reduction <add>, %222, %cst_83 [1] : vector<2x64xf32> to vector<2xf32>
    %224 = vector.shape_cast %223 : vector<2xf32> to vector<2x1xf32>
    %cst_84 = arith.constant 6.400000e+01 : f32
    %225 = vector.broadcast %cst_84 : f32 to vector<2x1xf32>
    %226 = arith.divf %224, %225 : vector<2x1xf32>
    %227 = vector.broadcast %219 : vector<2x1xf32> to vector<2x64xf32>
    %228 = arith.subf %213, %227 : vector<2x64xf32>
    %cst_85 = arith.constant 9.99999974E-6 : f32
    %229 = vector.broadcast %cst_85 : f32 to vector<2x1xf32>
    %230 = arith.addf %226, %229 : vector<2x1xf32>
    %231 = math.rsqrt %230 : vector<2x1xf32>
    %232 = vector.broadcast %231 : vector<2x1xf32> to vector<2x64xf32>
    %233 = arith.mulf %228, %232 : vector<2x64xf32>
    %234 = vector.broadcast %214 : vector<1x64xf32> to vector<2x64xf32>
    %235 = arith.mulf %233, %234 : vector<2x64xf32>
    %236 = vector.broadcast %215 : vector<1x64xf32> to vector<2x64xf32>
    %237 = arith.addf %235, %236 : vector<2x64xf32>
    %c1024 = arith.constant 1024 : index
    %c0_86 = arith.constant 0 : index
    %238 = vector.load %arg2[%c1024, %c0_86] : memref<1088x256xbf16, #tpu.memory_space<vmem>>, vector<64x32xbf16>
    %239 = arith.truncf %237 : vector<2x64xf32> to vector<2x64xbf16>
    %cst_87 = arith.constant dense<0.000000e+00> : vector<2x32xf32>
    %240 = tpu.matmul %239, %238, %cst_87 {dimension_numbers = #tpu.dot_dimension_numbers<[1], [0], [0], [1], [0, 0, 1, 1], [], []>} : vector<2x64xbf16>, vector<64x32xbf16>, vector<2x32xf32> -> vector<2x32xf32>
    %c15 = arith.constant 15 : index
    %c0_88 = arith.constant 0 : index
    %241 = vector.load %arg3[%c15, %c0_88] : memref<18x256xf32, #tpu.memory_space<vmem>>, vector<1x32xf32>
    %242 = vector.broadcast %241 : vector<1x32xf32> to vector<2x32xf32>
    %243 = arith.addf %240, %242 : vector<2x32xf32>
    %c16 = arith.constant 16 : index
    %c0_89 = arith.constant 0 : index
    %244 = vector.load %arg3[%c16, %c0_89] : memref<18x256xf32, #tpu.memory_space<vmem>>, vector<1x32xf32>
    %c17 = arith.constant 17 : index
    %c0_90 = arith.constant 0 : index
    %245 = vector.load %arg3[%c17, %c0_90] : memref<18x256xf32, #tpu.memory_space<vmem>>, vector<1x32xf32>
    %cst_91 = arith.constant dense<0.000000e+00> : vector<2xf32>
    %246 = vector.multi_reduction <add>, %243, %cst_91 [1] : vector<2x32xf32> to vector<2xf32>
    %247 = vector.shape_cast %246 : vector<2xf32> to vector<2x1xf32>
    %cst_92 = arith.constant 3.200000e+01 : f32
    %248 = vector.broadcast %cst_92 : f32 to vector<2x1xf32>
    %249 = arith.divf %247, %248 : vector<2x1xf32>
    %250 = vector.broadcast %249 : vector<2x1xf32> to vector<2x32xf32>
    %251 = arith.subf %243, %250 : vector<2x32xf32>
    %252 = arith.mulf %251, %251 : vector<2x32xf32>
    %cst_93 = arith.constant dense<0.000000e+00> : vector<2xf32>
    %253 = vector.multi_reduction <add>, %252, %cst_93 [1] : vector<2x32xf32> to vector<2xf32>
    %254 = vector.shape_cast %253 : vector<2xf32> to vector<2x1xf32>
    %cst_94 = arith.constant 3.200000e+01 : f32
    %255 = vector.broadcast %cst_94 : f32 to vector<2x1xf32>
    %256 = arith.divf %254, %255 : vector<2x1xf32>
    %257 = vector.broadcast %249 : vector<2x1xf32> to vector<2x32xf32>
    %258 = arith.subf %243, %257 : vector<2x32xf32>
    %cst_95 = arith.constant 9.99999974E-6 : f32
    %259 = vector.broadcast %cst_95 : f32 to vector<2x1xf32>
    %260 = arith.addf %256, %259 : vector<2x1xf32>
    %261 = math.rsqrt %260 : vector<2x1xf32>
    %262 = vector.broadcast %261 : vector<2x1xf32> to vector<2x32xf32>
    %263 = arith.mulf %258, %262 : vector<2x32xf32>
    %264 = vector.broadcast %244 : vector<1x32xf32> to vector<2x32xf32>
    %265 = arith.mulf %263, %264 : vector<2x32xf32>
    %266 = vector.broadcast %245 : vector<1x32xf32> to vector<2x32xf32>
    %267 = arith.addf %265, %266 : vector<2x32xf32>
    %268 = arith.mulf %267, %267 : vector<2x32xf32>
    %cst_96 = arith.constant dense<0.000000e+00> : vector<2xf32>
    %269 = vector.multi_reduction <add>, %268, %cst_96 [1] : vector<2x32xf32> to vector<2xf32>
    %270 = vector.shape_cast %269 : vector<2xf32> to vector<2x1xf32>
    %cst_97 = arith.constant 1.000000e-24 : f32
    %271 = vector.broadcast %cst_97 : f32 to vector<2x1xf32>
    %272 = arith.maximumf %270, %271 : vector<2x1xf32>
    %273 = math.rsqrt %272 : vector<2x1xf32>
    %274 = vector.broadcast %273 : vector<2x1xf32> to vector<2x32xf32>
    %275 = arith.mulf %267, %274 : vector<2x32xf32>
    %c0_98 = arith.constant 0 : index
    %c0_99 = arith.constant 0 : index
    %276 = vector.load %arg4[%c0_98, %c0_99] : memref<736x256xbf16, #tpu.memory_space<vmem>>, vector<32x64xbf16>
    %277 = arith.truncf %275 : vector<2x32xf32> to vector<2x32xbf16>
    %cst_100 = arith.constant dense<0.000000e+00> : vector<2x64xf32>
    %278 = tpu.matmul %277, %276, %cst_100 {dimension_numbers = #tpu.dot_dimension_numbers<[1], [0], [0], [1], [0, 0, 1, 1], [], []>} : vector<2x32xbf16>, vector<32x64xbf16>, vector<2x64xf32> -> vector<2x64xf32>
    %c0_101 = arith.constant 0 : index
    %c0_102 = arith.constant 0 : index
    %279 = vector.load %arg5[%c0_101, %c0_102] : memref<14x256xf32, #tpu.memory_space<vmem>>, vector<1x64xf32>
    %280 = vector.broadcast %279 : vector<1x64xf32> to vector<2x64xf32>
    %281 = arith.addf %278, %280 : vector<2x64xf32>
    %c1_103 = arith.constant 1 : index
    %c0_104 = arith.constant 0 : index
    %282 = vector.load %arg5[%c1_103, %c0_104] : memref<14x256xf32, #tpu.memory_space<vmem>>, vector<1x64xf32>
    %c2_105 = arith.constant 2 : index
    %c0_106 = arith.constant 0 : index
    %283 = vector.load %arg5[%c2_105, %c0_106] : memref<14x256xf32, #tpu.memory_space<vmem>>, vector<1x64xf32>
    %cst_107 = arith.constant dense<0.000000e+00> : vector<2xf32>
    %284 = vector.multi_reduction <add>, %281, %cst_107 [1] : vector<2x64xf32> to vector<2xf32>
    %285 = vector.shape_cast %284 : vector<2xf32> to vector<2x1xf32>
    %cst_108 = arith.constant 6.400000e+01 : f32
    %286 = vector.broadcast %cst_108 : f32 to vector<2x1xf32>
    %287 = arith.divf %285, %286 : vector<2x1xf32>
    %288 = vector.broadcast %287 : vector<2x1xf32> to vector<2x64xf32>
    %289 = arith.subf %281, %288 : vector<2x64xf32>
    %290 = arith.mulf %289, %289 : vector<2x64xf32>
    %cst_109 = arith.constant dense<0.000000e+00> : vector<2xf32>
    %291 = vector.multi_reduction <add>, %290, %cst_109 [1] : vector<2x64xf32> to vector<2xf32>
    %292 = vector.shape_cast %291 : vector<2xf32> to vector<2x1xf32>
    %cst_110 = arith.constant 6.400000e+01 : f32
    %293 = vector.broadcast %cst_110 : f32 to vector<2x1xf32>
    %294 = arith.divf %292, %293 : vector<2x1xf32>
    %295 = vector.broadcast %287 : vector<2x1xf32> to vector<2x64xf32>
    %296 = arith.subf %281, %295 : vector<2x64xf32>
    %cst_111 = arith.constant 9.99999974E-6 : f32
    %297 = vector.broadcast %cst_111 : f32 to vector<2x1xf32>
    %298 = arith.addf %294, %297 : vector<2x1xf32>
    %299 = math.rsqrt %298 : vector<2x1xf32>
    %300 = vector.broadcast %299 : vector<2x1xf32> to vector<2x64xf32>
    %301 = arith.mulf %296, %300 : vector<2x64xf32>
    %302 = vector.broadcast %282 : vector<1x64xf32> to vector<2x64xf32>
    %303 = arith.mulf %301, %302 : vector<2x64xf32>
    %304 = vector.broadcast %283 : vector<1x64xf32> to vector<2x64xf32>
    %305 = arith.addf %303, %304 : vector<2x64xf32>
    %c32 = arith.constant 32 : index
    %c0_112 = arith.constant 0 : index
    %306 = vector.load %arg4[%c32, %c0_112] : memref<736x256xbf16, #tpu.memory_space<vmem>>, vector<64x256xbf16>
    %307 = arith.truncf %305 : vector<2x64xf32> to vector<2x64xbf16>
    %cst_113 = arith.constant dense<0.000000e+00> : vector<2x256xf32>
    %308 = tpu.matmul %307, %306, %cst_113 {dimension_numbers = #tpu.dot_dimension_numbers<[1], [0], [0], [1], [0, 0, 1, 1], [], []>} : vector<2x64xbf16>, vector<64x256xbf16>, vector<2x256xf32> -> vector<2x256xf32>
    %c3_114 = arith.constant 3 : index
    %c0_115 = arith.constant 0 : index
    %309 = vector.load %arg5[%c3_114, %c0_115] : memref<14x256xf32, #tpu.memory_space<vmem>>, vector<1x256xf32>
    %310 = vector.broadcast %309 : vector<1x256xf32> to vector<2x256xf32>
    %311 = arith.addf %308, %310 : vector<2x256xf32>
    %cst_116 = arith.constant 5.000000e-01 : f32
    %312 = vector.broadcast %cst_116 : f32 to vector<2x256xf32>
    %313 = arith.mulf %312, %311 : vector<2x256xf32>
    %cst_117 = arith.constant 0.707106769 : f32
    %314 = vector.broadcast %cst_117 : f32 to vector<2x256xf32>
    %315 = arith.mulf %311, %314 : vector<2x256xf32>
    %316 = math.erf %315 : vector<2x256xf32>
    %cst_118 = arith.constant 1.000000e+00 : f32
    %317 = vector.broadcast %cst_118 : f32 to vector<2x256xf32>
    %318 = arith.addf %317, %316 : vector<2x256xf32>
    %319 = arith.mulf %313, %318 : vector<2x256xf32>
    %c96 = arith.constant 96 : index
    %c0_119 = arith.constant 0 : index
    %320 = vector.load %arg4[%c96, %c0_119] : memref<736x256xbf16, #tpu.memory_space<vmem>>, vector<256x64xbf16>
    %321 = arith.truncf %319 : vector<2x256xf32> to vector<2x256xbf16>
    %cst_120 = arith.constant dense<0.000000e+00> : vector<2x64xf32>
    %322 = tpu.matmul %321, %320, %cst_120 {dimension_numbers = #tpu.dot_dimension_numbers<[1], [0], [0], [1], [0, 0, 1, 1], [], []>} : vector<2x256xbf16>, vector<256x64xbf16>, vector<2x64xf32> -> vector<2x64xf32>
    %c4_121 = arith.constant 4 : index
    %c0_122 = arith.constant 0 : index
    %323 = vector.load %arg5[%c4_121, %c0_122] : memref<14x256xf32, #tpu.memory_space<vmem>>, vector<1x64xf32>
    %324 = vector.broadcast %323 : vector<1x64xf32> to vector<2x64xf32>
    %325 = arith.addf %322, %324 : vector<2x64xf32>
    %326 = arith.addf %325, %305 : vector<2x64xf32>
    %c5_123 = arith.constant 5 : index
    %c0_124 = arith.constant 0 : index
    %327 = vector.load %arg5[%c5_123, %c0_124] : memref<14x256xf32, #tpu.memory_space<vmem>>, vector<1x64xf32>
    %c6_125 = arith.constant 6 : index
    %c0_126 = arith.constant 0 : index
    %328 = vector.load %arg5[%c6_125, %c0_126] : memref<14x256xf32, #tpu.memory_space<vmem>>, vector<1x64xf32>
    %cst_127 = arith.constant dense<0.000000e+00> : vector<2xf32>
    %329 = vector.multi_reduction <add>, %326, %cst_127 [1] : vector<2x64xf32> to vector<2xf32>
    %330 = vector.shape_cast %329 : vector<2xf32> to vector<2x1xf32>
    %cst_128 = arith.constant 6.400000e+01 : f32
    %331 = vector.broadcast %cst_128 : f32 to vector<2x1xf32>
    %332 = arith.divf %330, %331 : vector<2x1xf32>
    %333 = vector.broadcast %332 : vector<2x1xf32> to vector<2x64xf32>
    %334 = arith.subf %326, %333 : vector<2x64xf32>
    %335 = arith.mulf %334, %334 : vector<2x64xf32>
    %cst_129 = arith.constant dense<0.000000e+00> : vector<2xf32>
    %336 = vector.multi_reduction <add>, %335, %cst_129 [1] : vector<2x64xf32> to vector<2xf32>
    %337 = vector.shape_cast %336 : vector<2xf32> to vector<2x1xf32>
    %cst_130 = arith.constant 6.400000e+01 : f32
    %338 = vector.broadcast %cst_130 : f32 to vector<2x1xf32>
    %339 = arith.divf %337, %338 : vector<2x1xf32>
    %340 = vector.broadcast %332 : vector<2x1xf32> to vector<2x64xf32>
    %341 = arith.subf %326, %340 : vector<2x64xf32>
    %cst_131 = arith.constant 9.99999974E-6 : f32
    %342 = vector.broadcast %cst_131 : f32 to vector<2x1xf32>
    %343 = arith.addf %339, %342 : vector<2x1xf32>
    %344 = math.rsqrt %343 : vector<2x1xf32>
    %345 = vector.broadcast %344 : vector<2x1xf32> to vector<2x64xf32>
    %346 = arith.mulf %341, %345 : vector<2x64xf32>
    %347 = vector.broadcast %327 : vector<1x64xf32> to vector<2x64xf32>
    %348 = arith.mulf %346, %347 : vector<2x64xf32>
    %349 = vector.broadcast %328 : vector<1x64xf32> to vector<2x64xf32>
    %350 = arith.addf %348, %349 : vector<2x64xf32>
    %c352 = arith.constant 352 : index
    %c0_132 = arith.constant 0 : index
    %351 = vector.load %arg4[%c352, %c0_132] : memref<736x256xbf16, #tpu.memory_space<vmem>>, vector<64x256xbf16>
    %352 = arith.truncf %350 : vector<2x64xf32> to vector<2x64xbf16>
    %cst_133 = arith.constant dense<0.000000e+00> : vector<2x256xf32>
    %353 = tpu.matmul %352, %351, %cst_133 {dimension_numbers = #tpu.dot_dimension_numbers<[1], [0], [0], [1], [0, 0, 1, 1], [], []>} : vector<2x64xbf16>, vector<64x256xbf16>, vector<2x256xf32> -> vector<2x256xf32>
    %c7_134 = arith.constant 7 : index
    %c0_135 = arith.constant 0 : index
    %354 = vector.load %arg5[%c7_134, %c0_135] : memref<14x256xf32, #tpu.memory_space<vmem>>, vector<1x256xf32>
    %355 = vector.broadcast %354 : vector<1x256xf32> to vector<2x256xf32>
    %356 = arith.addf %353, %355 : vector<2x256xf32>
    %cst_136 = arith.constant 5.000000e-01 : f32
    %357 = vector.broadcast %cst_136 : f32 to vector<2x256xf32>
    %358 = arith.mulf %357, %356 : vector<2x256xf32>
    %cst_137 = arith.constant 0.707106769 : f32
    %359 = vector.broadcast %cst_137 : f32 to vector<2x256xf32>
    %360 = arith.mulf %356, %359 : vector<2x256xf32>
    %361 = math.erf %360 : vector<2x256xf32>
    %cst_138 = arith.constant 1.000000e+00 : f32
    %362 = vector.broadcast %cst_138 : f32 to vector<2x256xf32>
    %363 = arith.addf %362, %361 : vector<2x256xf32>
    %364 = arith.mulf %358, %363 : vector<2x256xf32>
    %c416 = arith.constant 416 : index
    %c0_139 = arith.constant 0 : index
    %365 = vector.load %arg4[%c416, %c0_139] : memref<736x256xbf16, #tpu.memory_space<vmem>>, vector<256x64xbf16>
    %366 = arith.truncf %364 : vector<2x256xf32> to vector<2x256xbf16>
    %cst_140 = arith.constant dense<0.000000e+00> : vector<2x64xf32>
    %367 = tpu.matmul %366, %365, %cst_140 {dimension_numbers = #tpu.dot_dimension_numbers<[1], [0], [0], [1], [0, 0, 1, 1], [], []>} : vector<2x256xbf16>, vector<256x64xbf16>, vector<2x64xf32> -> vector<2x64xf32>
    %c8_141 = arith.constant 8 : index
    %c0_142 = arith.constant 0 : index
    %368 = vector.load %arg5[%c8_141, %c0_142] : memref<14x256xf32, #tpu.memory_space<vmem>>, vector<1x64xf32>
    %369 = vector.broadcast %368 : vector<1x64xf32> to vector<2x64xf32>
    %370 = arith.addf %367, %369 : vector<2x64xf32>
    %371 = arith.addf %370, %350 : vector<2x64xf32>
    %c9_143 = arith.constant 9 : index
    %c0_144 = arith.constant 0 : index
    %372 = vector.load %arg5[%c9_143, %c0_144] : memref<14x256xf32, #tpu.memory_space<vmem>>, vector<1x64xf32>
    %c10_145 = arith.constant 10 : index
    %c0_146 = arith.constant 0 : index
    %373 = vector.load %arg5[%c10_145, %c0_146] : memref<14x256xf32, #tpu.memory_space<vmem>>, vector<1x64xf32>
    %cst_147 = arith.constant dense<0.000000e+00> : vector<2xf32>
    %374 = vector.multi_reduction <add>, %371, %cst_147 [1] : vector<2x64xf32> to vector<2xf32>
    %375 = vector.shape_cast %374 : vector<2xf32> to vector<2x1xf32>
    %cst_148 = arith.constant 6.400000e+01 : f32
    %376 = vector.broadcast %cst_148 : f32 to vector<2x1xf32>
    %377 = arith.divf %375, %376 : vector<2x1xf32>
    %378 = vector.broadcast %377 : vector<2x1xf32> to vector<2x64xf32>
    %379 = arith.subf %371, %378 : vector<2x64xf32>
    %380 = arith.mulf %379, %379 : vector<2x64xf32>
    %cst_149 = arith.constant dense<0.000000e+00> : vector<2xf32>
    %381 = vector.multi_reduction <add>, %380, %cst_149 [1] : vector<2x64xf32> to vector<2xf32>
    %382 = vector.shape_cast %381 : vector<2xf32> to vector<2x1xf32>
    %cst_150 = arith.constant 6.400000e+01 : f32
    %383 = vector.broadcast %cst_150 : f32 to vector<2x1xf32>
    %384 = arith.divf %382, %383 : vector<2x1xf32>
    %385 = vector.broadcast %377 : vector<2x1xf32> to vector<2x64xf32>
    %386 = arith.subf %371, %385 : vector<2x64xf32>
    %cst_151 = arith.constant 9.99999974E-6 : f32
    %387 = vector.broadcast %cst_151 : f32 to vector<2x1xf32>
    %388 = arith.addf %384, %387 : vector<2x1xf32>
    %389 = math.rsqrt %388 : vector<2x1xf32>
    %390 = vector.broadcast %389 : vector<2x1xf32> to vector<2x64xf32>
    %391 = arith.mulf %386, %390 : vector<2x64xf32>
    %392 = vector.broadcast %372 : vector<1x64xf32> to vector<2x64xf32>
    %393 = arith.mulf %391, %392 : vector<2x64xf32>
    %394 = vector.broadcast %373 : vector<1x64xf32> to vector<2x64xf32>
    %395 = arith.addf %393, %394 : vector<2x64xf32>
    %c672 = arith.constant 672 : index
    %c0_152 = arith.constant 0 : index
    %396 = vector.load %arg4[%c672, %c0_152] : memref<736x256xbf16, #tpu.memory_space<vmem>>, vector<64x32xbf16>
    %397 = arith.truncf %395 : vector<2x64xf32> to vector<2x64xbf16>
    %cst_153 = arith.constant dense<0.000000e+00> : vector<2x32xf32>
    %398 = tpu.matmul %397, %396, %cst_153 {dimension_numbers = #tpu.dot_dimension_numbers<[1], [0], [0], [1], [0, 0, 1, 1], [], []>} : vector<2x64xbf16>, vector<64x32xbf16>, vector<2x32xf32> -> vector<2x32xf32>
    %c11_154 = arith.constant 11 : index
    %c0_155 = arith.constant 0 : index
    %399 = vector.load %arg5[%c11_154, %c0_155] : memref<14x256xf32, #tpu.memory_space<vmem>>, vector<1x32xf32>
    %400 = vector.broadcast %399 : vector<1x32xf32> to vector<2x32xf32>
    %401 = arith.addf %398, %400 : vector<2x32xf32>
    %c12_156 = arith.constant 12 : index
    %c0_157 = arith.constant 0 : index
    %402 = vector.load %arg5[%c12_156, %c0_157] : memref<14x256xf32, #tpu.memory_space<vmem>>, vector<1x32xf32>
    %c13_158 = arith.constant 13 : index
    %c0_159 = arith.constant 0 : index
    %403 = vector.load %arg5[%c13_158, %c0_159] : memref<14x256xf32, #tpu.memory_space<vmem>>, vector<1x32xf32>
    %cst_160 = arith.constant dense<0.000000e+00> : vector<2xf32>
    %404 = vector.multi_reduction <add>, %401, %cst_160 [1] : vector<2x32xf32> to vector<2xf32>
    %405 = vector.shape_cast %404 : vector<2xf32> to vector<2x1xf32>
    %cst_161 = arith.constant 3.200000e+01 : f32
    %406 = vector.broadcast %cst_161 : f32 to vector<2x1xf32>
    %407 = arith.divf %405, %406 : vector<2x1xf32>
    %408 = vector.broadcast %407 : vector<2x1xf32> to vector<2x32xf32>
    %409 = arith.subf %401, %408 : vector<2x32xf32>
    %410 = arith.mulf %409, %409 : vector<2x32xf32>
    %cst_162 = arith.constant dense<0.000000e+00> : vector<2xf32>
    %411 = vector.multi_reduction <add>, %410, %cst_162 [1] : vector<2x32xf32> to vector<2xf32>
    %412 = vector.shape_cast %411 : vector<2xf32> to vector<2x1xf32>
    %cst_163 = arith.constant 3.200000e+01 : f32
    %413 = vector.broadcast %cst_163 : f32 to vector<2x1xf32>
    %414 = arith.divf %412, %413 : vector<2x1xf32>
    %415 = vector.broadcast %407 : vector<2x1xf32> to vector<2x32xf32>
    %416 = arith.subf %401, %415 : vector<2x32xf32>
    %cst_164 = arith.constant 9.99999974E-6 : f32
    %417 = vector.broadcast %cst_164 : f32 to vector<2x1xf32>
    %418 = arith.addf %414, %417 : vector<2x1xf32>
    %419 = math.rsqrt %418 : vector<2x1xf32>
    %420 = vector.broadcast %419 : vector<2x1xf32> to vector<2x32xf32>
    %421 = arith.mulf %416, %420 : vector<2x32xf32>
    %422 = vector.broadcast %402 : vector<1x32xf32> to vector<2x32xf32>
    %423 = arith.mulf %421, %422 : vector<2x32xf32>
    %424 = vector.broadcast %403 : vector<1x32xf32> to vector<2x32xf32>
    %425 = arith.addf %423, %424 : vector<2x32xf32>
    %426 = arith.mulf %425, %425 : vector<2x32xf32>
    %cst_165 = arith.constant dense<0.000000e+00> : vector<2xf32>
    %427 = vector.multi_reduction <add>, %426, %cst_165 [1] : vector<2x32xf32> to vector<2xf32>
    %428 = vector.shape_cast %427 : vector<2xf32> to vector<2x1xf32>
    %cst_166 = arith.constant 1.000000e-24 : f32
    %429 = vector.broadcast %cst_166 : f32 to vector<2x1xf32>
    %430 = arith.maximumf %428, %429 : vector<2x1xf32>
    %431 = math.rsqrt %430 : vector<2x1xf32>
    %432 = vector.broadcast %431 : vector<2x1xf32> to vector<2x32xf32>
    %433 = arith.mulf %425, %432 : vector<2x32xf32>
    %c0_167 = arith.constant 0 : index
    %c0_168 = arith.constant 0 : index
    %434 = vector.load %arg13[%c0_167, %c0_168] : memref<8x128xf32, #tpu.memory_space<vmem>>, vector<2x32xf32>
    tpu.vector_store %arg13[%c0_167, %c0_168], %433 {strides = array<i32>} : memref<8x128xf32, #tpu.memory_space<vmem>>, vector<2x32xf32>,
    %c0_169 = arith.constant 0 : index
    %c0_170 = arith.constant 0 : index
    %c0_171 = arith.constant 0 : index
    %435 = vector.load %arg6[%c0_169, %c0_170, %c0_171] : memref<2x2x6xi32, #tpu.memory_space<vmem>>, vector<1x2x6xi32>
    %436 = vector.shape_cast %435 : vector<1x2x6xi32> to vector<2x6xi32>
    %c0_172 = arith.constant 0 : index
    %c0_173 = arith.constant 0 : index
    %c0_174 = arith.constant 0 : index
    %437 = vector.load %arg7[%c0_172, %c0_173, %c0_174] : memref<2x2x6xf32, #tpu.memory_space<vmem>>, vector<1x2x6xf32>
    %438 = vector.shape_cast %437 : vector<1x2x6xf32> to vector<2x6xf32>
    %439 = tpu.iota {dimensions = array<i32: 2>} : vector<2x6x100xi32>
    %440 = vector.shape_cast %436 : vector<2x6xi32> to vector<2x6x1xi32>
    %441 = vector.broadcast %440 : vector<2x6x1xi32> to vector<2x6x100xi32>
    %442 = arith.cmpi eq, %439, %441 : vector<2x6x100xi32>
    %443 = arith.extui %442 : vector<2x6x100xi1> to vector<2x6x100xi32>
    %444 = arith.sitofp %443 : vector<2x6x100xi32> to vector<2x6x100xf32>
    %445 = vector.shape_cast %438 : vector<2x6xf32> to vector<2x6x1xf32>
    %446 = vector.broadcast %445 : vector<2x6x1xf32> to vector<2x6x100xf32>
    %447 = arith.mulf %444, %446 : vector<2x6x100xf32>
    %cst_175 = arith.constant dense<0.000000e+00> : vector<2x100xf32>
    %448 = vector.multi_reduction <add>, %447, %cst_175 [1] : vector<2x6x100xf32> to vector<2x100xf32>
    %cst_176 = arith.constant dense<0.000000e+00> : vector<2xf32>
    %449 = vector.multi_reduction <add>, %438, %cst_176 [1] : vector<2x6xf32> to vector<2xf32>
    %450 = vector.shape_cast %449 : vector<2xf32> to vector<2x1xf32>
    %cst_177 = arith.constant 1.000000e+00 : f32
    %451 = vector.broadcast %cst_177 : f32 to vector<2x1xf32>
    %452 = arith.maximumf %450, %451 : vector<2x1xf32>
    %c0_178 = arith.constant 0 : index
    %c0_179 = arith.constant 0 : index
    %c0_180 = arith.constant 0 : index
    %453 = vector.load %arg8[%c0_178, %c0_179, %c0_180] : memref<2x100x48xbf16, #tpu.memory_space<vmem>>, vector<1x100x48xbf16>
    %454 = vector.shape_cast %453 : vector<1x100x48xbf16> to vector<100x48xbf16>
    %455 = arith.truncf %448 : vector<2x100xf32> to vector<2x100xbf16>
    %cst_181 = arith.constant dense<0.000000e+00> : vector<2x48xf32>
    %456 = tpu.matmul %455, %454, %cst_181 {dimension_numbers = #tpu.dot_dimension_numbers<[1], [0], [0], [1], [0, 0, 1, 1], [], []>} : vector<2x100xbf16>, vector<100x48xbf16>, vector<2x48xf32> -> vector<2x48xf32>
    %457 = vector.broadcast %452 : vector<2x1xf32> to vector<2x48xf32>
    %458 = arith.divf %456, %457 : vector<2x48xf32>
    %c0_182 = arith.constant 0 : index
    %c0_183 = arith.constant 0 : index
    %c0_184 = arith.constant 0 : index
    %459 = vector.load %arg9[%c0_182, %c0_183, %c0_184] : memref<2x576x192xbf16, #tpu.memory_space<vmem>>, vector<1x48x48xbf16>
    %460 = vector.shape_cast %459 : vector<1x48x48xbf16> to vector<48x48xbf16>
    %461 = arith.truncf %458 : vector<2x48xf32> to vector<2x48xbf16>
    %cst_185 = arith.constant dense<0.000000e+00> : vector<2x48xf32>
    %462 = tpu.matmul %461, %460, %cst_185 {dimension_numbers = #tpu.dot_dimension_numbers<[1], [0], [0], [1], [0, 0, 1, 1], [], []>} : vector<2x48xbf16>, vector<48x48xbf16>, vector<2x48xf32> -> vector<2x48xf32>
    %c0_186 = arith.constant 0 : index
    %c0_187 = arith.constant 0 : index
    %c0_188 = arith.constant 0 : index
    %463 = vector.load %arg10[%c0_186, %c0_187, %c0_188] : memref<2x14x192xf32, #tpu.memory_space<vmem>>, vector<1x1x48xf32>
    %464 = vector.shape_cast %463 : vector<1x1x48xf32> to vector<1x48xf32>
    %465 = vector.broadcast %464 : vector<1x48xf32> to vector<2x48xf32>
    %466 = arith.addf %462, %465 : vector<2x48xf32>
    %c0_189 = arith.constant 0 : index
    %c1_190 = arith.constant 1 : index
    %c0_191 = arith.constant 0 : index
    %467 = vector.load %arg10[%c0_189, %c1_190, %c0_191] : memref<2x14x192xf32, #tpu.memory_space<vmem>>, vector<1x1x48xf32>
    %468 = vector.shape_cast %467 : vector<1x1x48xf32> to vector<1x48xf32>
    %c0_192 = arith.constant 0 : index
    %c2_193 = arith.constant 2 : index
    %c0_194 = arith.constant 0 : index
    %469 = vector.load %arg10[%c0_192, %c2_193, %c0_194] : memref<2x14x192xf32, #tpu.memory_space<vmem>>, vector<1x1x48xf32>
    %470 = vector.shape_cast %469 : vector<1x1x48xf32> to vector<1x48xf32>
    %cst_195 = arith.constant dense<0.000000e+00> : vector<2xf32>
    %471 = vector.multi_reduction <add>, %466, %cst_195 [1] : vector<2x48xf32> to vector<2xf32>
    %472 = vector.shape_cast %471 : vector<2xf32> to vector<2x1xf32>
    %cst_196 = arith.constant 4.800000e+01 : f32
    %473 = vector.broadcast %cst_196 : f32 to vector<2x1xf32>
    %474 = arith.divf %472, %473 : vector<2x1xf32>
    %475 = vector.broadcast %474 : vector<2x1xf32> to vector<2x48xf32>
    %476 = arith.subf %466, %475 : vector<2x48xf32>
    %477 = arith.mulf %476, %476 : vector<2x48xf32>
    %cst_197 = arith.constant dense<0.000000e+00> : vector<2xf32>
    %478 = vector.multi_reduction <add>, %477, %cst_197 [1] : vector<2x48xf32> to vector<2xf32>
    %479 = vector.shape_cast %478 : vector<2xf32> to vector<2x1xf32>
    %cst_198 = arith.constant 4.800000e+01 : f32
    %480 = vector.broadcast %cst_198 : f32 to vector<2x1xf32>
    %481 = arith.divf %479, %480 : vector<2x1xf32>
    %482 = vector.broadcast %474 : vector<2x1xf32> to vector<2x48xf32>
    %483 = arith.subf %466, %482 : vector<2x48xf32>
    %cst_199 = arith.constant 9.99999974E-6 : f32
    %484 = vector.broadcast %cst_199 : f32 to vector<2x1xf32>
    %485 = arith.addf %481, %484 : vector<2x1xf32>
    %486 = math.rsqrt %485 : vector<2x1xf32>
    %487 = vector.broadcast %486 : vector<2x1xf32> to vector<2x48xf32>
    %488 = arith.mulf %483, %487 : vector<2x48xf32>
    %489 = vector.broadcast %468 : vector<1x48xf32> to vector<2x48xf32>
    %490 = arith.mulf %488, %489 : vector<2x48xf32>
    %491 = vector.broadcast %470 : vector<1x48xf32> to vector<2x48xf32>
    %492 = arith.addf %490, %491 : vector<2x48xf32>
    %c0_200 = arith.constant 0 : index
    %c48 = arith.constant 48 : index
    %c0_201 = arith.constant 0 : index
    %493 = vector.load %arg9[%c0_200, %c48, %c0_201] : memref<2x576x192xbf16, #tpu.memory_space<vmem>>, vector<1x48x192xbf16>
    %494 = vector.shape_cast %493 : vector<1x48x192xbf16> to vector<48x192xbf16>
    %495 = arith.truncf %492 : vector<2x48xf32> to vector<2x48xbf16>
    %cst_202 = arith.constant dense<0.000000e+00> : vector<2x192xf32>
    %496 = tpu.matmul %495, %494, %cst_202 {dimension_numbers = #tpu.dot_dimension_numbers<[1], [0], [0], [1], [0, 0, 1, 1], [], []>} : vector<2x48xbf16>, vector<48x192xbf16>, vector<2x192xf32> -> vector<2x192xf32>
    %c0_203 = arith.constant 0 : index
    %c3_204 = arith.constant 3 : index
    %c0_205 = arith.constant 0 : index
    %497 = vector.load %arg10[%c0_203, %c3_204, %c0_205] : memref<2x14x192xf32, #tpu.memory_space<vmem>>, vector<1x1x192xf32>
    %498 = vector.shape_cast %497 : vector<1x1x192xf32> to vector<1x192xf32>
    %499 = vector.broadcast %498 : vector<1x192xf32> to vector<2x192xf32>
    %500 = arith.addf %496, %499 : vector<2x192xf32>
    %cst_206 = arith.constant 5.000000e-01 : f32
    %501 = vector.broadcast %cst_206 : f32 to vector<2x192xf32>
    %502 = arith.mulf %501, %500 : vector<2x192xf32>
    %cst_207 = arith.constant 0.707106769 : f32
    %503 = vector.broadcast %cst_207 : f32 to vector<2x192xf32>
    %504 = arith.mulf %500, %503 : vector<2x192xf32>
    %505 = math.erf %504 : vector<2x192xf32>
    %cst_208 = arith.constant 1.000000e+00 : f32
    %506 = vector.broadcast %cst_208 : f32 to vector<2x192xf32>
    %507 = arith.addf %506, %505 : vector<2x192xf32>
    %508 = arith.mulf %502, %507 : vector<2x192xf32>
    %c0_209 = arith.constant 0 : index
    %c96_210 = arith.constant 96 : index
    %c0_211 = arith.constant 0 : index
    %509 = vector.load %arg9[%c0_209, %c96_210, %c0_211] : memref<2x576x192xbf16, #tpu.memory_space<vmem>>, vector<1x192x48xbf16>
    %510 = vector.shape_cast %509 : vector<1x192x48xbf16> to vector<192x48xbf16>
    %511 = arith.truncf %508 : vector<2x192xf32> to vector<2x192xbf16>
    %cst_212 = arith.constant dense<0.000000e+00> : vector<2x48xf32>
    %512 = tpu.matmul %511, %510, %cst_212 {dimension_numbers = #tpu.dot_dimension_numbers<[1], [0], [0], [1], [0, 0, 1, 1], [], []>} : vector<2x192xbf16>, vector<192x48xbf16>, vector<2x48xf32> -> vector<2x48xf32>
    %c0_213 = arith.constant 0 : index
    %c4_214 = arith.constant 4 : index
    %c0_215 = arith.constant 0 : index
    %513 = vector.load %arg10[%c0_213, %c4_214, %c0_215] : memref<2x14x192xf32, #tpu.memory_space<vmem>>, vector<1x1x48xf32>
    %514 = vector.shape_cast %513 : vector<1x1x48xf32> to vector<1x48xf32>
    %515 = vector.broadcast %514 : vector<1x48xf32> to vector<2x48xf32>
    %516 = arith.addf %512, %515 : vector<2x48xf32>
    %517 = arith.addf %516, %492 : vector<2x48xf32>
    %c0_216 = arith.constant 0 : index
    %c5_217 = arith.constant 5 : index
    %c0_218 = arith.constant 0 : index
    %518 = vector.load %arg10[%c0_216, %c5_217, %c0_218] : memref<2x14x192xf32, #tpu.memory_space<vmem>>, vector<1x1x48xf32>
    %519 = vector.shape_cast %518 : vector<1x1x48xf32> to vector<1x48xf32>
    %c0_219 = arith.constant 0 : index
    %c6_220 = arith.constant 6 : index
    %c0_221 = arith.constant 0 : index
    %520 = vector.load %arg10[%c0_219, %c6_220, %c0_221] : memref<2x14x192xf32, #tpu.memory_space<vmem>>, vector<1x1x48xf32>
    %521 = vector.shape_cast %520 : vector<1x1x48xf32> to vector<1x48xf32>
    %cst_222 = arith.constant dense<0.000000e+00> : vector<2xf32>
    %522 = vector.multi_reduction <add>, %517, %cst_222 [1] : vector<2x48xf32> to vector<2xf32>
    %523 = vector.shape_cast %522 : vector<2xf32> to vector<2x1xf32>
    %cst_223 = arith.constant 4.800000e+01 : f32
    %524 = vector.broadcast %cst_223 : f32 to vector<2x1xf32>
    %525 = arith.divf %523, %524 : vector<2x1xf32>
    %526 = vector.broadcast %525 : vector<2x1xf32> to vector<2x48xf32>
    %527 = arith.subf %517, %526 : vector<2x48xf32>
    %528 = arith.mulf %527, %527 : vector<2x48xf32>
    %cst_224 = arith.constant dense<0.000000e+00> : vector<2xf32>
    %529 = vector.multi_reduction <add>, %528, %cst_224 [1] : vector<2x48xf32> to vector<2xf32>
    %530 = vector.shape_cast %529 : vector<2xf32> to vector<2x1xf32>
    %cst_225 = arith.constant 4.800000e+01 : f32
    %531 = vector.broadcast %cst_225 : f32 to vector<2x1xf32>
    %532 = arith.divf %530, %531 : vector<2x1xf32>
    %533 = vector.broadcast %525 : vector<2x1xf32> to vector<2x48xf32>
    %534 = arith.subf %517, %533 : vector<2x48xf32>
    %cst_226 = arith.constant 9.99999974E-6 : f32
    %535 = vector.broadcast %cst_226 : f32 to vector<2x1xf32>
    %536 = arith.addf %532, %535 : vector<2x1xf32>
    %537 = math.rsqrt %536 : vector<2x1xf32>
    %538 = vector.broadcast %537 : vector<2x1xf32> to vector<2x48xf32>
    %539 = arith.mulf %534, %538 : vector<2x48xf32>
    %540 = vector.broadcast %519 : vector<1x48xf32> to vector<2x48xf32>
    %541 = arith.mulf %539, %540 : vector<2x48xf32>
    %542 = vector.broadcast %521 : vector<1x48xf32> to vector<2x48xf32>
    %543 = arith.addf %541, %542 : vector<2x48xf32>
    %c0_227 = arith.constant 0 : index
    %c288 = arith.constant 288 : index
    %c0_228 = arith.constant 0 : index
    %544 = vector.load %arg9[%c0_227, %c288, %c0_228] : memref<2x576x192xbf16, #tpu.memory_space<vmem>>, vector<1x48x192xbf16>
    %545 = vector.shape_cast %544 : vector<1x48x192xbf16> to vector<48x192xbf16>
    %546 = arith.truncf %543 : vector<2x48xf32> to vector<2x48xbf16>
    %cst_229 = arith.constant dense<0.000000e+00> : vector<2x192xf32>
    %547 = tpu.matmul %546, %545, %cst_229 {dimension_numbers = #tpu.dot_dimension_numbers<[1], [0], [0], [1], [0, 0, 1, 1], [], []>} : vector<2x48xbf16>, vector<48x192xbf16>, vector<2x192xf32> -> vector<2x192xf32>
    %c0_230 = arith.constant 0 : index
    %c7_231 = arith.constant 7 : index
    %c0_232 = arith.constant 0 : index
    %548 = vector.load %arg10[%c0_230, %c7_231, %c0_232] : memref<2x14x192xf32, #tpu.memory_space<vmem>>, vector<1x1x192xf32>
    %549 = vector.shape_cast %548 : vector<1x1x192xf32> to vector<1x192xf32>
    %550 = vector.broadcast %549 : vector<1x192xf32> to vector<2x192xf32>
    %551 = arith.addf %547, %550 : vector<2x192xf32>
    %cst_233 = arith.constant 5.000000e-01 : f32
    %552 = vector.broadcast %cst_233 : f32 to vector<2x192xf32>
    %553 = arith.mulf %552, %551 : vector<2x192xf32>
    %cst_234 = arith.constant 0.707106769 : f32
    %554 = vector.broadcast %cst_234 : f32 to vector<2x192xf32>
    %555 = arith.mulf %551, %554 : vector<2x192xf32>
    %556 = math.erf %555 : vector<2x192xf32>
    %cst_235 = arith.constant 1.000000e+00 : f32
    %557 = vector.broadcast %cst_235 : f32 to vector<2x192xf32>
    %558 = arith.addf %557, %556 : vector<2x192xf32>
    %559 = arith.mulf %553, %558 : vector<2x192xf32>
    %c0_236 = arith.constant 0 : index
    %c336 = arith.constant 336 : index
    %c0_237 = arith.constant 0 : index
    %560 = vector.load %arg9[%c0_236, %c336, %c0_237] : memref<2x576x192xbf16, #tpu.memory_space<vmem>>, vector<1x192x48xbf16>
    %561 = vector.shape_cast %560 : vector<1x192x48xbf16> to vector<192x48xbf16>
    %562 = arith.truncf %559 : vector<2x192xf32> to vector<2x192xbf16>
    %cst_238 = arith.constant dense<0.000000e+00> : vector<2x48xf32>
    %563 = tpu.matmul %562, %561, %cst_238 {dimension_numbers = #tpu.dot_dimension_numbers<[1], [0], [0], [1], [0, 0, 1, 1], [], []>} : vector<2x192xbf16>, vector<192x48xbf16>, vector<2x48xf32> -> vector<2x48xf32>
    %c0_239 = arith.constant 0 : index
    %c8_240 = arith.constant 8 : index
    %c0_241 = arith.constant 0 : index
    %564 = vector.load %arg10[%c0_239, %c8_240, %c0_241] : memref<2x14x192xf32, #tpu.memory_space<vmem>>, vector<1x1x48xf32>
    %565 = vector.shape_cast %564 : vector<1x1x48xf32> to vector<1x48xf32>
    %566 = vector.broadcast %565 : vector<1x48xf32> to vector<2x48xf32>
    %567 = arith.addf %563, %566 : vector<2x48xf32>
    %568 = arith.addf %567, %543 : vector<2x48xf32>
    %c0_242 = arith.constant 0 : index
    %c9_243 = arith.constant 9 : index
    %c0_244 = arith.constant 0 : index
    %569 = vector.load %arg10[%c0_242, %c9_243, %c0_244] : memref<2x14x192xf32, #tpu.memory_space<vmem>>, vector<1x1x48xf32>
    %570 = vector.shape_cast %569 : vector<1x1x48xf32> to vector<1x48xf32>
    %c0_245 = arith.constant 0 : index
    %c10_246 = arith.constant 10 : index
    %c0_247 = arith.constant 0 : index
    %571 = vector.load %arg10[%c0_245, %c10_246, %c0_247] : memref<2x14x192xf32, #tpu.memory_space<vmem>>, vector<1x1x48xf32>
    %572 = vector.shape_cast %571 : vector<1x1x48xf32> to vector<1x48xf32>
    %cst_248 = arith.constant dense<0.000000e+00> : vector<2xf32>
    %573 = vector.multi_reduction <add>, %568, %cst_248 [1] : vector<2x48xf32> to vector<2xf32>
    %574 = vector.shape_cast %573 : vector<2xf32> to vector<2x1xf32>
    %cst_249 = arith.constant 4.800000e+01 : f32
    %575 = vector.broadcast %cst_249 : f32 to vector<2x1xf32>
    %576 = arith.divf %574, %575 : vector<2x1xf32>
    %577 = vector.broadcast %576 : vector<2x1xf32> to vector<2x48xf32>
    %578 = arith.subf %568, %577 : vector<2x48xf32>
    %579 = arith.mulf %578, %578 : vector<2x48xf32>
    %cst_250 = arith.constant dense<0.000000e+00> : vector<2xf32>
    %580 = vector.multi_reduction <add>, %579, %cst_250 [1] : vector<2x48xf32> to vector<2xf32>
    %581 = vector.shape_cast %580 : vector<2xf32> to vector<2x1xf32>
    %cst_251 = arith.constant 4.800000e+01 : f32
    %582 = vector.broadcast %cst_251 : f32 to vector<2x1xf32>
    %583 = arith.divf %581, %582 : vector<2x1xf32>
    %584 = vector.broadcast %576 : vector<2x1xf32> to vector<2x48xf32>
    %585 = arith.subf %568, %584 : vector<2x48xf32>
    %cst_252 = arith.constant 9.99999974E-6 : f32
    %586 = vector.broadcast %cst_252 : f32 to vector<2x1xf32>
    %587 = arith.addf %583, %586 : vector<2x1xf32>
    %588 = math.rsqrt %587 : vector<2x1xf32>
    %589 = vector.broadcast %588 : vector<2x1xf32> to vector<2x48xf32>
    %590 = arith.mulf %585, %589 : vector<2x48xf32>
    %591 = vector.broadcast %570 : vector<1x48xf32> to vector<2x48xf32>
    %592 = arith.mulf %590, %591 : vector<2x48xf32>
    %593 = vector.broadcast %572 : vector<1x48xf32> to vector<2x48xf32>
    %594 = arith.addf %592, %593 : vector<2x48xf32>
    %c0_253 = arith.constant 0 : index
    %c528 = arith.constant 528 : index
    %c0_254 = arith.constant 0 : index
    %595 = vector.load %arg9[%c0_253, %c528, %c0_254] : memref<2x576x192xbf16, #tpu.memory_space<vmem>>, vector<1x48x32xbf16>
    %596 = vector.shape_cast %595 : vector<1x48x32xbf16> to vector<48x32xbf16>
    %597 = arith.truncf %594 : vector<2x48xf32> to vector<2x48xbf16>
    %cst_255 = arith.constant dense<0.000000e+00> : vector<2x32xf32>
    %598 = tpu.matmul %597, %596, %cst_255 {dimension_numbers = #tpu.dot_dimension_numbers<[1], [0], [0], [1], [0, 0, 1, 1], [], []>} : vector<2x48xbf16>, vector<48x32xbf16>, vector<2x32xf32> -> vector<2x32xf32>
    %c0_256 = arith.constant 0 : index
    %c11_257 = arith.constant 11 : index
    %c0_258 = arith.constant 0 : index
    %599 = vector.load %arg10[%c0_256, %c11_257, %c0_258] : memref<2x14x192xf32, #tpu.memory_space<vmem>>, vector<1x1x32xf32>
    %600 = vector.shape_cast %599 : vector<1x1x32xf32> to vector<1x32xf32>
    %601 = vector.broadcast %600 : vector<1x32xf32> to vector<2x32xf32>
    %602 = arith.addf %598, %601 : vector<2x32xf32>
    %c0_259 = arith.constant 0 : index
    %c12_260 = arith.constant 12 : index
    %c0_261 = arith.constant 0 : index
    %603 = vector.load %arg10[%c0_259, %c12_260, %c0_261] : memref<2x14x192xf32, #tpu.memory_space<vmem>>, vector<1x1x32xf32>
    %604 = vector.shape_cast %603 : vector<1x1x32xf32> to vector<1x32xf32>
    %c0_262 = arith.constant 0 : index
    %c13_263 = arith.constant 13 : index
    %c0_264 = arith.constant 0 : index
    %605 = vector.load %arg10[%c0_262, %c13_263, %c0_264] : memref<2x14x192xf32, #tpu.memory_space<vmem>>, vector<1x1x32xf32>
    %606 = vector.shape_cast %605 : vector<1x1x32xf32> to vector<1x32xf32>
    %cst_265 = arith.constant dense<0.000000e+00> : vector<2xf32>
    %607 = vector.multi_reduction <add>, %602, %cst_265 [1] : vector<2x32xf32> to vector<2xf32>
    %608 = vector.shape_cast %607 : vector<2xf32> to vector<2x1xf32>
    %cst_266 = arith.constant 3.200000e+01 : f32
    %609 = vector.broadcast %cst_266 : f32 to vector<2x1xf32>
    %610 = arith.divf %608, %609 : vector<2x1xf32>
    %611 = vector.broadcast %610 : vector<2x1xf32> to vector<2x32xf32>
    %612 = arith.subf %602, %611 : vector<2x32xf32>
    %613 = arith.mulf %612, %612 : vector<2x32xf32>
    %cst_267 = arith.constant dense<0.000000e+00> : vector<2xf32>
    %614 = vector.multi_reduction <add>, %613, %cst_267 [1] : vector<2x32xf32> to vector<2xf32>
    %615 = vector.shape_cast %614 : vector<2xf32> to vector<2x1xf32>
    %cst_268 = arith.constant 3.200000e+01 : f32
    %616 = vector.broadcast %cst_268 : f32 to vector<2x1xf32>
    %617 = arith.divf %615, %616 : vector<2x1xf32>
    %618 = vector.broadcast %610 : vector<2x1xf32> to vector<2x32xf32>
    %619 = arith.subf %602, %618 : vector<2x32xf32>
    %cst_269 = arith.constant 9.99999974E-6 : f32
    %620 = vector.broadcast %cst_269 : f32 to vector<2x1xf32>
    %621 = arith.addf %617, %620 : vector<2x1xf32>
    %622 = math.rsqrt %621 : vector<2x1xf32>
    %623 = vector.broadcast %622 : vector<2x1xf32> to vector<2x32xf32>
    %624 = arith.mulf %619, %623 : vector<2x32xf32>
    %625 = vector.broadcast %604 : vector<1x32xf32> to vector<2x32xf32>
    %626 = arith.mulf %624, %625 : vector<2x32xf32>
    %627 = vector.broadcast %606 : vector<1x32xf32> to vector<2x32xf32>
    %628 = arith.addf %626, %627 : vector<2x32xf32>
    %c0_270 = arith.constant 0 : index
    %c0_271 = arith.constant 0 : index
    %c0_272 = arith.constant 0 : index
    %629 = vector.load %arg11[%c0_270, %c0_271, %c0_272] : memref<2x736x256xbf16, #tpu.memory_space<vmem>>, vector<1x32x64xbf16>
    %630 = vector.shape_cast %629 : vector<1x32x64xbf16> to vector<32x64xbf16>
    %631 = arith.truncf %628 : vector<2x32xf32> to vector<2x32xbf16>
    %cst_273 = arith.constant dense<0.000000e+00> : vector<2x64xf32>
    %632 = tpu.matmul %631, %630, %cst_273 {dimension_numbers = #tpu.dot_dimension_numbers<[1], [0], [0], [1], [0, 0, 1, 1], [], []>} : vector<2x32xbf16>, vector<32x64xbf16>, vector<2x64xf32> -> vector<2x64xf32>
    %c0_274 = arith.constant 0 : index
    %c0_275 = arith.constant 0 : index
    %c0_276 = arith.constant 0 : index
    %633 = vector.load %arg12[%c0_274, %c0_275, %c0_276] : memref<2x14x256xf32, #tpu.memory_space<vmem>>, vector<1x1x64xf32>
    %634 = vector.shape_cast %633 : vector<1x1x64xf32> to vector<1x64xf32>
    %635 = vector.broadcast %634 : vector<1x64xf32> to vector<2x64xf32>
    %636 = arith.addf %632, %635 : vector<2x64xf32>
    %c0_277 = arith.constant 0 : index
    %c1_278 = arith.constant 1 : index
    %c0_279 = arith.constant 0 : index
    %637 = vector.load %arg12[%c0_277, %c1_278, %c0_279] : memref<2x14x256xf32, #tpu.memory_space<vmem>>, vector<1x1x64xf32>
    %638 = vector.shape_cast %637 : vector<1x1x64xf32> to vector<1x64xf32>
    %c0_280 = arith.constant 0 : index
    %c2_281 = arith.constant 2 : index
    %c0_282 = arith.constant 0 : index
    %639 = vector.load %arg12[%c0_280, %c2_281, %c0_282] : memref<2x14x256xf32, #tpu.memory_space<vmem>>, vector<1x1x64xf32>
    %640 = vector.shape_cast %639 : vector<1x1x64xf32> to vector<1x64xf32>
    %cst_283 = arith.constant dense<0.000000e+00> : vector<2xf32>
    %641 = vector.multi_reduction <add>, %636, %cst_283 [1] : vector<2x64xf32> to vector<2xf32>
    %642 = vector.shape_cast %641 : vector<2xf32> to vector<2x1xf32>
    %cst_284 = arith.constant 6.400000e+01 : f32
    %643 = vector.broadcast %cst_284 : f32 to vector<2x1xf32>
    %644 = arith.divf %642, %643 : vector<2x1xf32>
    %645 = vector.broadcast %644 : vector<2x1xf32> to vector<2x64xf32>
    %646 = arith.subf %636, %645 : vector<2x64xf32>
    %647 = arith.mulf %646, %646 : vector<2x64xf32>
    %cst_285 = arith.constant dense<0.000000e+00> : vector<2xf32>
    %648 = vector.multi_reduction <add>, %647, %cst_285 [1] : vector<2x64xf32> to vector<2xf32>
    %649 = vector.shape_cast %648 : vector<2xf32> to vector<2x1xf32>
    %cst_286 = arith.constant 6.400000e+01 : f32
    %650 = vector.broadcast %cst_286 : f32 to vector<2x1xf32>
    %651 = arith.divf %649, %650 : vector<2x1xf32>
    %652 = vector.broadcast %644 : vector<2x1xf32> to vector<2x64xf32>
    %653 = arith.subf %636, %652 : vector<2x64xf32>
    %cst_287 = arith.constant 9.99999974E-6 : f32
    %654 = vector.broadcast %cst_287 : f32 to vector<2x1xf32>
    %655 = arith.addf %651, %654 : vector<2x1xf32>
    %656 = math.rsqrt %655 : vector<2x1xf32>
    %657 = vector.broadcast %656 : vector<2x1xf32> to vector<2x64xf32>
    %658 = arith.mulf %653, %657 : vector<2x64xf32>
    %659 = vector.broadcast %638 : vector<1x64xf32> to vector<2x64xf32>
    %660 = arith.mulf %658, %659 : vector<2x64xf32>
    %661 = vector.broadcast %640 : vector<1x64xf32> to vector<2x64xf32>
    %662 = arith.addf %660, %661 : vector<2x64xf32>
    %c0_288 = arith.constant 0 : index
    %c32_289 = arith.constant 32 : index
    %c0_290 = arith.constant 0 : index
    %663 = vector.load %arg11[%c0_288, %c32_289, %c0_290] : memref<2x736x256xbf16, #tpu.memory_space<vmem>>, vector<1x64x256xbf16>
    %664 = vector.shape_cast %663 : vector<1x64x256xbf16> to vector<64x256xbf16>
    %665 = arith.truncf %662 : vector<2x64xf32> to vector<2x64xbf16>
    %cst_291 = arith.constant dense<0.000000e+00> : vector<2x256xf32>
    %666 = tpu.matmul %665, %664, %cst_291 {dimension_numbers = #tpu.dot_dimension_numbers<[1], [0], [0], [1], [0, 0, 1, 1], [], []>} : vector<2x64xbf16>, vector<64x256xbf16>, vector<2x256xf32> -> vector<2x256xf32>
    %c0_292 = arith.constant 0 : index
    %c3_293 = arith.constant 3 : index
    %c0_294 = arith.constant 0 : index
    %667 = vector.load %arg12[%c0_292, %c3_293, %c0_294] : memref<2x14x256xf32, #tpu.memory_space<vmem>>, vector<1x1x256xf32>
    %668 = vector.shape_cast %667 : vector<1x1x256xf32> to vector<1x256xf32>
    %669 = vector.broadcast %668 : vector<1x256xf32> to vector<2x256xf32>
    %670 = arith.addf %666, %669 : vector<2x256xf32>
    %cst_295 = arith.constant 5.000000e-01 : f32
    %671 = vector.broadcast %cst_295 : f32 to vector<2x256xf32>
    %672 = arith.mulf %671, %670 : vector<2x256xf32>
    %cst_296 = arith.constant 0.707106769 : f32
    %673 = vector.broadcast %cst_296 : f32 to vector<2x256xf32>
    %674 = arith.mulf %670, %673 : vector<2x256xf32>
    %675 = math.erf %674 : vector<2x256xf32>
    %cst_297 = arith.constant 1.000000e+00 : f32
    %676 = vector.broadcast %cst_297 : f32 to vector<2x256xf32>
    %677 = arith.addf %676, %675 : vector<2x256xf32>
    %678 = arith.mulf %672, %677 : vector<2x256xf32>
    %c0_298 = arith.constant 0 : index
    %c96_299 = arith.constant 96 : index
    %c0_300 = arith.constant 0 : index
    %679 = vector.load %arg11[%c0_298, %c96_299, %c0_300] : memref<2x736x256xbf16, #tpu.memory_space<vmem>>, vector<1x256x64xbf16>
    %680 = vector.shape_cast %679 : vector<1x256x64xbf16> to vector<256x64xbf16>
    %681 = arith.truncf %678 : vector<2x256xf32> to vector<2x256xbf16>
    %cst_301 = arith.constant dense<0.000000e+00> : vector<2x64xf32>
    %682 = tpu.matmul %681, %680, %cst_301 {dimension_numbers = #tpu.dot_dimension_numbers<[1], [0], [0], [1], [0, 0, 1, 1], [], []>} : vector<2x256xbf16>, vector<256x64xbf16>, vector<2x64xf32> -> vector<2x64xf32>
    %c0_302 = arith.constant 0 : index
    %c4_303 = arith.constant 4 : index
    %c0_304 = arith.constant 0 : index
    %683 = vector.load %arg12[%c0_302, %c4_303, %c0_304] : memref<2x14x256xf32, #tpu.memory_space<vmem>>, vector<1x1x64xf32>
    %684 = vector.shape_cast %683 : vector<1x1x64xf32> to vector<1x64xf32>
    %685 = vector.broadcast %684 : vector<1x64xf32> to vector<2x64xf32>
    %686 = arith.addf %682, %685 : vector<2x64xf32>
    %687 = arith.addf %686, %662 : vector<2x64xf32>
    %c0_305 = arith.constant 0 : index
    %c5_306 = arith.constant 5 : index
    %c0_307 = arith.constant 0 : index
    %688 = vector.load %arg12[%c0_305, %c5_306, %c0_307] : memref<2x14x256xf32, #tpu.memory_space<vmem>>, vector<1x1x64xf32>
    %689 = vector.shape_cast %688 : vector<1x1x64xf32> to vector<1x64xf32>
    %c0_308 = arith.constant 0 : index
    %c6_309 = arith.constant 6 : index
    %c0_310 = arith.constant 0 : index
    %690 = vector.load %arg12[%c0_308, %c6_309, %c0_310] : memref<2x14x256xf32, #tpu.memory_space<vmem>>, vector<1x1x64xf32>
    %691 = vector.shape_cast %690 : vector<1x1x64xf32> to vector<1x64xf32>
    %cst_311 = arith.constant dense<0.000000e+00> : vector<2xf32>
    %692 = vector.multi_reduction <add>, %687, %cst_311 [1] : vector<2x64xf32> to vector<2xf32>
    %693 = vector.shape_cast %692 : vector<2xf32> to vector<2x1xf32>
    %cst_312 = arith.constant 6.400000e+01 : f32
    %694 = vector.broadcast %cst_312 : f32 to vector<2x1xf32>
    %695 = arith.divf %693, %694 : vector<2x1xf32>
    %696 = vector.broadcast %695 : vector<2x1xf32> to vector<2x64xf32>
    %697 = arith.subf %687, %696 : vector<2x64xf32>
    %698 = arith.mulf %697, %697 : vector<2x64xf32>
    %cst_313 = arith.constant dense<0.000000e+00> : vector<2xf32>
    %699 = vector.multi_reduction <add>, %698, %cst_313 [1] : vector<2x64xf32> to vector<2xf32>
    %700 = vector.shape_cast %699 : vector<2xf32> to vector<2x1xf32>
    %cst_314 = arith.constant 6.400000e+01 : f32
    %701 = vector.broadcast %cst_314 : f32 to vector<2x1xf32>
    %702 = arith.divf %700, %701 : vector<2x1xf32>
    %703 = vector.broadcast %695 : vector<2x1xf32> to vector<2x64xf32>
    %704 = arith.subf %687, %703 : vector<2x64xf32>
    %cst_315 = arith.constant 9.99999974E-6 : f32
    %705 = vector.broadcast %cst_315 : f32 to vector<2x1xf32>
    %706 = arith.addf %702, %705 : vector<2x1xf32>
    %707 = math.rsqrt %706 : vector<2x1xf32>
    %708 = vector.broadcast %707 : vector<2x1xf32> to vector<2x64xf32>
    %709 = arith.mulf %704, %708 : vector<2x64xf32>
    %710 = vector.broadcast %689 : vector<1x64xf32> to vector<2x64xf32>
    %711 = arith.mulf %709, %710 : vector<2x64xf32>
    %712 = vector.broadcast %691 : vector<1x64xf32> to vector<2x64xf32>
    %713 = arith.addf %711, %712 : vector<2x64xf32>
    %c0_316 = arith.constant 0 : index
    %c352_317 = arith.constant 352 : index
    %c0_318 = arith.constant 0 : index
    %714 = vector.load %arg11[%c0_316, %c352_317, %c0_318] : memref<2x736x256xbf16, #tpu.memory_space<vmem>>, vector<1x64x256xbf16>
    %715 = vector.shape_cast %714 : vector<1x64x256xbf16> to vector<64x256xbf16>
    %716 = arith.truncf %713 : vector<2x64xf32> to vector<2x64xbf16>
    %cst_319 = arith.constant dense<0.000000e+00> : vector<2x256xf32>
    %717 = tpu.matmul %716, %715, %cst_319 {dimension_numbers = #tpu.dot_dimension_numbers<[1], [0], [0], [1], [0, 0, 1, 1], [], []>} : vector<2x64xbf16>, vector<64x256xbf16>, vector<2x256xf32> -> vector<2x256xf32>
    %c0_320 = arith.constant 0 : index
    %c7_321 = arith.constant 7 : index
    %c0_322 = arith.constant 0 : index
    %718 = vector.load %arg12[%c0_320, %c7_321, %c0_322] : memref<2x14x256xf32, #tpu.memory_space<vmem>>, vector<1x1x256xf32>
    %719 = vector.shape_cast %718 : vector<1x1x256xf32> to vector<1x256xf32>
    %720 = vector.broadcast %719 : vector<1x256xf32> to vector<2x256xf32>
    %721 = arith.addf %717, %720 : vector<2x256xf32>
    %cst_323 = arith.constant 5.000000e-01 : f32
    %722 = vector.broadcast %cst_323 : f32 to vector<2x256xf32>
    %723 = arith.mulf %722, %721 : vector<2x256xf32>
    %cst_324 = arith.constant 0.707106769 : f32
    %724 = vector.broadcast %cst_324 : f32 to vector<2x256xf32>
    %725 = arith.mulf %721, %724 : vector<2x256xf32>
    %726 = math.erf %725 : vector<2x256xf32>
    %cst_325 = arith.constant 1.000000e+00 : f32
    %727 = vector.broadcast %cst_325 : f32 to vector<2x256xf32>
    %728 = arith.addf %727, %726 : vector<2x256xf32>
    %729 = arith.mulf %723, %728 : vector<2x256xf32>
    %c0_326 = arith.constant 0 : index
    %c416_327 = arith.constant 416 : index
    %c0_328 = arith.constant 0 : index
    %730 = vector.load %arg11[%c0_326, %c416_327, %c0_328] : memref<2x736x256xbf16, #tpu.memory_space<vmem>>, vector<1x256x64xbf16>
    %731 = vector.shape_cast %730 : vector<1x256x64xbf16> to vector<256x64xbf16>
    %732 = arith.truncf %729 : vector<2x256xf32> to vector<2x256xbf16>
    %cst_329 = arith.constant dense<0.000000e+00> : vector<2x64xf32>
    %733 = tpu.matmul %732, %731, %cst_329 {dimension_numbers = #tpu.dot_dimension_numbers<[1], [0], [0], [1], [0, 0, 1, 1], [], []>} : vector<2x256xbf16>, vector<256x64xbf16>, vector<2x64xf32> -> vector<2x64xf32>
    %c0_330 = arith.constant 0 : index
    %c8_331 = arith.constant 8 : index
    %c0_332 = arith.constant 0 : index
    %734 = vector.load %arg12[%c0_330, %c8_331, %c0_332] : memref<2x14x256xf32, #tpu.memory_space<vmem>>, vector<1x1x64xf32>
    %735 = vector.shape_cast %734 : vector<1x1x64xf32> to vector<1x64xf32>
    %736 = vector.broadcast %735 : vector<1x64xf32> to vector<2x64xf32>
    %737 = arith.addf %733, %736 : vector<2x64xf32>
    %738 = arith.addf %737, %713 : vector<2x64xf32>
    %c0_333 = arith.constant 0 : index
    %c9_334 = arith.constant 9 : index
    %c0_335 = arith.constant 0 : index
    %739 = vector.load %arg12[%c0_333, %c9_334, %c0_335] : memref<2x14x256xf32, #tpu.memory_space<vmem>>, vector<1x1x64xf32>
    %740 = vector.shape_cast %739 : vector<1x1x64xf32> to vector<1x64xf32>
    %c0_336 = arith.constant 0 : index
    %c10_337 = arith.constant 10 : index
    %c0_338 = arith.constant 0 : index
    %741 = vector.load %arg12[%c0_336, %c10_337, %c0_338] : memref<2x14x256xf32, #tpu.memory_space<vmem>>, vector<1x1x64xf32>
    %742 = vector.shape_cast %741 : vector<1x1x64xf32> to vector<1x64xf32>
    %cst_339 = arith.constant dense<0.000000e+00> : vector<2xf32>
    %743 = vector.multi_reduction <add>, %738, %cst_339 [1] : vector<2x64xf32> to vector<2xf32>
    %744 = vector.shape_cast %743 : vector<2xf32> to vector<2x1xf32>
    %cst_340 = arith.constant 6.400000e+01 : f32
    %745 = vector.broadcast %cst_340 : f32 to vector<2x1xf32>
    %746 = arith.divf %744, %745 : vector<2x1xf32>
    %747 = vector.broadcast %746 : vector<2x1xf32> to vector<2x64xf32>
    %748 = arith.subf %738, %747 : vector<2x64xf32>
    %749 = arith.mulf %748, %748 : vector<2x64xf32>
    %cst_341 = arith.constant dense<0.000000e+00> : vector<2xf32>
    %750 = vector.multi_reduction <add>, %749, %cst_341 [1] : vector<2x64xf32> to vector<2xf32>
    %751 = vector.shape_cast %750 : vector<2xf32> to vector<2x1xf32>
    %cst_342 = arith.constant 6.400000e+01 : f32
    %752 = vector.broadcast %cst_342 : f32 to vector<2x1xf32>
    %753 = arith.divf %751, %752 : vector<2x1xf32>
    %754 = vector.broadcast %746 : vector<2x1xf32> to vector<2x64xf32>
    %755 = arith.subf %738, %754 : vector<2x64xf32>
    %cst_343 = arith.constant 9.99999974E-6 : f32
    %756 = vector.broadcast %cst_343 : f32 to vector<2x1xf32>
    %757 = arith.addf %753, %756 : vector<2x1xf32>
    %758 = math.rsqrt %757 : vector<2x1xf32>
    %759 = vector.broadcast %758 : vector<2x1xf32> to vector<2x64xf32>
    %760 = arith.mulf %755, %759 : vector<2x64xf32>
    %761 = vector.broadcast %740 : vector<1x64xf32> to vector<2x64xf32>
    %762 = arith.mulf %760, %761 : vector<2x64xf32>
    %763 = vector.broadcast %742 : vector<1x64xf32> to vector<2x64xf32>
    %764 = arith.addf %762, %763 : vector<2x64xf32>
    %c0_344 = arith.constant 0 : index
    %c672_345 = arith.constant 672 : index
    %c0_346 = arith.constant 0 : index
    %765 = vector.load %arg11[%c0_344, %c672_345, %c0_346] : memref<2x736x256xbf16, #tpu.memory_space<vmem>>, vector<1x64x32xbf16>
    %766 = vector.shape_cast %765 : vector<1x64x32xbf16> to vector<64x32xbf16>
    %767 = arith.truncf %764 : vector<2x64xf32> to vector<2x64xbf16>
    %cst_347 = arith.constant dense<0.000000e+00> : vector<2x32xf32>
    %768 = tpu.matmul %767, %766, %cst_347 {dimension_numbers = #tpu.dot_dimension_numbers<[1], [0], [0], [1], [0, 0, 1, 1], [], []>} : vector<2x64xbf16>, vector<64x32xbf16>, vector<2x32xf32> -> vector<2x32xf32>
    %c0_348 = arith.constant 0 : index
    %c11_349 = arith.constant 11 : index
    %c0_350 = arith.constant 0 : index
    %769 = vector.load %arg12[%c0_348, %c11_349, %c0_350] : memref<2x14x256xf32, #tpu.memory_space<vmem>>, vector<1x1x32xf32>
    %770 = vector.shape_cast %769 : vector<1x1x32xf32> to vector<1x32xf32>
    %771 = vector.broadcast %770 : vector<1x32xf32> to vector<2x32xf32>
    %772 = arith.addf %768, %771 : vector<2x32xf32>
    %c0_351 = arith.constant 0 : index
    %c12_352 = arith.constant 12 : index
    %c0_353 = arith.constant 0 : index
    %773 = vector.load %arg12[%c0_351, %c12_352, %c0_353] : memref<2x14x256xf32, #tpu.memory_space<vmem>>, vector<1x1x32xf32>
    %774 = vector.shape_cast %773 : vector<1x1x32xf32> to vector<1x32xf32>
    %c0_354 = arith.constant 0 : index
    %c13_355 = arith.constant 13 : index
    %c0_356 = arith.constant 0 : index
    %775 = vector.load %arg12[%c0_354, %c13_355, %c0_356] : memref<2x14x256xf32, #tpu.memory_space<vmem>>, vector<1x1x32xf32>
    %776 = vector.shape_cast %775 : vector<1x1x32xf32> to vector<1x32xf32>
    %cst_357 = arith.constant dense<0.000000e+00> : vector<2xf32>
    %777 = vector.multi_reduction <add>, %772, %cst_357 [1] : vector<2x32xf32> to vector<2xf32>
    %778 = vector.shape_cast %777 : vector<2xf32> to vector<2x1xf32>
    %cst_358 = arith.constant 3.200000e+01 : f32
    %779 = vector.broadcast %cst_358 : f32 to vector<2x1xf32>
    %780 = arith.divf %778, %779 : vector<2x1xf32>
    %781 = vector.broadcast %780 : vector<2x1xf32> to vector<2x32xf32>
    %782 = arith.subf %772, %781 : vector<2x32xf32>
    %783 = arith.mulf %782, %782 : vector<2x32xf32>
    %cst_359 = arith.constant dense<0.000000e+00> : vector<2xf32>
    %784 = vector.multi_reduction <add>, %783, %cst_359 [1] : vector<2x32xf32> to vector<2xf32>
    %785 = vector.shape_cast %784 : vector<2xf32> to vector<2x1xf32>
    %cst_360 = arith.constant 3.200000e+01 : f32
    %786 = vector.broadcast %cst_360 : f32 to vector<2x1xf32>
    %787 = arith.divf %785, %786 : vector<2x1xf32>
    %788 = vector.broadcast %780 : vector<2x1xf32> to vector<2x32xf32>
    %789 = arith.subf %772, %788 : vector<2x32xf32>
    %cst_361 = arith.constant 9.99999974E-6 : f32
    %790 = vector.broadcast %cst_361 : f32 to vector<2x1xf32>
    %791 = arith.addf %787, %790 : vector<2x1xf32>
    %792 = math.rsqrt %791 : vector<2x1xf32>
    %793 = vector.broadcast %792 : vector<2x1xf32> to vector<2x32xf32>
    %794 = arith.mulf %789, %793 : vector<2x32xf32>
    %795 = vector.broadcast %774 : vector<1x32xf32> to vector<2x32xf32>
    %796 = arith.mulf %794, %795 : vector<2x32xf32>
    %797 = vector.broadcast %776 : vector<1x32xf32> to vector<2x32xf32>
    %798 = arith.addf %796, %797 : vector<2x32xf32>
    %799 = arith.mulf %798, %798 : vector<2x32xf32>
    %cst_362 = arith.constant dense<0.000000e+00> : vector<2xf32>
    %800 = vector.multi_reduction <add>, %799, %cst_362 [1] : vector<2x32xf32> to vector<2xf32>
    %801 = vector.shape_cast %800 : vector<2xf32> to vector<2x1xf32>
    %cst_363 = arith.constant 1.000000e-24 : f32
    %802 = vector.broadcast %cst_363 : f32 to vector<2x1xf32>
    %803 = arith.maximumf %801, %802 : vector<2x1xf32>
    %804 = math.rsqrt %803 : vector<2x1xf32>
    %805 = vector.broadcast %804 : vector<2x1xf32> to vector<2x32xf32>
    %806 = arith.mulf %798, %805 : vector<2x32xf32>
    %c2_364 = arith.constant 2 : index
    %c0_365 = arith.constant 0 : index
    %807 = vector.load %arg13[%c2_364, %c0_365] : memref<8x128xf32, #tpu.memory_space<vmem>>, vector<2x32xf32>
    tpu.vector_store %arg13[%c2_364, %c0_365], %806 {strides = array<i32>} : memref<8x128xf32, #tpu.memory_space<vmem>>, vector<2x32xf32>,
    %c1_366 = arith.constant 1 : index
    %c0_367 = arith.constant 0 : index
    %c0_368 = arith.constant 0 : index
    %808 = vector.load %arg6[%c1_366, %c0_367, %c0_368] : memref<2x2x6xi32, #tpu.memory_space<vmem>>, vector<1x2x6xi32>
    %809 = vector.shape_cast %808 : vector<1x2x6xi32> to vector<2x6xi32>
    %c1_369 = arith.constant 1 : index
    %c0_370 = arith.constant 0 : index
    %c0_371 = arith.constant 0 : index
    %810 = vector.load %arg7[%c1_369, %c0_370, %c0_371] : memref<2x2x6xf32, #tpu.memory_space<vmem>>, vector<1x2x6xf32>
    %811 = vector.shape_cast %810 : vector<1x2x6xf32> to vector<2x6xf32>
    %812 = tpu.iota {dimensions = array<i32: 2>} : vector<2x6x100xi32>
    %813 = vector.shape_cast %809 : vector<2x6xi32> to vector<2x6x1xi32>
    %814 = vector.broadcast %813 : vector<2x6x1xi32> to vector<2x6x100xi32>
    %815 = arith.cmpi eq, %812, %814 : vector<2x6x100xi32>
    %816 = arith.extui %815 : vector<2x6x100xi1> to vector<2x6x100xi32>
    %817 = arith.sitofp %816 : vector<2x6x100xi32> to vector<2x6x100xf32>
    %818 = vector.shape_cast %811 : vector<2x6xf32> to vector<2x6x1xf32>
    %819 = vector.broadcast %818 : vector<2x6x1xf32> to vector<2x6x100xf32>
    %820 = arith.mulf %817, %819 : vector<2x6x100xf32>
    %cst_372 = arith.constant dense<0.000000e+00> : vector<2x100xf32>
    %821 = vector.multi_reduction <add>, %820, %cst_372 [1] : vector<2x6x100xf32> to vector<2x100xf32>
    %cst_373 = arith.constant dense<0.000000e+00> : vector<2xf32>
    %822 = vector.multi_reduction <add>, %811, %cst_373 [1] : vector<2x6xf32> to vector<2xf32>
    %823 = vector.shape_cast %822 : vector<2xf32> to vector<2x1xf32>
    %cst_374 = arith.constant 1.000000e+00 : f32
    %824 = vector.broadcast %cst_374 : f32 to vector<2x1xf32>
    %825 = arith.maximumf %823, %824 : vector<2x1xf32>
    %c1_375 = arith.constant 1 : index
    %c0_376 = arith.constant 0 : index
    %c0_377 = arith.constant 0 : index
    %826 = vector.load %arg8[%c1_375, %c0_376, %c0_377] : memref<2x100x48xbf16, #tpu.memory_space<vmem>>, vector<1x100x48xbf16>
    %827 = vector.shape_cast %826 : vector<1x100x48xbf16> to vector<100x48xbf16>
    %828 = arith.truncf %821 : vector<2x100xf32> to vector<2x100xbf16>
    %cst_378 = arith.constant dense<0.000000e+00> : vector<2x48xf32>
    %829 = tpu.matmul %828, %827, %cst_378 {dimension_numbers = #tpu.dot_dimension_numbers<[1], [0], [0], [1], [0, 0, 1, 1], [], []>} : vector<2x100xbf16>, vector<100x48xbf16>, vector<2x48xf32> -> vector<2x48xf32>
    %830 = vector.broadcast %825 : vector<2x1xf32> to vector<2x48xf32>
    %831 = arith.divf %829, %830 : vector<2x48xf32>
    %c1_379 = arith.constant 1 : index
    %c0_380 = arith.constant 0 : index
    %c0_381 = arith.constant 0 : index
    %832 = vector.load %arg9[%c1_379, %c0_380, %c0_381] : memref<2x576x192xbf16, #tpu.memory_space<vmem>>, vector<1x48x48xbf16>
    %833 = vector.shape_cast %832 : vector<1x48x48xbf16> to vector<48x48xbf16>
    %834 = arith.truncf %831 : vector<2x48xf32> to vector<2x48xbf16>
    %cst_382 = arith.constant dense<0.000000e+00> : vector<2x48xf32>
    %835 = tpu.matmul %834, %833, %cst_382 {dimension_numbers = #tpu.dot_dimension_numbers<[1], [0], [0], [1], [0, 0, 1, 1], [], []>} : vector<2x48xbf16>, vector<48x48xbf16>, vector<2x48xf32> -> vector<2x48xf32>
    %c1_383 = arith.constant 1 : index
    %c0_384 = arith.constant 0 : index
    %c0_385 = arith.constant 0 : index
    %836 = vector.load %arg10[%c1_383, %c0_384, %c0_385] : memref<2x14x192xf32, #tpu.memory_space<vmem>>, vector<1x1x48xf32>
    %837 = vector.shape_cast %836 : vector<1x1x48xf32> to vector<1x48xf32>
    %838 = vector.broadcast %837 : vector<1x48xf32> to vector<2x48xf32>
    %839 = arith.addf %835, %838 : vector<2x48xf32>
    %c1_386 = arith.constant 1 : index
    %c1_387 = arith.constant 1 : index
    %c0_388 = arith.constant 0 : index
    %840 = vector.load %arg10[%c1_386, %c1_387, %c0_388] : memref<2x14x192xf32, #tpu.memory_space<vmem>>, vector<1x1x48xf32>
    %841 = vector.shape_cast %840 : vector<1x1x48xf32> to vector<1x48xf32>
    %c1_389 = arith.constant 1 : index
    %c2_390 = arith.constant 2 : index
    %c0_391 = arith.constant 0 : index
    %842 = vector.load %arg10[%c1_389, %c2_390, %c0_391] : memref<2x14x192xf32, #tpu.memory_space<vmem>>, vector<1x1x48xf32>
    %843 = vector.shape_cast %842 : vector<1x1x48xf32> to vector<1x48xf32>
    %cst_392 = arith.constant dense<0.000000e+00> : vector<2xf32>
    %844 = vector.multi_reduction <add>, %839, %cst_392 [1] : vector<2x48xf32> to vector<2xf32>
    %845 = vector.shape_cast %844 : vector<2xf32> to vector<2x1xf32>
    %cst_393 = arith.constant 4.800000e+01 : f32
    %846 = vector.broadcast %cst_393 : f32 to vector<2x1xf32>
    %847 = arith.divf %845, %846 : vector<2x1xf32>
    %848 = vector.broadcast %847 : vector<2x1xf32> to vector<2x48xf32>
    %849 = arith.subf %839, %848 : vector<2x48xf32>
    %850 = arith.mulf %849, %849 : vector<2x48xf32>
    %cst_394 = arith.constant dense<0.000000e+00> : vector<2xf32>
    %851 = vector.multi_reduction <add>, %850, %cst_394 [1] : vector<2x48xf32> to vector<2xf32>
    %852 = vector.shape_cast %851 : vector<2xf32> to vector<2x1xf32>
    %cst_395 = arith.constant 4.800000e+01 : f32
    %853 = vector.broadcast %cst_395 : f32 to vector<2x1xf32>
    %854 = arith.divf %852, %853 : vector<2x1xf32>
    %855 = vector.broadcast %847 : vector<2x1xf32> to vector<2x48xf32>
    %856 = arith.subf %839, %855 : vector<2x48xf32>
    %cst_396 = arith.constant 9.99999974E-6 : f32
    %857 = vector.broadcast %cst_396 : f32 to vector<2x1xf32>
    %858 = arith.addf %854, %857 : vector<2x1xf32>
    %859 = math.rsqrt %858 : vector<2x1xf32>
    %860 = vector.broadcast %859 : vector<2x1xf32> to vector<2x48xf32>
    %861 = arith.mulf %856, %860 : vector<2x48xf32>
    %862 = vector.broadcast %841 : vector<1x48xf32> to vector<2x48xf32>
    %863 = arith.mulf %861, %862 : vector<2x48xf32>
    %864 = vector.broadcast %843 : vector<1x48xf32> to vector<2x48xf32>
    %865 = arith.addf %863, %864 : vector<2x48xf32>
    %c1_397 = arith.constant 1 : index
    %c48_398 = arith.constant 48 : index
    %c0_399 = arith.constant 0 : index
    %866 = vector.load %arg9[%c1_397, %c48_398, %c0_399] : memref<2x576x192xbf16, #tpu.memory_space<vmem>>, vector<1x48x192xbf16>
    %867 = vector.shape_cast %866 : vector<1x48x192xbf16> to vector<48x192xbf16>
    %868 = arith.truncf %865 : vector<2x48xf32> to vector<2x48xbf16>
    %cst_400 = arith.constant dense<0.000000e+00> : vector<2x192xf32>
    %869 = tpu.matmul %868, %867, %cst_400 {dimension_numbers = #tpu.dot_dimension_numbers<[1], [0], [0], [1], [0, 0, 1, 1], [], []>} : vector<2x48xbf16>, vector<48x192xbf16>, vector<2x192xf32> -> vector<2x192xf32>
    %c1_401 = arith.constant 1 : index
    %c3_402 = arith.constant 3 : index
    %c0_403 = arith.constant 0 : index
    %870 = vector.load %arg10[%c1_401, %c3_402, %c0_403] : memref<2x14x192xf32, #tpu.memory_space<vmem>>, vector<1x1x192xf32>
    %871 = vector.shape_cast %870 : vector<1x1x192xf32> to vector<1x192xf32>
    %872 = vector.broadcast %871 : vector<1x192xf32> to vector<2x192xf32>
    %873 = arith.addf %869, %872 : vector<2x192xf32>
    %cst_404 = arith.constant 5.000000e-01 : f32
    %874 = vector.broadcast %cst_404 : f32 to vector<2x192xf32>
    %875 = arith.mulf %874, %873 : vector<2x192xf32>
    %cst_405 = arith.constant 0.707106769 : f32
    %876 = vector.broadcast %cst_405 : f32 to vector<2x192xf32>
    %877 = arith.mulf %873, %876 : vector<2x192xf32>
    %878 = math.erf %877 : vector<2x192xf32>
    %cst_406 = arith.constant 1.000000e+00 : f32
    %879 = vector.broadcast %cst_406 : f32 to vector<2x192xf32>
    %880 = arith.addf %879, %878 : vector<2x192xf32>
    %881 = arith.mulf %875, %880 : vector<2x192xf32>
    %c1_407 = arith.constant 1 : index
    %c96_408 = arith.constant 96 : index
    %c0_409 = arith.constant 0 : index
    %882 = vector.load %arg9[%c1_407, %c96_408, %c0_409] : memref<2x576x192xbf16, #tpu.memory_space<vmem>>, vector<1x192x48xbf16>
    %883 = vector.shape_cast %882 : vector<1x192x48xbf16> to vector<192x48xbf16>
    %884 = arith.truncf %881 : vector<2x192xf32> to vector<2x192xbf16>
    %cst_410 = arith.constant dense<0.000000e+00> : vector<2x48xf32>
    %885 = tpu.matmul %884, %883, %cst_410 {dimension_numbers = #tpu.dot_dimension_numbers<[1], [0], [0], [1], [0, 0, 1, 1], [], []>} : vector<2x192xbf16>, vector<192x48xbf16>, vector<2x48xf32> -> vector<2x48xf32>
    %c1_411 = arith.constant 1 : index
    %c4_412 = arith.constant 4 : index
    %c0_413 = arith.constant 0 : index
    %886 = vector.load %arg10[%c1_411, %c4_412, %c0_413] : memref<2x14x192xf32, #tpu.memory_space<vmem>>, vector<1x1x48xf32>
    %887 = vector.shape_cast %886 : vector<1x1x48xf32> to vector<1x48xf32>
    %888 = vector.broadcast %887 : vector<1x48xf32> to vector<2x48xf32>
    %889 = arith.addf %885, %888 : vector<2x48xf32>
    %890 = arith.addf %889, %865 : vector<2x48xf32>
    %c1_414 = arith.constant 1 : index
    %c5_415 = arith.constant 5 : index
    %c0_416 = arith.constant 0 : index
    %891 = vector.load %arg10[%c1_414, %c5_415, %c0_416] : memref<2x14x192xf32, #tpu.memory_space<vmem>>, vector<1x1x48xf32>
    %892 = vector.shape_cast %891 : vector<1x1x48xf32> to vector<1x48xf32>
    %c1_417 = arith.constant 1 : index
    %c6_418 = arith.constant 6 : index
    %c0_419 = arith.constant 0 : index
    %893 = vector.load %arg10[%c1_417, %c6_418, %c0_419] : memref<2x14x192xf32, #tpu.memory_space<vmem>>, vector<1x1x48xf32>
    %894 = vector.shape_cast %893 : vector<1x1x48xf32> to vector<1x48xf32>
    %cst_420 = arith.constant dense<0.000000e+00> : vector<2xf32>
    %895 = vector.multi_reduction <add>, %890, %cst_420 [1] : vector<2x48xf32> to vector<2xf32>
    %896 = vector.shape_cast %895 : vector<2xf32> to vector<2x1xf32>
    %cst_421 = arith.constant 4.800000e+01 : f32
    %897 = vector.broadcast %cst_421 : f32 to vector<2x1xf32>
    %898 = arith.divf %896, %897 : vector<2x1xf32>
    %899 = vector.broadcast %898 : vector<2x1xf32> to vector<2x48xf32>
    %900 = arith.subf %890, %899 : vector<2x48xf32>
    %901 = arith.mulf %900, %900 : vector<2x48xf32>
    %cst_422 = arith.constant dense<0.000000e+00> : vector<2xf32>
    %902 = vector.multi_reduction <add>, %901, %cst_422 [1] : vector<2x48xf32> to vector<2xf32>
    %903 = vector.shape_cast %902 : vector<2xf32> to vector<2x1xf32>
    %cst_423 = arith.constant 4.800000e+01 : f32
    %904 = vector.broadcast %cst_423 : f32 to vector<2x1xf32>
    %905 = arith.divf %903, %904 : vector<2x1xf32>
    %906 = vector.broadcast %898 : vector<2x1xf32> to vector<2x48xf32>
    %907 = arith.subf %890, %906 : vector<2x48xf32>
    %cst_424 = arith.constant 9.99999974E-6 : f32
    %908 = vector.broadcast %cst_424 : f32 to vector<2x1xf32>
    %909 = arith.addf %905, %908 : vector<2x1xf32>
    %910 = math.rsqrt %909 : vector<2x1xf32>
    %911 = vector.broadcast %910 : vector<2x1xf32> to vector<2x48xf32>
    %912 = arith.mulf %907, %911 : vector<2x48xf32>
    %913 = vector.broadcast %892 : vector<1x48xf32> to vector<2x48xf32>
    %914 = arith.mulf %912, %913 : vector<2x48xf32>
    %915 = vector.broadcast %894 : vector<1x48xf32> to vector<2x48xf32>
    %916 = arith.addf %914, %915 : vector<2x48xf32>
    %c1_425 = arith.constant 1 : index
    %c288_426 = arith.constant 288 : index
    %c0_427 = arith.constant 0 : index
    %917 = vector.load %arg9[%c1_425, %c288_426, %c0_427] : memref<2x576x192xbf16, #tpu.memory_space<vmem>>, vector<1x48x192xbf16>
    %918 = vector.shape_cast %917 : vector<1x48x192xbf16> to vector<48x192xbf16>
    %919 = arith.truncf %916 : vector<2x48xf32> to vector<2x48xbf16>
    %cst_428 = arith.constant dense<0.000000e+00> : vector<2x192xf32>
    %920 = tpu.matmul %919, %918, %cst_428 {dimension_numbers = #tpu.dot_dimension_numbers<[1], [0], [0], [1], [0, 0, 1, 1], [], []>} : vector<2x48xbf16>, vector<48x192xbf16>, vector<2x192xf32> -> vector<2x192xf32>
    %c1_429 = arith.constant 1 : index
    %c7_430 = arith.constant 7 : index
    %c0_431 = arith.constant 0 : index
    %921 = vector.load %arg10[%c1_429, %c7_430, %c0_431] : memref<2x14x192xf32, #tpu.memory_space<vmem>>, vector<1x1x192xf32>
    %922 = vector.shape_cast %921 : vector<1x1x192xf32> to vector<1x192xf32>
    %923 = vector.broadcast %922 : vector<1x192xf32> to vector<2x192xf32>
    %924 = arith.addf %920, %923 : vector<2x192xf32>
    %cst_432 = arith.constant 5.000000e-01 : f32
    %925 = vector.broadcast %cst_432 : f32 to vector<2x192xf32>
    %926 = arith.mulf %925, %924 : vector<2x192xf32>
    %cst_433 = arith.constant 0.707106769 : f32
    %927 = vector.broadcast %cst_433 : f32 to vector<2x192xf32>
    %928 = arith.mulf %924, %927 : vector<2x192xf32>
    %929 = math.erf %928 : vector<2x192xf32>
    %cst_434 = arith.constant 1.000000e+00 : f32
    %930 = vector.broadcast %cst_434 : f32 to vector<2x192xf32>
    %931 = arith.addf %930, %929 : vector<2x192xf32>
    %932 = arith.mulf %926, %931 : vector<2x192xf32>
    %c1_435 = arith.constant 1 : index
    %c336_436 = arith.constant 336 : index
    %c0_437 = arith.constant 0 : index
    %933 = vector.load %arg9[%c1_435, %c336_436, %c0_437] : memref<2x576x192xbf16, #tpu.memory_space<vmem>>, vector<1x192x48xbf16>
    %934 = vector.shape_cast %933 : vector<1x192x48xbf16> to vector<192x48xbf16>
    %935 = arith.truncf %932 : vector<2x192xf32> to vector<2x192xbf16>
    %cst_438 = arith.constant dense<0.000000e+00> : vector<2x48xf32>
    %936 = tpu.matmul %935, %934, %cst_438 {dimension_numbers = #tpu.dot_dimension_numbers<[1], [0], [0], [1], [0, 0, 1, 1], [], []>} : vector<2x192xbf16>, vector<192x48xbf16>, vector<2x48xf32> -> vector<2x48xf32>
    %c1_439 = arith.constant 1 : index
    %c8_440 = arith.constant 8 : index
    %c0_441 = arith.constant 0 : index
    %937 = vector.load %arg10[%c1_439, %c8_440, %c0_441] : memref<2x14x192xf32, #tpu.memory_space<vmem>>, vector<1x1x48xf32>
    %938 = vector.shape_cast %937 : vector<1x1x48xf32> to vector<1x48xf32>
    %939 = vector.broadcast %938 : vector<1x48xf32> to vector<2x48xf32>
    %940 = arith.addf %936, %939 : vector<2x48xf32>
    %941 = arith.addf %940, %916 : vector<2x48xf32>
    %c1_442 = arith.constant 1 : index
    %c9_443 = arith.constant 9 : index
    %c0_444 = arith.constant 0 : index
    %942 = vector.load %arg10[%c1_442, %c9_443, %c0_444] : memref<2x14x192xf32, #tpu.memory_space<vmem>>, vector<1x1x48xf32>
    %943 = vector.shape_cast %942 : vector<1x1x48xf32> to vector<1x48xf32>
    %c1_445 = arith.constant 1 : index
    %c10_446 = arith.constant 10 : index
    %c0_447 = arith.constant 0 : index
    %944 = vector.load %arg10[%c1_445, %c10_446, %c0_447] : memref<2x14x192xf32, #tpu.memory_space<vmem>>, vector<1x1x48xf32>
    %945 = vector.shape_cast %944 : vector<1x1x48xf32> to vector<1x48xf32>
    %cst_448 = arith.constant dense<0.000000e+00> : vector<2xf32>
    %946 = vector.multi_reduction <add>, %941, %cst_448 [1] : vector<2x48xf32> to vector<2xf32>
    %947 = vector.shape_cast %946 : vector<2xf32> to vector<2x1xf32>
    %cst_449 = arith.constant 4.800000e+01 : f32
    %948 = vector.broadcast %cst_449 : f32 to vector<2x1xf32>
    %949 = arith.divf %947, %948 : vector<2x1xf32>
    %950 = vector.broadcast %949 : vector<2x1xf32> to vector<2x48xf32>
    %951 = arith.subf %941, %950 : vector<2x48xf32>
    %952 = arith.mulf %951, %951 : vector<2x48xf32>
    %cst_450 = arith.constant dense<0.000000e+00> : vector<2xf32>
    %953 = vector.multi_reduction <add>, %952, %cst_450 [1] : vector<2x48xf32> to vector<2xf32>
    %954 = vector.shape_cast %953 : vector<2xf32> to vector<2x1xf32>
    %cst_451 = arith.constant 4.800000e+01 : f32
    %955 = vector.broadcast %cst_451 : f32 to vector<2x1xf32>
    %956 = arith.divf %954, %955 : vector<2x1xf32>
    %957 = vector.broadcast %949 : vector<2x1xf32> to vector<2x48xf32>
    %958 = arith.subf %941, %957 : vector<2x48xf32>
    %cst_452 = arith.constant 9.99999974E-6 : f32
    %959 = vector.broadcast %cst_452 : f32 to vector<2x1xf32>
    %960 = arith.addf %956, %959 : vector<2x1xf32>
    %961 = math.rsqrt %960 : vector<2x1xf32>
    %962 = vector.broadcast %961 : vector<2x1xf32> to vector<2x48xf32>
    %963 = arith.mulf %958, %962 : vector<2x48xf32>
    %964 = vector.broadcast %943 : vector<1x48xf32> to vector<2x48xf32>
    %965 = arith.mulf %963, %964 : vector<2x48xf32>
    %966 = vector.broadcast %945 : vector<1x48xf32> to vector<2x48xf32>
    %967 = arith.addf %965, %966 : vector<2x48xf32>
    %c1_453 = arith.constant 1 : index
    %c528_454 = arith.constant 528 : index
    %c0_455 = arith.constant 0 : index
    %968 = vector.load %arg9[%c1_453, %c528_454, %c0_455] : memref<2x576x192xbf16, #tpu.memory_space<vmem>>, vector<1x48x32xbf16>
    %969 = vector.shape_cast %968 : vector<1x48x32xbf16> to vector<48x32xbf16>
    %970 = arith.truncf %967 : vector<2x48xf32> to vector<2x48xbf16>
    %cst_456 = arith.constant dense<0.000000e+00> : vector<2x32xf32>
    %971 = tpu.matmul %970, %969, %cst_456 {dimension_numbers = #tpu.dot_dimension_numbers<[1], [0], [0], [1], [0, 0, 1, 1], [], []>} : vector<2x48xbf16>, vector<48x32xbf16>, vector<2x32xf32> -> vector<2x32xf32>
    %c1_457 = arith.constant 1 : index
    %c11_458 = arith.constant 11 : index
    %c0_459 = arith.constant 0 : index
    %972 = vector.load %arg10[%c1_457, %c11_458, %c0_459] : memref<2x14x192xf32, #tpu.memory_space<vmem>>, vector<1x1x32xf32>
    %973 = vector.shape_cast %972 : vector<1x1x32xf32> to vector<1x32xf32>
    %974 = vector.broadcast %973 : vector<1x32xf32> to vector<2x32xf32>
    %975 = arith.addf %971, %974 : vector<2x32xf32>
    %c1_460 = arith.constant 1 : index
    %c12_461 = arith.constant 12 : index
    %c0_462 = arith.constant 0 : index
    %976 = vector.load %arg10[%c1_460, %c12_461, %c0_462] : memref<2x14x192xf32, #tpu.memory_space<vmem>>, vector<1x1x32xf32>
    %977 = vector.shape_cast %976 : vector<1x1x32xf32> to vector<1x32xf32>
    %c1_463 = arith.constant 1 : index
    %c13_464 = arith.constant 13 : index
    %c0_465 = arith.constant 0 : index
    %978 = vector.load %arg10[%c1_463, %c13_464, %c0_465] : memref<2x14x192xf32, #tpu.memory_space<vmem>>, vector<1x1x32xf32>
    %979 = vector.shape_cast %978 : vector<1x1x32xf32> to vector<1x32xf32>
    %cst_466 = arith.constant dense<0.000000e+00> : vector<2xf32>
    %980 = vector.multi_reduction <add>, %975, %cst_466 [1] : vector<2x32xf32> to vector<2xf32>
    %981 = vector.shape_cast %980 : vector<2xf32> to vector<2x1xf32>
    %cst_467 = arith.constant 3.200000e+01 : f32
    %982 = vector.broadcast %cst_467 : f32 to vector<2x1xf32>
    %983 = arith.divf %981, %982 : vector<2x1xf32>
    %984 = vector.broadcast %983 : vector<2x1xf32> to vector<2x32xf32>
    %985 = arith.subf %975, %984 : vector<2x32xf32>
    %986 = arith.mulf %985, %985 : vector<2x32xf32>
    %cst_468 = arith.constant dense<0.000000e+00> : vector<2xf32>
    %987 = vector.multi_reduction <add>, %986, %cst_468 [1] : vector<2x32xf32> to vector<2xf32>
    %988 = vector.shape_cast %987 : vector<2xf32> to vector<2x1xf32>
    %cst_469 = arith.constant 3.200000e+01 : f32
    %989 = vector.broadcast %cst_469 : f32 to vector<2x1xf32>
    %990 = arith.divf %988, %989 : vector<2x1xf32>
    %991 = vector.broadcast %983 : vector<2x1xf32> to vector<2x32xf32>
    %992 = arith.subf %975, %991 : vector<2x32xf32>
    %cst_470 = arith.constant 9.99999974E-6 : f32
    %993 = vector.broadcast %cst_470 : f32 to vector<2x1xf32>
    %994 = arith.addf %990, %993 : vector<2x1xf32>
    %995 = math.rsqrt %994 : vector<2x1xf32>
    %996 = vector.broadcast %995 : vector<2x1xf32> to vector<2x32xf32>
    %997 = arith.mulf %992, %996 : vector<2x32xf32>
    %998 = vector.broadcast %977 : vector<1x32xf32> to vector<2x32xf32>
    %999 = arith.mulf %997, %998 : vector<2x32xf32>
    %1000 = vector.broadcast %979 : vector<1x32xf32> to vector<2x32xf32>
    %1001 = arith.addf %999, %1000 : vector<2x32xf32>
    %c1_471 = arith.constant 1 : index
    %c0_472 = arith.constant 0 : index
    %c0_473 = arith.constant 0 : index
    %1002 = vector.load %arg11[%c1_471, %c0_472, %c0_473] : memref<2x736x256xbf16, #tpu.memory_space<vmem>>, vector<1x32x64xbf16>
    %1003 = vector.shape_cast %1002 : vector<1x32x64xbf16> to vector<32x64xbf16>
    %1004 = arith.truncf %1001 : vector<2x32xf32> to vector<2x32xbf16>
    %cst_474 = arith.constant dense<0.000000e+00> : vector<2x64xf32>
    %1005 = tpu.matmul %1004, %1003, %cst_474 {dimension_numbers = #tpu.dot_dimension_numbers<[1], [0], [0], [1], [0, 0, 1, 1], [], []>} : vector<2x32xbf16>, vector<32x64xbf16>, vector<2x64xf32> -> vector<2x64xf32>
    %c1_475 = arith.constant 1 : index
    %c0_476 = arith.constant 0 : index
    %c0_477 = arith.constant 0 : index
    %1006 = vector.load %arg12[%c1_475, %c0_476, %c0_477] : memref<2x14x256xf32, #tpu.memory_space<vmem>>, vector<1x1x64xf32>
    %1007 = vector.shape_cast %1006 : vector<1x1x64xf32> to vector<1x64xf32>
    %1008 = vector.broadcast %1007 : vector<1x64xf32> to vector<2x64xf32>
    %1009 = arith.addf %1005, %1008 : vector<2x64xf32>
    %c1_478 = arith.constant 1 : index
    %c1_479 = arith.constant 1 : index
    %c0_480 = arith.constant 0 : index
    %1010 = vector.load %arg12[%c1_478, %c1_479, %c0_480] : memref<2x14x256xf32, #tpu.memory_space<vmem>>, vector<1x1x64xf32>
    %1011 = vector.shape_cast %1010 : vector<1x1x64xf32> to vector<1x64xf32>
    %c1_481 = arith.constant 1 : index
    %c2_482 = arith.constant 2 : index
    %c0_483 = arith.constant 0 : index
    %1012 = vector.load %arg12[%c1_481, %c2_482, %c0_483] : memref<2x14x256xf32, #tpu.memory_space<vmem>>, vector<1x1x64xf32>
    %1013 = vector.shape_cast %1012 : vector<1x1x64xf32> to vector<1x64xf32>
    %cst_484 = arith.constant dense<0.000000e+00> : vector<2xf32>
    %1014 = vector.multi_reduction <add>, %1009, %cst_484 [1] : vector<2x64xf32> to vector<2xf32>
    %1015 = vector.shape_cast %1014 : vector<2xf32> to vector<2x1xf32>
    %cst_485 = arith.constant 6.400000e+01 : f32
    %1016 = vector.broadcast %cst_485 : f32 to vector<2x1xf32>
    %1017 = arith.divf %1015, %1016 : vector<2x1xf32>
    %1018 = vector.broadcast %1017 : vector<2x1xf32> to vector<2x64xf32>
    %1019 = arith.subf %1009, %1018 : vector<2x64xf32>
    %1020 = arith.mulf %1019, %1019 : vector<2x64xf32>
    %cst_486 = arith.constant dense<0.000000e+00> : vector<2xf32>
    %1021 = vector.multi_reduction <add>, %1020, %cst_486 [1] : vector<2x64xf32> to vector<2xf32>
    %1022 = vector.shape_cast %1021 : vector<2xf32> to vector<2x1xf32>
    %cst_487 = arith.constant 6.400000e+01 : f32
    %1023 = vector.broadcast %cst_487 : f32 to vector<2x1xf32>
    %1024 = arith.divf %1022, %1023 : vector<2x1xf32>
    %1025 = vector.broadcast %1017 : vector<2x1xf32> to vector<2x64xf32>
    %1026 = arith.subf %1009, %1025 : vector<2x64xf32>
    %cst_488 = arith.constant 9.99999974E-6 : f32
    %1027 = vector.broadcast %cst_488 : f32 to vector<2x1xf32>
    %1028 = arith.addf %1024, %1027 : vector<2x1xf32>
    %1029 = math.rsqrt %1028 : vector<2x1xf32>
    %1030 = vector.broadcast %1029 : vector<2x1xf32> to vector<2x64xf32>
    %1031 = arith.mulf %1026, %1030 : vector<2x64xf32>
    %1032 = vector.broadcast %1011 : vector<1x64xf32> to vector<2x64xf32>
    %1033 = arith.mulf %1031, %1032 : vector<2x64xf32>
    %1034 = vector.broadcast %1013 : vector<1x64xf32> to vector<2x64xf32>
    %1035 = arith.addf %1033, %1034 : vector<2x64xf32>
    %c1_489 = arith.constant 1 : index
    %c32_490 = arith.constant 32 : index
    %c0_491 = arith.constant 0 : index
    %1036 = vector.load %arg11[%c1_489, %c32_490, %c0_491] : memref<2x736x256xbf16, #tpu.memory_space<vmem>>, vector<1x64x256xbf16>
    %1037 = vector.shape_cast %1036 : vector<1x64x256xbf16> to vector<64x256xbf16>
    %1038 = arith.truncf %1035 : vector<2x64xf32> to vector<2x64xbf16>
    %cst_492 = arith.constant dense<0.000000e+00> : vector<2x256xf32>
    %1039 = tpu.matmul %1038, %1037, %cst_492 {dimension_numbers = #tpu.dot_dimension_numbers<[1], [0], [0], [1], [0, 0, 1, 1], [], []>} : vector<2x64xbf16>, vector<64x256xbf16>, vector<2x256xf32> -> vector<2x256xf32>
    %c1_493 = arith.constant 1 : index
    %c3_494 = arith.constant 3 : index
    %c0_495 = arith.constant 0 : index
    %1040 = vector.load %arg12[%c1_493, %c3_494, %c0_495] : memref<2x14x256xf32, #tpu.memory_space<vmem>>, vector<1x1x256xf32>
    %1041 = vector.shape_cast %1040 : vector<1x1x256xf32> to vector<1x256xf32>
    %1042 = vector.broadcast %1041 : vector<1x256xf32> to vector<2x256xf32>
    %1043 = arith.addf %1039, %1042 : vector<2x256xf32>
    %cst_496 = arith.constant 5.000000e-01 : f32
    %1044 = vector.broadcast %cst_496 : f32 to vector<2x256xf32>
    %1045 = arith.mulf %1044, %1043 : vector<2x256xf32>
    %cst_497 = arith.constant 0.707106769 : f32
    %1046 = vector.broadcast %cst_497 : f32 to vector<2x256xf32>
    %1047 = arith.mulf %1043, %1046 : vector<2x256xf32>
    %1048 = math.erf %1047 : vector<2x256xf32>
    %cst_498 = arith.constant 1.000000e+00 : f32
    %1049 = vector.broadcast %cst_498 : f32 to vector<2x256xf32>
    %1050 = arith.addf %1049, %1048 : vector<2x256xf32>
    %1051 = arith.mulf %1045, %1050 : vector<2x256xf32>
    %c1_499 = arith.constant 1 : index
    %c96_500 = arith.constant 96 : index
    %c0_501 = arith.constant 0 : index
    %1052 = vector.load %arg11[%c1_499, %c96_500, %c0_501] : memref<2x736x256xbf16, #tpu.memory_space<vmem>>, vector<1x256x64xbf16>
    %1053 = vector.shape_cast %1052 : vector<1x256x64xbf16> to vector<256x64xbf16>
    %1054 = arith.truncf %1051 : vector<2x256xf32> to vector<2x256xbf16>
    %cst_502 = arith.constant dense<0.000000e+00> : vector<2x64xf32>
    %1055 = tpu.matmul %1054, %1053, %cst_502 {dimension_numbers = #tpu.dot_dimension_numbers<[1], [0], [0], [1], [0, 0, 1, 1], [], []>} : vector<2x256xbf16>, vector<256x64xbf16>, vector<2x64xf32> -> vector<2x64xf32>
    %c1_503 = arith.constant 1 : index
    %c4_504 = arith.constant 4 : index
    %c0_505 = arith.constant 0 : index
    %1056 = vector.load %arg12[%c1_503, %c4_504, %c0_505] : memref<2x14x256xf32, #tpu.memory_space<vmem>>, vector<1x1x64xf32>
    %1057 = vector.shape_cast %1056 : vector<1x1x64xf32> to vector<1x64xf32>
    %1058 = vector.broadcast %1057 : vector<1x64xf32> to vector<2x64xf32>
    %1059 = arith.addf %1055, %1058 : vector<2x64xf32>
    %1060 = arith.addf %1059, %1035 : vector<2x64xf32>
    %c1_506 = arith.constant 1 : index
    %c5_507 = arith.constant 5 : index
    %c0_508 = arith.constant 0 : index
    %1061 = vector.load %arg12[%c1_506, %c5_507, %c0_508] : memref<2x14x256xf32, #tpu.memory_space<vmem>>, vector<1x1x64xf32>
    %1062 = vector.shape_cast %1061 : vector<1x1x64xf32> to vector<1x64xf32>
    %c1_509 = arith.constant 1 : index
    %c6_510 = arith.constant 6 : index
    %c0_511 = arith.constant 0 : index
    %1063 = vector.load %arg12[%c1_509, %c6_510, %c0_511] : memref<2x14x256xf32, #tpu.memory_space<vmem>>, vector<1x1x64xf32>
    %1064 = vector.shape_cast %1063 : vector<1x1x64xf32> to vector<1x64xf32>
    %cst_512 = arith.constant dense<0.000000e+00> : vector<2xf32>
    %1065 = vector.multi_reduction <add>, %1060, %cst_512 [1] : vector<2x64xf32> to vector<2xf32>
    %1066 = vector.shape_cast %1065 : vector<2xf32> to vector<2x1xf32>
    %cst_513 = arith.constant 6.400000e+01 : f32
    %1067 = vector.broadcast %cst_513 : f32 to vector<2x1xf32>
    %1068 = arith.divf %1066, %1067 : vector<2x1xf32>
    %1069 = vector.broadcast %1068 : vector<2x1xf32> to vector<2x64xf32>
    %1070 = arith.subf %1060, %1069 : vector<2x64xf32>
    %1071 = arith.mulf %1070, %1070 : vector<2x64xf32>
    %cst_514 = arith.constant dense<0.000000e+00> : vector<2xf32>
    %1072 = vector.multi_reduction <add>, %1071, %cst_514 [1] : vector<2x64xf32> to vector<2xf32>
    %1073 = vector.shape_cast %1072 : vector<2xf32> to vector<2x1xf32>
    %cst_515 = arith.constant 6.400000e+01 : f32
    %1074 = vector.broadcast %cst_515 : f32 to vector<2x1xf32>
    %1075 = arith.divf %1073, %1074 : vector<2x1xf32>
    %1076 = vector.broadcast %1068 : vector<2x1xf32> to vector<2x64xf32>
    %1077 = arith.subf %1060, %1076 : vector<2x64xf32>
    %cst_516 = arith.constant 9.99999974E-6 : f32
    %1078 = vector.broadcast %cst_516 : f32 to vector<2x1xf32>
    %1079 = arith.addf %1075, %1078 : vector<2x1xf32>
    %1080 = math.rsqrt %1079 : vector<2x1xf32>
    %1081 = vector.broadcast %1080 : vector<2x1xf32> to vector<2x64xf32>
    %1082 = arith.mulf %1077, %1081 : vector<2x64xf32>
    %1083 = vector.broadcast %1062 : vector<1x64xf32> to vector<2x64xf32>
    %1084 = arith.mulf %1082, %1083 : vector<2x64xf32>
    %1085 = vector.broadcast %1064 : vector<1x64xf32> to vector<2x64xf32>
    %1086 = arith.addf %1084, %1085 : vector<2x64xf32>
    %c1_517 = arith.constant 1 : index
    %c352_518 = arith.constant 352 : index
    %c0_519 = arith.constant 0 : index
    %1087 = vector.load %arg11[%c1_517, %c352_518, %c0_519] : memref<2x736x256xbf16, #tpu.memory_space<vmem>>, vector<1x64x256xbf16>
    %1088 = vector.shape_cast %1087 : vector<1x64x256xbf16> to vector<64x256xbf16>
    %1089 = arith.truncf %1086 : vector<2x64xf32> to vector<2x64xbf16>
    %cst_520 = arith.constant dense<0.000000e+00> : vector<2x256xf32>
    %1090 = tpu.matmul %1089, %1088, %cst_520 {dimension_numbers = #tpu.dot_dimension_numbers<[1], [0], [0], [1], [0, 0, 1, 1], [], []>} : vector<2x64xbf16>, vector<64x256xbf16>, vector<2x256xf32> -> vector<2x256xf32>
    %c1_521 = arith.constant 1 : index
    %c7_522 = arith.constant 7 : index
    %c0_523 = arith.constant 0 : index
    %1091 = vector.load %arg12[%c1_521, %c7_522, %c0_523] : memref<2x14x256xf32, #tpu.memory_space<vmem>>, vector<1x1x256xf32>
    %1092 = vector.shape_cast %1091 : vector<1x1x256xf32> to vector<1x256xf32>
    %1093 = vector.broadcast %1092 : vector<1x256xf32> to vector<2x256xf32>
    %1094 = arith.addf %1090, %1093 : vector<2x256xf32>
    %cst_524 = arith.constant 5.000000e-01 : f32
    %1095 = vector.broadcast %cst_524 : f32 to vector<2x256xf32>
    %1096 = arith.mulf %1095, %1094 : vector<2x256xf32>
    %cst_525 = arith.constant 0.707106769 : f32
    %1097 = vector.broadcast %cst_525 : f32 to vector<2x256xf32>
    %1098 = arith.mulf %1094, %1097 : vector<2x256xf32>
    %1099 = math.erf %1098 : vector<2x256xf32>
    %cst_526 = arith.constant 1.000000e+00 : f32
    %1100 = vector.broadcast %cst_526 : f32 to vector<2x256xf32>
    %1101 = arith.addf %1100, %1099 : vector<2x256xf32>
    %1102 = arith.mulf %1096, %1101 : vector<2x256xf32>
    %c1_527 = arith.constant 1 : index
    %c416_528 = arith.constant 416 : index
    %c0_529 = arith.constant 0 : index
    %1103 = vector.load %arg11[%c1_527, %c416_528, %c0_529] : memref<2x736x256xbf16, #tpu.memory_space<vmem>>, vector<1x256x64xbf16>
    %1104 = vector.shape_cast %1103 : vector<1x256x64xbf16> to vector<256x64xbf16>
    %1105 = arith.truncf %1102 : vector<2x256xf32> to vector<2x256xbf16>
    %cst_530 = arith.constant dense<0.000000e+00> : vector<2x64xf32>
    %1106 = tpu.matmul %1105, %1104, %cst_530 {dimension_numbers = #tpu.dot_dimension_numbers<[1], [0], [0], [1], [0, 0, 1, 1], [], []>} : vector<2x256xbf16>, vector<256x64xbf16>, vector<2x64xf32> -> vector<2x64xf32>
    %c1_531 = arith.constant 1 : index
    %c8_532 = arith.constant 8 : index
    %c0_533 = arith.constant 0 : index
    %1107 = vector.load %arg12[%c1_531, %c8_532, %c0_533] : memref<2x14x256xf32, #tpu.memory_space<vmem>>, vector<1x1x64xf32>
    %1108 = vector.shape_cast %1107 : vector<1x1x64xf32> to vector<1x64xf32>
    %1109 = vector.broadcast %1108 : vector<1x64xf32> to vector<2x64xf32>
    %1110 = arith.addf %1106, %1109 : vector<2x64xf32>
    %1111 = arith.addf %1110, %1086 : vector<2x64xf32>
    %c1_534 = arith.constant 1 : index
    %c9_535 = arith.constant 9 : index
    %c0_536 = arith.constant 0 : index
    %1112 = vector.load %arg12[%c1_534, %c9_535, %c0_536] : memref<2x14x256xf32, #tpu.memory_space<vmem>>, vector<1x1x64xf32>
    %1113 = vector.shape_cast %1112 : vector<1x1x64xf32> to vector<1x64xf32>
    %c1_537 = arith.constant 1 : index
    %c10_538 = arith.constant 10 : index
    %c0_539 = arith.constant 0 : index
    %1114 = vector.load %arg12[%c1_537, %c10_538, %c0_539] : memref<2x14x256xf32, #tpu.memory_space<vmem>>, vector<1x1x64xf32>
    %1115 = vector.shape_cast %1114 : vector<1x1x64xf32> to vector<1x64xf32>
    %cst_540 = arith.constant dense<0.000000e+00> : vector<2xf32>
    %1116 = vector.multi_reduction <add>, %1111, %cst_540 [1] : vector<2x64xf32> to vector<2xf32>
    %1117 = vector.shape_cast %1116 : vector<2xf32> to vector<2x1xf32>
    %cst_541 = arith.constant 6.400000e+01 : f32
    %1118 = vector.broadcast %cst_541 : f32 to vector<2x1xf32>
    %1119 = arith.divf %1117, %1118 : vector<2x1xf32>
    %1120 = vector.broadcast %1119 : vector<2x1xf32> to vector<2x64xf32>
    %1121 = arith.subf %1111, %1120 : vector<2x64xf32>
    %1122 = arith.mulf %1121, %1121 : vector<2x64xf32>
    %cst_542 = arith.constant dense<0.000000e+00> : vector<2xf32>
    %1123 = vector.multi_reduction <add>, %1122, %cst_542 [1] : vector<2x64xf32> to vector<2xf32>
    %1124 = vector.shape_cast %1123 : vector<2xf32> to vector<2x1xf32>
    %cst_543 = arith.constant 6.400000e+01 : f32
    %1125 = vector.broadcast %cst_543 : f32 to vector<2x1xf32>
    %1126 = arith.divf %1124, %1125 : vector<2x1xf32>
    %1127 = vector.broadcast %1119 : vector<2x1xf32> to vector<2x64xf32>
    %1128 = arith.subf %1111, %1127 : vector<2x64xf32>
    %cst_544 = arith.constant 9.99999974E-6 : f32
    %1129 = vector.broadcast %cst_544 : f32 to vector<2x1xf32>
    %1130 = arith.addf %1126, %1129 : vector<2x1xf32>
    %1131 = math.rsqrt %1130 : vector<2x1xf32>
    %1132 = vector.broadcast %1131 : vector<2x1xf32> to vector<2x64xf32>
    %1133 = arith.mulf %1128, %1132 : vector<2x64xf32>
    %1134 = vector.broadcast %1113 : vector<1x64xf32> to vector<2x64xf32>
    %1135 = arith.mulf %1133, %1134 : vector<2x64xf32>
    %1136 = vector.broadcast %1115 : vector<1x64xf32> to vector<2x64xf32>
    %1137 = arith.addf %1135, %1136 : vector<2x64xf32>
    %c1_545 = arith.constant 1 : index
    %c672_546 = arith.constant 672 : index
    %c0_547 = arith.constant 0 : index
    %1138 = vector.load %arg11[%c1_545, %c672_546, %c0_547] : memref<2x736x256xbf16, #tpu.memory_space<vmem>>, vector<1x64x32xbf16>
    %1139 = vector.shape_cast %1138 : vector<1x64x32xbf16> to vector<64x32xbf16>
    %1140 = arith.truncf %1137 : vector<2x64xf32> to vector<2x64xbf16>
    %cst_548 = arith.constant dense<0.000000e+00> : vector<2x32xf32>
    %1141 = tpu.matmul %1140, %1139, %cst_548 {dimension_numbers = #tpu.dot_dimension_numbers<[1], [0], [0], [1], [0, 0, 1, 1], [], []>} : vector<2x64xbf16>, vector<64x32xbf16>, vector<2x32xf32> -> vector<2x32xf32>
    %c1_549 = arith.constant 1 : index
    %c11_550 = arith.constant 11 : index
    %c0_551 = arith.constant 0 : index
    %1142 = vector.load %arg12[%c1_549, %c11_550, %c0_551] : memref<2x14x256xf32, #tpu.memory_space<vmem>>, vector<1x1x32xf32>
    %1143 = vector.shape_cast %1142 : vector<1x1x32xf32> to vector<1x32xf32>
    %1144 = vector.broadcast %1143 : vector<1x32xf32> to vector<2x32xf32>
    %1145 = arith.addf %1141, %1144 : vector<2x32xf32>
    %c1_552 = arith.constant 1 : index
    %c12_553 = arith.constant 12 : index
    %c0_554 = arith.constant 0 : index
    %1146 = vector.load %arg12[%c1_552, %c12_553, %c0_554] : memref<2x14x256xf32, #tpu.memory_space<vmem>>, vector<1x1x32xf32>
    %1147 = vector.shape_cast %1146 : vector<1x1x32xf32> to vector<1x32xf32>
    %c1_555 = arith.constant 1 : index
    %c13_556 = arith.constant 13 : index
    %c0_557 = arith.constant 0 : index
    %1148 = vector.load %arg12[%c1_555, %c13_556, %c0_557] : memref<2x14x256xf32, #tpu.memory_space<vmem>>, vector<1x1x32xf32>
    %1149 = vector.shape_cast %1148 : vector<1x1x32xf32> to vector<1x32xf32>
    %cst_558 = arith.constant dense<0.000000e+00> : vector<2xf32>
    %1150 = vector.multi_reduction <add>, %1145, %cst_558 [1] : vector<2x32xf32> to vector<2xf32>
    %1151 = vector.shape_cast %1150 : vector<2xf32> to vector<2x1xf32>
    %cst_559 = arith.constant 3.200000e+01 : f32
    %1152 = vector.broadcast %cst_559 : f32 to vector<2x1xf32>
    %1153 = arith.divf %1151, %1152 : vector<2x1xf32>
    %1154 = vector.broadcast %1153 : vector<2x1xf32> to vector<2x32xf32>
    %1155 = arith.subf %1145, %1154 : vector<2x32xf32>
    %1156 = arith.mulf %1155, %1155 : vector<2x32xf32>
    %cst_560 = arith.constant dense<0.000000e+00> : vector<2xf32>
    %1157 = vector.multi_reduction <add>, %1156, %cst_560 [1] : vector<2x32xf32> to vector<2xf32>
    %1158 = vector.shape_cast %1157 : vector<2xf32> to vector<2x1xf32>
    %cst_561 = arith.constant 3.200000e+01 : f32
    %1159 = vector.broadcast %cst_561 : f32 to vector<2x1xf32>
    %1160 = arith.divf %1158, %1159 : vector<2x1xf32>
    %1161 = vector.broadcast %1153 : vector<2x1xf32> to vector<2x32xf32>
    %1162 = arith.subf %1145, %1161 : vector<2x32xf32>
    %cst_562 = arith.constant 9.99999974E-6 : f32
    %1163 = vector.broadcast %cst_562 : f32 to vector<2x1xf32>
    %1164 = arith.addf %1160, %1163 : vector<2x1xf32>
    %1165 = math.rsqrt %1164 : vector<2x1xf32>
    %1166 = vector.broadcast %1165 : vector<2x1xf32> to vector<2x32xf32>
    %1167 = arith.mulf %1162, %1166 : vector<2x32xf32>
    %1168 = vector.broadcast %1147 : vector<1x32xf32> to vector<2x32xf32>
    %1169 = arith.mulf %1167, %1168 : vector<2x32xf32>
    %1170 = vector.broadcast %1149 : vector<1x32xf32> to vector<2x32xf32>
    %1171 = arith.addf %1169, %1170 : vector<2x32xf32>
    %1172 = arith.mulf %1171, %1171 : vector<2x32xf32>
    %cst_563 = arith.constant dense<0.000000e+00> : vector<2xf32>
    %1173 = vector.multi_reduction <add>, %1172, %cst_563 [1] : vector<2x32xf32> to vector<2xf32>
    %1174 = vector.shape_cast %1173 : vector<2xf32> to vector<2x1xf32>
    %cst_564 = arith.constant 1.000000e-24 : f32
    %1175 = vector.broadcast %cst_564 : f32 to vector<2x1xf32>
    %1176 = arith.maximumf %1174, %1175 : vector<2x1xf32>
    %1177 = math.rsqrt %1176 : vector<2x1xf32>
    %1178 = vector.broadcast %1177 : vector<2x1xf32> to vector<2x32xf32>
    %1179 = arith.mulf %1171, %1178 : vector<2x32xf32>
    %c4_565 = arith.constant 4 : index
    %c0_566 = arith.constant 0 : index
    %1180 = vector.load %arg13[%c4_565, %c0_566] : memref<8x128xf32, #tpu.memory_space<vmem>>, vector<2x32xf32>
    tpu.vector_store %arg13[%c4_565, %c0_566], %1179 {strides = array<i32>} : memref<8x128xf32, #tpu.memory_space<vmem>>, vector<2x32xf32>,
    return
  }
}

</mosaic_0001>

<bundles_post_ra>
// kernel: tpu_custom_call.1
= control target key start
LH: loop header
LB: loop body
LE: loop exit
PB: predicated region body
PF: predicated region fallthrough
CT: control target
= control target key end

     0   :  { %18 = vsyncpa [#allocation3], 0  ;;  %s8762_s0 = inlined_call_operand.vmem [shape: f32[2,8,64], index: 0, kind: input, shape index: {}]   ;;  %s8763_s1 = inlined_call_operand.vmem [shape: f32[2,64], index: 1, kind: input, shape index: {}]   ;;  %s8764_s2 = inlined_call_operand.hbm [shape: bf16[1088,256], index: 2, kind: input, shape index: {}]   ;;  %s8765_s3 = inlined_call_operand.vmem [shape: f32[18,256], index: 3, kind: input, shape index: {}]   ;;  %s8766_s4 = inlined_call_operand.vmem [shape: bf16[736,256], index: 4, kind: input, shape index: {}]   ;;  %s8767_s5 = inlined_call_operand.vmem [shape: f32[14,256], index: 5, kind: input, shape index: {}]   ;;  %s8768_s6 = inlined_call_operand.vmem [shape: s32[2,2,6], index: 6, kind: input, shape index: {}]   ;;  %s8769_s7 = inlined_call_operand.vmem [shape: f32[2,2,6], index: 7, kind: input, shape index: {}]   ;;  %s8770_s8 = inlined_call_operand.vmem [shape: bf16[2,100,48], index: 8, kind: input, shape index: {}]   ;;  %s8771_s9 = inlined_call_operand.vmem [shape: bf16[2,576,192], index: 9, kind: input, shape index: {}]   ;;  %s8772_s10 = inlined_call_operand.vmem [shape: f32[2,14,192], index: 10, kind: input, shape index: {}]   ;;  %s8773_s11 = inlined_call_operand.vmem [shape: bf16[2,736,256], index: 11, kind: input, shape index: {}]   ;;  %s8774_s12 = inlined_call_operand.vmem [shape: f32[2,14,256], index: 12, kind: input, shape index: {}]   ;;  %s8775_s13 = inlined_call_operand.hbm [shape: f32[8,128], index: 13, kind: output, shape index: {}]  }
   0x1   :  { %19 = vsyncpa [#allocation4], 0  ;;  %s7192_s25 = smov [#allocation2]   ;;  %s7144_s29 = scalar_lea.hbm %s8764_s2, 17408 }
   0x2   :  { %s29_s26 = sshll.u32 %s7192_s25, 4  ;;  %p7145_p0 = scmp.ne.s32.totalorder %s8764_s2, %s7144_s29  ;;  %s30_s26 = int_to_ptr.vmem [resolvable:$true] %s29_s26 }
   0x3   :  { %p7148_p1 = scmp.lt.u32.totalorder %s7144_s29, %s8764_s2 }
   0x5   :  { %p7150_p2 = pnand %p7148_p1, %p7145_p0 }
   0x7   :  { %7153 = shalt.err (!%p7150_p2)
}
   0x8   :  { %s7154_s17 = scalar_lea.vmem %s30_s26, 17408  ;;  %p7159_p4 = scmp.lt.s32.totalorder %s30_s26, %s30_s26 }
   0x9   :  { %p7155_p3 = scmp.ne.s32.totalorder %s30_s26, %s7154_s17  ;;  %p7160_p5 = scmp.lt.s32.totalorder %s7154_s17, %s7154_s17 }
   0xb   :  { %p7161_p6 = por %p7160_p5, %p7159_p4 }
   0xd   :  { %p7162_p7 = pnand %p7161_p6, %p7155_p3 }
   0xf   :  { %7165 = shalt.err (!%p7162_p7)
}
  0x10   :  { %s7193_s18 = smov 128   ;;  %s7194_s19 = smov 8  }
  0x11   :  { %35 = dma.hbm_to_vmem [thread:$0]  %s8764_s2, 17408, %s30_s26, [#allocation3], %s7193_s18, %s7193_s18, %s7194_s19  }
  0x12   :  { %7188 = dma.done.wait [#allocation3], 17408  }
  0x13   :  { %7189 = vsyncadd [#allocation3], 4294949888  ;;  %vm65_vm0 = vcmask 523264   ;;  %v61_v0 = vld [vmem:[%s8762_s0] sm:$0xff]  ;;  %v62_v1 = vld [vmem:[%s8762_s0 + $0x8] sm:$0xff]  ;;  %v136_v52 = vlaneseq  ;;  %vm146_vm1 = vcmask 1041409  }
  0x14   :  { %v66_v2 = vsel %vm65_vm0, %v61_v0, 0.0  ;;  %v69_v3 = vsel %vm65_vm0, %v62_v1, 0.0  ;;  %v5595_v21 = vld [vmem:[%s8763_s1] ss:$0 sm:$0xff]  ;;  %v5596_v23 = vld [vmem:[%s8763_s1 + $0x1] ss:$0 sm:$0xff] }
  0x15   :  { %67 = vadd.xlane.f32.xlu0 %v66_v2  ;;  %v7309_v53 = vand.u32 127, %v136_v52  ;;  %v139_v54 = vshrl.u32 %v136_v52, 7  ;;  %vm149_vm2 = vcmask 58368   ;;  %v7195_v62 = vmov 0   ;;  %s7198_s16 = smov [#allocation5]  }
  0x16   :  { %6622 = vset.pattern.permute.xlu0 %v7195_v62  ;;  %6621 = vset.pattern.permute.xlu1 %v7195_v62  ;;  %vm7197_vm3 = vmmov 0   ;;  %vm429_vm4 = vcmask 517120   ;;  %vm1439_vm5 = vcmask 254976   ;;  %vm1481_vm6 = vcmask 261120   ;;  %s5582_s17 = sshll.u32 %s7198_s16, 4  ;;  %s5583_s17 = int_to_ptr.vmem [resolvable:$true] %s5582_s17 }
  0x17   :  { %v7312_v55 = vsub.s32 %v7309_v53, %v139_v54  ;;  %542 = vmatprep.mubr.bf16.mxu1 %v7195_v62  ;;  %v7321_v63 = vsub.s32 0, %v139_v54  ;;  %vm2307_vm7 = vcmask 41984   ;;  %vm2292_vm10 = vcmask 816128   ;;  %p7171_p9 = scmp.lt.s32.totalorder %s5583_s17, %s5583_s17 }
  0x18   :  { %vm2376_vm11 = vcmask 1041408   ;;  %vm2372_vm12 = vcmask 818176   ;;  %vm2448_vm13 = vcmask 392192   ;;  %vm2494_vm14 = vcmask 386048  }
  0x19   :  { %70 = vadd.xlane.f32.xlu0 %v69_v3 }
  0xa2   :  { %v68_v4 = vpop.xlane.xlu0 %67 }
  0xa3   :  { %v73_v5 = vmul.f32 0.015625, %v68_v4 }
  0xa5   :  { %v75_v6 = vsub.f32 %v61_v0, %v73_v5  ;;  %v7323_v0 = vsub.s32 1, %v139_v54 }
  0xa6   :  { %v71_v7 = vpop.xlane.xlu0 %70 }
  0xa7   :  { %v74_v8 = vmul.f32 0.015625, %v71_v7  ;;  %v77_v9 = vmul.f32 %v75_v6, %v75_v6 }
  0xa9   :  { %v76_v10 = vsub.f32 %v62_v1, %v74_v8  ;;  %v79_v11 = vsel %vm65_vm0, %v77_v9, 0.0 }
  0xaa   :  { %80 = vadd.xlane.f32.xlu1 %v79_v11 }
  0xab   :  { %v78_v12 = vmul.f32 %v76_v10, %v76_v10 }
  0xad   :  { %v82_v13 = vsel %vm65_vm0, %v78_v12, 0.0 }
  0xae   :  { %83 = vadd.xlane.f32.xlu1 %v82_v13 }
 0x137   :  { %v81_v14 = vpop.xlane.xlu1 %80 }
 0x138   :  { %v85_v15 = vmul.f32 0.015625, %v81_v14 }
 0x13a   :  { %v87_v16 = vadd.f32 1e-05, %v85_v15 }
 0x13b   :  { %v84_v17 = vpop.xlane.xlu1 %83 }
 0x13c   :  { %7011 = vrsqrt.f32 %v87_v16  ;;  %v86_v18 = vmul.f32 0.015625, %v84_v17 }
 0x13e   :  { %v88_v19 = vadd.f32 1e-05, %v86_v18 }
 0x140   :  { %7013 = vrsqrt.f32 %v88_v19 }
 0x146   :  { %v7012_v20 = vpop.eup %7011 }
 0x147   :  { %v91_v22 = vmul.f32 %v7012_v20, %v75_v6 }
 0x149   :  { %v97_v24 = vmul.f32 %v5595_v21, %v91_v22 }
 0x14a   :  { %v7014_v25 = vpop.eup %7013 }
 0x14b   :  { %v103_v26 = vadd.f32 %v5596_v23, %v97_v24  ;;  %v92_v27 = vmul.f32 %v7014_v25, %v76_v10 }
 0x14d   :  { %v7297_v28 = vclamps-f32 %v103_v26, 1.0  ;;  %v98_v29 = vmul.f32 %v5595_v21, %v92_v27 }
 0x14f   :  { %v109_v30 = vsel %vm65_vm0, %v7297_v28, 0.0  ;;  %v104_v31 = vadd.f32 %v5596_v23, %v98_v29 }
 0x150   :  { %v110_v32 = vrot.slane %v109_v30, 4 }
 0x151   :  { %v7301_v33 = vclamps-f32 %v104_v31, 1.0 }
 0x152   :  { %v111_v34 = vadd.f32 %v110_v32, %v109_v30 }
 0x153   :  { %v116_v35 = vsel %vm65_vm0, %v7301_v33, 0.0 }
 0x154   :  { %v112_v36 = vrot.slane %v111_v34, 2  ;;  %v117_v37 = vrot.slane %v116_v35, 4 }
 0x156   :  { %v113_v38 = vadd.f32 %v112_v36, %v111_v34  ;;  %v118_v39 = vadd.f32 %v117_v37, %v116_v35 }
 0x158   :  { %v114_v40 = vrot.slane %v113_v38, 1  ;;  %v119_v41 = vrot.slane %v118_v39, 2 }
 0x15a   :  { %v115_v42 = vadd.f32 %v114_v40, %v113_v38  ;;  %v120_v43 = vadd.f32 %v119_v41, %v118_v39 }
 0x15c   :  { %v124_v44 = vmul.f32 0.125, %v115_v42  ;;  %v121_v45 = vrot.slane %v120_v43, 1 }
 0x15e   :  { %v126_v46 = vmul.f32 %v7297_v28, %v124_v44  ;;  %v122_v47 = vadd.f32 %v121_v45, %v120_v43 }
 0x160   :  { %v128_v48 = vsel %vm65_vm0, %v126_v46, 0.0  ;;  %v125_v49 = vmul.f32 0.125, %v122_v47 }
 0x161   :  { %129 = vadd.xlane.f32.xlu0 %v128_v48 }
 0x162   :  { %v127_v50 = vmul.f32 %v7301_v33, %v125_v49 }
 0x164   :  { %v131_v51 = vsel %vm65_vm0, %v127_v50, 0.0 }
 0x165   :  { %132 = vadd.xlane.f32.xlu1 %v131_v51 }
 0x1ee   :  { %v130_v56 = vpop.xlane.xlu0 %129 }
 0x1ef   :  { %v141_v58 = vrot.slane %v130_v56, %v7312_v55 }
 0x1f2   :  { %v133_v57 = vpop.xlane.xlu1 %132 }
 0x1f3   :  { %v145_v59 = vrot.slane %v133_v57, %v7312_v55 }
 0x1f5   :  { %v147_v60 = vsel %vm146_vm1, %v145_v59, %v141_v58 }
 0x1f6   :  { %v150_v61 = vsel %vm149_vm2, %v147_v60, -inf }
 0x1f7   :  { %151 = vmax.xlane.f32.xlu0 %v150_v61 }
 0x284   :  { %v152_v1 = vpop.xlane.xlu0 %151 }
 0x285   :  { %v157_v2 = vrot.slane %v152_v1, %v7321_v63  ;;  %v161_v3 = vrot.slane %v152_v1, %v7323_v0 }
 0x287   :  { %v164_v4 = vsub.f32 %v130_v56, %v157_v2  ;;  %v165_v5 = vsub.f32 %v133_v57, %v161_v3 }
 0x289   :  { %v166_v6 = vmul.f32 1.442695, %v164_v4  ;;  %v168_v7 = vmul.f32 1.442695, %v165_v5 }
 0x28b   :  { %7015 = vpow2.f32 %v166_v6 }
 0x28c   :  { %7017 = vpow2.f32 %v168_v7 }
 0x295   :  { %v7016_v8 = vpop.eup %7015 }
 0x296   :  { %v7018_v9 = vpop.eup %7017  ;;  %173 = vperm.xlu1 %6621, %v7016_v8  }
 0x297   :  { %176 = vperm.xlu0 %6622, %v7018_v9  }
 0x315   :  { %v174_v10 = vpop.permute.xlu1 %173 }
 0x316   :  { %v177_v11 = vpop.permute.xlu0 %176  ;;  %v181_v12 = vrot.slane %v174_v10, %v7312_v55  ;;  %v6625_v10 = vld [vmem:[#allocation2 + $0x20] ss:$8 sps:$4 sm:$0xff]  }
 0x317   :  { %v185_v13 = vrot.slane %v177_v11, %v7312_v55  ;;  %v6626_v11 = vld [vmem:[#allocation2 + $0x30] ss:$8 sps:$4 sm:$0xff]  }
 0x319   :  { %v186_v14 = vsel %vm146_vm1, %v185_v13, %v181_v12 }
 0x31a   :  { %v188_v15 = vsel %vm149_vm2, %v186_v14, 0.0 }
 0x31b   :  { %189 = vadd.xlane.f32.xlu1 %v188_v15 }
 0x3a8   :  { %v190_v16 = vpop.xlane.xlu1 %189 }
 0x3a9   :  { %7019 = vrcp.f32 %v190_v16 }
 0x3b3   :  { %v7020_v17 = vpop.eup %7019 }
 0x3b4   :  { %v196_v18 = vrot.slane %v7020_v17, %v7321_v63  ;;  %v200_v20 = vrot.slane %v7020_v17, %v7323_v0 }
 0x3b6   :  { %v203_v19 = vmul.f32 %v7016_v8, %v196_v18  ;;  %v204_v21 = vmul.f32 %v7018_v9, %v200_v20  ;;  %v6623_v8 = vld [vmem:[#allocation2] ss:$8 sps:$4 sm:$0xff]   ;;  %v7196_v9 = vmov 0.0  }
 0x3b7   :  { %6454 = vmatprep.subr.bf16.mxu0 %v7196_v9  ;;  %60 = vst [vmem:[#allocation5] sm:$0xff] %v7196_v9  ;;  %6462 = vmatprep.mubr.msk.bf16.mxu0 %vm7197_vm3, %v7196_v9 }
 0x3b8   :  { %210 = vperm.xlu0 %6622, %v203_v19   ;;  %v206_v31 = vmul.f32 0.1, %v204_v21  ;;  %v205_v32 = vmul.f32 0.1, %v203_v19  ;;  %6455 = vmatpush3.bf16.msra.mxu0 %v6623_v8 }
 0x3b9   :  { %6456 = vmatprep.subr.bf16.mxu0 %v7196_v9 }
 0x3bc   :  { %213 = vperm.xlu0 %6622, %v204_v21  }
 0x437   :  { %v211_v22 = vpop.permute.xlu0 %210 }
 0x438   :  { %v218_v24 = vrot.slane %v211_v22, %v7312_v55 }
 0x43b   :  { %v214_v23 = vpop.permute.xlu0 %213 }
 0x43c   :  { %v222_v25 = vrot.slane %v214_v23, %v7312_v55 }
 0x43e   :  { %v223_v26 = vsel %vm146_vm1, %v222_v25, %v218_v24 }
 0x43f   :  { %v225_v27 = vsel %vm149_vm2, %v223_v26, 0.0 }
 0x440   :  { %226 = vadd.xlane.f32.xlu1 %v225_v27 }
 0x4cd   :  { %v227_v29 = vpop.xlane.xlu1 %226 }
 0x4ce   :  { %v228_v30 = vmul.f32 0.125, %v227_v29 }
 0x4d0   :  { %v233_v34 = vrot.slane %v228_v30, %v7321_v63  ;;  %v237_v35 = vrot.slane %v228_v30, %v7323_v0 }
 0x4d2   :  { %v240_v36 = vmul.f32 %v233_v34, %v205_v32  ;;  %v241_v37 = vmul.f32 %v237_v35, %v206_v31 }
 0x4d4   :  { %v243_v38 = vsub.f32 %v204_v21, %v241_v37  ;;  %v242_v39 = vsub.f32 %v203_v19, %v240_v36  ;;  %v353_v36 = vld [vmem:[%s8765_s3] ss:$0 sm:$0xff] }
 0x4d6   :  { %250 = vperm.xlu1 %6621, %v243_v38   ;;  %247 = vperm.xlu0 %6622, %v242_v39  }
 0x555   :  { %v251_v40 = vpop.permute.xlu1 %250  ;;  %v248_v41 = vpop.permute.xlu0 %247 }
 0x556   :  { %v259_v42 = vrot.slane %v251_v40, %v7312_v55  ;;  %v255_v43 = vrot.slane %v248_v41, %v7312_v55 }
 0x558   :  { %v260_v44 = vsel %vm146_vm1, %v259_v42, %v255_v43 }
 0x559   :  { %v262_v45 = vsel %vm149_vm2, %v260_v44, -inf }
 0x55a   :  { %263 = vmax.xlane.f32.xlu0 %v262_v45 }
 0x5e7   :  { %v264_v46 = vpop.xlane.xlu0 %263 }
 0x5e8   :  { %v269_v47 = vrot.slane %v264_v46, %v7321_v63  ;;  %v273_v48 = vrot.slane %v264_v46, %v7323_v0 }
 0x5ea   :  { %v276_v49 = vsub.f32 %v242_v39, %v269_v47  ;;  %v277_v50 = vsub.f32 %v243_v38, %v273_v48  ;;  %v6627_v48 = vld [vmem:[#allocation2 + $0x44] ss:$8 sps:$4 sm:$0xff]  }
 0x5eb   :  { %510 = vmatprep.subr.bf16.mxu1 %v6627_v48 }
 0x5ec   :  { %v278_v51 = vmul.f32 1.442695, %v276_v49  ;;  %v280_v52 = vmul.f32 1.442695, %v277_v50  ;;  %v6629_v49 = vld [vmem:[#allocation2 + $0x40] ss:$8 sps:$4 sm:$0xff]  }
 0x5ed   :  { %511 = vmatpush1.bf16.msra.mxu1 %v6629_v49  ;;  %v6630_v50 = vld [vmem:[#allocation2 + $0x54] ss:$8 sps:$4 sm:$0xff]  }
 0x5ee   :  { %7021 = vpow2.f32 %v278_v51  ;;  %v6632_v51 = vld [vmem:[#allocation2 + $0x50] ss:$8 sps:$4 sm:$0xff]   ;;  %512 = vmatprep.subr.bf16.mxu1 %v6630_v50 }
 0x5ef   :  { %7023 = vpow2.f32 %v280_v52  ;;  %v6633_v52 = vld [vmem:[#allocation2 + $0x64] ss:$8 sps:$4 sm:$0xff]  }
 0x5f1   :  { %513 = vmatpush1.bf16.msra.mxu1 %v6632_v51 }
 0x5f2   :  { %514 = vmatprep.subr.bf16.mxu1 %v6633_v52 }
 0x5f8   :  { %v7022_v54 = vpop.eup %7021 }
 0x5f9   :  { %285 = vperm.xlu1 %6621, %v7022_v54   ;;  %v7024_v56 = vpop.eup %7023 }
 0x5fd   :  { %288 = vperm.xlu1 %6621, %v7024_v56  }
 0x678   :  { %v286_v57 = vpop.permute.xlu1 %285 }
 0x679   :  { %v293_v59 = vrot.slane %v286_v57, %v7312_v55  ;;  %v6638_v57 = vld [vmem:[#allocation2 + $0x70] ss:$8 sps:$4 sm:$0xff]  }
 0x67c   :  { %v289_v58 = vpop.permute.xlu1 %288 }
 0x67d   :  { %v297_v60 = vrot.slane %v289_v58, %v7312_v55  ;;  %v6624_v55 = vld [vmem:[#allocation2 + $0x10] ss:$8 sps:$4 sm:$0xff]   ;;  %v6639_v58 = vld [vmem:[#allocation2 + $0x100] ss:$8 sps:$4 sm:$0xff]  }
 0x67e   :  { %6457 = vmatpush3.bf16.msra.mxu0 %v6624_v55 }
 0x67f   :  { %v298_v61 = vsel %vm146_vm1, %v297_v60, %v293_v59  ;;  %6458 = vmatprep.subr.bf16.mxu0 %v7196_v9  ;;  %v6640_v59 = vld [vmem:[#allocation2 + $0x80] ss:$8 sps:$4 sm:$0xff]   ;;  %v6641_v60 = vld [vmem:[#allocation2 + $0x110] ss:$8 sps:$4 sm:$0xff]  }
 0x680   :  { %v300_v1 = vsel %vm149_vm2, %v298_v61, 0.0  ;;  %v6642_v61 = vld [vmem:[#allocation2 + $0x90] ss:$8 sps:$4 sm:$0xff]  }
 0x681   :  { %301 = vadd.xlane.f32.xlu1 %v300_v1 }
 0x682   :  { %6459 = vmatpush3.bf16.msra.mxu0 %v6625_v10 }
 0x683   :  { %6460 = vmatprep.subr.bf16.mxu0 %v7196_v9 }
 0x686   :  { %6461 = vmatpush3.bf16.msra.mxu0 %v6626_v11  ;;  %v6643_v11 = vld [vmem:[#allocation2 + $0x120] ss:$8 sps:$4 sm:$0xff]  }
 0x687   :  { %6195 = vmatprep.subr.bf16.mxu0 %v6639_v58 }
 0x70e   :  { %v302_v2 = vpop.xlane.xlu1 %301 }
 0x70f   :  { %7025 = vrcp.f32 %v302_v2 }
 0x719   :  { %v7026_v3 = vpop.eup %7025 }
 0x71a   :  { %v308_v4 = vrot.slane %v7026_v3, %v7321_v63  ;;  %v312_v6 = vrot.slane %v7026_v3, %v7323_v0 }
 0x71c   :  { %v315_v5 = vmul.f32 %v7022_v54, %v308_v4  ;;  %v316_v7 = vmul.f32 %v7024_v56, %v312_v6  ;;  %v6635_v54 = vld [vmem:[#allocation2 + $0x60] ss:$8 sps:$4 sm:$0xff]   ;;  %v6636_v56 = vld [vmem:[#allocation2 + $0x74] ss:$8 sps:$4 sm:$0xff]  }
 0x71d   :  { %515 = vmatpush1.bf16.msra.mxu1 %v6635_v54 }
 0x71e   :  { %319 = vperm.xlu0 %6622, %v315_v5   ;;  %516 = vmatprep.subr.bf16.mxu1 %v6636_v56  ;;  %v427_v5 = vld [vmem:[%s8765_s3 + $0x1] ss:$0 sm:$0xff] }
 0x721   :  { %517 = vmatpush1.bf16.msra.mxu1 %v6638_v57 }
 0x722   :  { %324 = vperm.xlu0 %6622, %v316_v7   ;;  %v428_v7 = vld [vmem:[%s8765_s3 + $0x2] ss:$0 sm:$0xff] }
 0x79d   :  { %v320_v12 = vpop.permute.xlu0 %319 }
 0x79e   :  { %v327_v13 = vmul.f32 %v7297_v28, %v320_v12  ;;  %v6644_v12 = vld [vmem:[#allocation2 + $0xa0] ss:$8 sps:$4 sm:$0xff]  }
 0x7a0   :  { %v329_v14 = vsel %vm65_vm0, %v327_v13, 0.0  ;;  %v6645_v13 = vld [vmem:[#allocation2 + $0x130] ss:$8 sps:$4 sm:$0xff]  }
 0x7a1   :  { %v330_v15 = vrot.slane %v329_v14, 4  ;;  %v325_v16 = vpop.permute.xlu0 %324 }
 0x7a2   :  { %v328_v17 = vmul.f32 %v7301_v33, %v325_v16  ;;  %v6648_v16 = vld [vmem:[#allocation2 + $0xc0] ss:$8 sps:$4 sm:$0xff]  }
 0x7a3   :  { %v331_v18 = vadd.f32 %v330_v15, %v329_v14  ;;  %v6646_v14 = vld [vmem:[#allocation2 + $0xb0] ss:$8 sps:$4 sm:$0xff]   ;;  %v6647_v15 = vld [vmem:[#allocation2 + $0x140] ss:$8 sps:$4 sm:$0xff]  }
 0x7a4   :  { %v336_v19 = vsel %vm65_vm0, %v328_v17, 0.0  ;;  %v6649_v17 = vld [vmem:[#allocation2 + $0x150] ss:$8 sps:$4 sm:$0xff]  }
 0x7a5   :  { %v332_v20 = vrot.slane %v331_v18, 2  ;;  %v337_v21 = vrot.slane %v336_v19, 4 }
 0x7a7   :  { %v333_v22 = vadd.f32 %v332_v20, %v331_v18  ;;  %v338_v23 = vadd.f32 %v337_v21, %v336_v19  ;;  %v6650_v18 = vld [vmem:[#allocation2 + $0xd0] ss:$8 sps:$4 sm:$0xff]   ;;  %v6651_v19 = vld [vmem:[#allocation2 + $0x160] ss:$8 sps:$4 sm:$0xff]  }
 0x7a8   :  { %v6652_v20 = vld [vmem:[#allocation2 + $0xe0] ss:$8 sps:$4 sm:$0xff]   ;;  %v6653_v21 = vld [vmem:[#allocation2 + $0x170] ss:$8 sps:$4 sm:$0xff]  }
 0x7a9   :  { %v334_v24 = vrot.slane %v333_v22, 1  ;;  %v339_v25 = vrot.slane %v338_v23, 2 }
 0x7ab   :  { %v335_v26 = vadd.f32 %v334_v24, %v333_v22  ;;  %v340_v27 = vadd.f32 %v339_v25, %v338_v23  ;;  %v6654_v22 = vld [vmem:[#allocation2 + $0xf0] ss:$8 sps:$4 sm:$0xff]   ;;  %v5604_v23 = vld [vmem:[%s8765_s3 + $0x3] ss:$8 sm:$0x3] }
 0x7ac   :  { %v460_v24 = vrot.slane %v5604_v23, %v7321_v63  ;;  %v464_v25 = vrot.slane %v5604_v23, %v7323_v0  ;;  %v6673_v23 = vld [vmem:[#allocation2 + $0x270] ss:$8 sps:$4 sm:$0xff]  }
 0x7ad   :  { %v341_v29 = vrot.slane %v340_v27, 1  ;;  %v351_v30 = vpack.c.bf16 %v335_v26, %v335_v26 }
 0x7af   :  { %v342_v28 = vadd.f32 %v341_v29, %v340_v27  ;;  %v356_v32 = vunpack.c.l.b16 %v351_v30 }
 0x7b1   :  { %v352_v31 = vpack.c.bf16 %v342_v28, %v342_v28 }
 0x7b3   :  { %v357_v34 = vunpack.c.l.b16 %v352_v31 }
 0x7b5   :  { %v358_v35 = vsel %vm146_vm1, %v357_v34, %v356_v32 }
 0x7b6   :  { %v359_v33 = vpack.c.b16 %v358_v35, %v358_v35 }
 0x7b8   :  { %6463 = vmatmul.mubr.msk.bf16.vlgmr.msra.gmra.mrb[0].mxu0 %vm65_vm0, %v359_v33 }
 0x7b9   :  { %6196 = vmatpush3.bf16.msra.mxu0 %v6640_v59 }
 0x7ba   :  { %6197 = vmatprep.subr.bf16.mxu0 %v6641_v60  ;;  %v6657_v60 = vld [vmem:[#allocation2 + $0x184] ss:$8 sps:$4 sm:$0xff]  }
 0x7bb   :  { %815 = vmatprep.subr.bf16.mxu1 %v6657_v60 }
 0x7bd   :  { %6198 = vmatpush3.bf16.msra.mxu0 %v6642_v61  ;;  %v6655_v61 = vld [vmem:[#allocation2 + $0x180] ss:$8 sps:$4 sm:$0xff]  }
 0x7be   :  { %6199 = vmatprep.subr.bf16.mxu0 %v6643_v11 }
 0x7c1   :  { %6200 = vmatpush3.bf16.msra.mxu0 %v6644_v12  ;;  %v733_v12 = vld [vmem:[%s8765_s3 + $0x5] ss:$0 sm:$0xff] }
 0x7c2   :  { %6201 = vmatprep.subr.bf16.mxu0 %v6645_v13 }
 0x7c5   :  { %6202 = vmatpush3.bf16.msra.mxu0 %v6646_v14  ;;  %v734_v14 = vld [vmem:[%s8765_s3 + $0x6] ss:$0 sm:$0xff] }
 0x7c6   :  { %6203 = vmatprep.subr.bf16.mxu0 %v6647_v15 }
 0x7c9   :  { %6204 = vmatpush3.bf16.msra.mxu0 %v6648_v16 }
 0x7ca   :  { %6205 = vmatprep.subr.bf16.mxu0 %v6649_v17  ;;  %v6668_v17 = vld [vmem:[#allocation2 + $0x1c0] ss:$8 sps:$4 sm:$0xff]  }
 0x7cd   :  { %6206 = vmatpush3.bf16.msra.mxu0 %v6650_v18 }
 0x7ce   :  { %6207 = vmatprep.subr.bf16.mxu0 %v6651_v19  ;;  %v6669_v19 = vld [vmem:[#allocation2 + $0x250] ss:$8 sps:$4 sm:$0xff]  }
 0x7d1   :  { %6208 = vmatpush3.bf16.msra.mxu0 %v6652_v20  ;;  %v6670_v20 = vld [vmem:[#allocation2 + $0x1d0] ss:$8 sps:$4 sm:$0xff]  }
 0x7d2   :  { %6209 = vmatprep.subr.bf16.mxu0 %v6653_v21  ;;  %v6671_v21 = vld [vmem:[#allocation2 + $0x260] ss:$8 sps:$4 sm:$0xff]  }
 0x7d5   :  { %6210 = vmatpush3.bf16.msra.mxu0 %v6654_v22  ;;  %v6672_v22 = vld [vmem:[#allocation2 + $0x1e0] ss:$8 sps:$4 sm:$0xff]  }
 0x88b   :  { %v421_v37 = vpop.f32.mrb[0].mxu0 }
 0x88c   :  { %v422_v38 = vadd.f32 %v421_v37, %v353_v36  ;;  %v6464_v39 = vpop.f32.mrb[1].mxu0 }
 0x88d   :  { %v424_v40 = vpop.f32.mrb[2].mxu0 }
 0x88e   :  { %v6465_v41 = vpop.f32.mrb[3].mxu0  ;;  %v430_v42 = vsel %vm429_vm4, %v422_v38, 0.0 }
 0x88f   :  { %431 = vadd.xlane.f32.xlu0 %v430_v42 }
 0x91c   :  { %v432_v43 = vpop.xlane.xlu0 %431 }
 0x91d   :  { %v433_v44 = vmul.f32 0.015625, %v432_v43 }
 0x91f   :  { %v434_v45 = vsub.f32 %v422_v38, %v433_v44 }
 0x921   :  { %v435_v46 = vmul.f32 %v434_v45, %v434_v45 }
 0x923   :  { %v436_v47 = vsel %vm429_vm4, %v435_v46, 0.0 }
 0x924   :  { %437 = vadd.xlane.f32.xlu1 %v436_v47 }
 0x9b1   :  { %v438_v1 = vpop.xlane.xlu1 %437 }
 0x9b2   :  { %v439_v2 = vmul.f32 0.015625, %v438_v1  ;;  %v6660_v1 = vld [vmem:[#allocation2 + $0x194] ss:$8 sps:$4 sm:$0xff]  }
 0x9b4   :  { %v440_v3 = vadd.f32 1e-05, %v439_v2  ;;  %v6658_v2 = vld [vmem:[#allocation2 + $0x190] ss:$8 sps:$4 sm:$0xff]  }
 0x9b6   :  { %7027 = vrsqrt.f32 %v440_v3  ;;  %v6663_v3 = vld [vmem:[#allocation2 + $0x1a4] ss:$8 sps:$4 sm:$0xff]  }
 0x9c0   :  { %v7028_v4 = vpop.eup %7027 }
 0x9c1   :  { %v442_v6 = vmul.f32 %v7028_v4, %v434_v45  ;;  %v595_v45 = vld [vmem:[%s8765_s3 + $0x4] ss:$0 sm:$0xff]  ;;  %v6661_v4 = vld [vmem:[#allocation2 + $0x1a0] ss:$8 sps:$4 sm:$0xff]  }
 0x9c3   :  { %v443_v8 = vmul.f32 %v442_v6, %v427_v5  ;;  %v6664_v5 = vld [vmem:[#allocation2 + $0x1b0] ss:$8 sps:$4 sm:$0xff]   ;;  %v6666_v6 = vld [vmem:[#allocation2 + $0x1b4] ss:$8 sps:$4 sm:$0xff]  }
 0x9c5   :  { %v444_v55 = vadd.f32 %v443_v8, %v428_v7  ;;  %v6667_v7 = vld [vmem:[#allocation2 + $0x240] ss:$8 sps:$4 sm:$0xff]  }
 0x9c7   :  { %v453_v10 = vpack.c.bf16 %v444_v55, %v444_v55 }
 0x9c9   :  { %5613 = vmatmul.mubr.msk.bf16.vlgmr.msra.gmra.mrb[0].mxu1 %vm65_vm0, %v453_v10 }
 0x9ca   :  { %847 = vmatprep.mubr.bf16.mxu1 %v7195_v62  ;;  %816 = vmatpush1.bf16.msra.mxu1 %v6655_v61 }
 0x9cb   :  { %817 = vmatprep.subr.bf16.mxu1 %v6660_v1 }
 0x9ce   :  { %818 = vmatpush1.bf16.msra.mxu1 %v6658_v2 }
 0x9cf   :  { %819 = vmatprep.subr.bf16.mxu1 %v6663_v3 }
 0x9d2   :  { %820 = vmatpush1.bf16.msra.mxu1 %v6661_v4 }
 0x9d3   :  { %821 = vmatprep.subr.bf16.mxu1 %v6666_v6 }
 0x9d6   :  { %822 = vmatpush1.bf16.msra.mxu1 %v6664_v5 }
 0x9d7   :  { %6217 = vmatprep.subr.bf16.mxu1 %v6667_v7 }
 0xa9c   :  { %v544_v26 = vpop.f32.mrb[0].mxu1 }
 0xa9d   :  { %v545_v27 = vadd.f32 %v544_v26, %v460_v24  ;;  %v546_v29 = vpop.f32.mrb[1].mxu1  ;;  %v6674_v24 = vld [vmem:[#allocation2 + $0x1f0] ss:$8 sps:$4 sm:$0xff]   ;;  %v6676_v26 = vld [vmem:[#allocation2 + $0x200] ss:$8 sps:$4 sm:$0xff]  }
 0xa9e   :  { %v547_v30 = vadd.f32 %v546_v29, %v464_v25  ;;  %v548_v28 = vpop.f32.mrb[2].mxu1  ;;  %v6675_v25 = vld [vmem:[#allocation2 + $0x280] ss:$8 sps:$4 sm:$0xff]   ;;  %v6678_v29 = vld [vmem:[#allocation2 + $0x210] ss:$8 sps:$4 sm:$0xff]  }
 0xa9f   :  { %v553_v31 = vmul.f32 0.70710677, %v545_v27  ;;  %v549_v32 = vpop.f32.mrb[3].mxu1  ;;  %v551_v36 = vmul.f32 0.5, %v545_v27  ;;  %v6677_v27 = vld [vmem:[#allocation2 + $0x290] ss:$8 sps:$4 sm:$0xff]  }
 0xaa0   :  { %v554_v34 = vmul.f32 0.70710677, %v547_v30  ;;  %v552_v38 = vmul.f32 0.5, %v547_v30  ;;  %v6679_v30 = vld [vmem:[#allocation2 + $0x2a0] ss:$8 sps:$4 sm:$0xff]  }
 0xaa1   :  { %7029 = verf.f32 %v553_v31  ;;  %v6680_v28 = vld [vmem:[#allocation2 + $0x220] ss:$8 sps:$4 sm:$0xff]   ;;  %v6681_v31 = vld [vmem:[#allocation2 + $0x2b0] ss:$8 sps:$4 sm:$0xff]  }
 0xaa2   :  { %7031 = verf.f32 %v554_v34  ;;  %v6682_v32 = vld [vmem:[#allocation2 + $0x230] ss:$8 sps:$4 sm:$0xff]   ;;  %v5630_v34 = vld [vmem:[%s8765_s3 + $0x7] ss:$8 sm:$0x3] }
 0xaab   :  { %v7030_v35 = vpop.eup %7029 }
 0xaac   :  { %v7032_v33 = vpop.eup %7031  ;;  %v557_v37 = vadd.f32 1.0, %v7030_v35  ;;  %v765_v35 = vrot.slane %v5630_v34, %v7321_v63 }
 0xaad   :  { %v558_v39 = vadd.f32 1.0, %v7032_v33  ;;  %v769_v33 = vrot.slane %v5630_v34, %v7323_v0  ;;  %v6701_v34 = vld [vmem:[#allocation2 + $0x3b0] ss:$8 sps:$4 sm:$0xff]  }
 0xaae   :  { %v559_v40 = vmul.f32 %v557_v37, %v551_v36 }
 0xaaf   :  { %v560_v41 = vmul.f32 %v558_v39, %v552_v38 }
 0xab0   :  { %v593_v43 = vpack.c.bf16 %v559_v40, %v559_v40 }
 0xab1   :  { %v594_v42 = vpack.c.bf16 %v560_v41, %v560_v41 }
 0xab3   :  { %724 = vmatprep.mubr.bf16.mxu0 %v594_v42 }
 0xab4   :  { %725 = vmatmul.mubr.bf16.vlgmr.msra.gmra.mrb[4].mxu0 %v593_v43 }
 0xab5   :  { %1152 = vmatprep.mubr.bf16.mxu0 %v7195_v62 }
 0xb87   :  { %v6211_v44 = vpop.f32.mrb[4].mxu0 }
 0xb88   :  { %v6212_v46 = vpop.f32.mrb[5].mxu0 }
 0xb89   :  { %v6213_v47 = vadd.f32 %v6212_v46, %v6211_v44  ;;  %v6214_v48 = vpop.f32.mrb[6].mxu0 }
 0xb8a   :  { %v6215_v49 = vpop.f32.mrb[7].mxu0 }
 0xb8b   :  { %v727_v50 = vadd.f32 %v6213_v47, %v595_v45 }
 0xb8d   :  { %v732_v51 = vadd.f32 %v727_v50, %v444_v55 }
 0xb8f   :  { %v735_v52 = vsel %vm429_vm4, %v732_v51, 0.0 }
 0xb90   :  { %736 = vadd.xlane.f32.xlu1 %v735_v52 }
 0xc1d   :  { %v737_v54 = vpop.xlane.xlu1 %736 }
 0xc1e   :  { %v738_v56 = vmul.f32 0.015625, %v737_v54 }
 0xc20   :  { %v739_v57 = vsub.f32 %v732_v51, %v738_v56 }
 0xc22   :  { %v740_v58 = vmul.f32 %v739_v57, %v739_v57 }
 0xc24   :  { %v741_v59 = vsel %vm429_vm4, %v740_v58, 0.0 }
 0xc25   :  { %742 = vadd.xlane.f32.xlu1 %v741_v59 }
 0xcb2   :  { %v743_v8 = vpop.xlane.xlu1 %742 }
 0xcb3   :  { %v744_v55 = vmul.f32 0.015625, %v743_v8 }
 0xcb5   :  { %v745_v10 = vadd.f32 1e-05, %v744_v55  ;;  %v6685_v55 = vld [vmem:[#allocation2 + $0x2c4] ss:$8 sps:$4 sm:$0xff]  }
 0xcb6   :  { %1120 = vmatprep.subr.bf16.mxu0 %v6685_v55 }
 0xcb7   :  { %7033 = vrsqrt.f32 %v745_v10  ;;  %v6683_v10 = vld [vmem:[#allocation2 + $0x2c0] ss:$8 sps:$4 sm:$0xff]  }
 0xcb8   :  { %1121 = vmatpush1.bf16.msra.mxu0 %v6683_v10 }
 0xcc1   :  { %v7034_v11 = vpop.eup %7033 }
 0xcc2   :  { %v747_v13 = vmul.f32 %v7034_v11, %v739_v57  ;;  %v900_v57 = vld [vmem:[%s8765_s3 + $0x10] ss:$0 sm:$0xff]  ;;  %v6688_v11 = vld [vmem:[#allocation2 + $0x2d4] ss:$8 sps:$4 sm:$0xff]  }
 0xcc3   :  { %1122 = vmatprep.subr.bf16.mxu0 %v6688_v11 }
 0xcc4   :  { %v748_v15 = vmul.f32 %v747_v13, %v733_v12  ;;  %v6686_v12 = vld [vmem:[#allocation2 + $0x2d0] ss:$8 sps:$4 sm:$0xff]   ;;  %v6691_v13 = vld [vmem:[#allocation2 + $0x2e4] ss:$8 sps:$4 sm:$0xff]  }
 0xcc5   :  { %1123 = vmatpush1.bf16.msra.mxu0 %v6686_v12 }
 0xcc6   :  { %v7394_v16 = vadd.f32 %v748_v15, %v734_v14  ;;  %v6689_v14 = vld [vmem:[#allocation2 + $0x2e0] ss:$8 sps:$4 sm:$0xff]   ;;  %1124 = vmatprep.subr.bf16.mxu0 %v6691_v13  ;;  %v6692_v15 = vld [vmem:[#allocation2 + $0x2f0] ss:$8 sps:$4 sm:$0xff]  }
 0xcc8   :  { %v758_v18 = vpack.c.bf16 %v7394_v16, %v7394_v16 }
 0xcc9   :  { %1125 = vmatpush1.bf16.msra.mxu0 %v6689_v14 }
 0xcca   :  { %5639 = vmatmul.mubr.msk.bf16.vlgmr.msra.gmra.mrb[4].mxu1 %vm65_vm0, %v758_v18 }
 0xccb   :  { %6218 = vmatpush3.bf16.msra.mxu1 %v6668_v17  ;;  %v6695_v17 = vld [vmem:[#allocation2 + $0x380] ss:$8 sps:$4 sm:$0xff]  }
 0xccc   :  { %6219 = vmatprep.subr.bf16.mxu1 %v6669_v19 }
 0xccf   :  { %6220 = vmatpush3.bf16.msra.mxu1 %v6670_v20 }
 0xcd0   :  { %6221 = vmatprep.subr.bf16.mxu1 %v6671_v21 }
 0xcd3   :  { %6222 = vmatpush3.bf16.msra.mxu1 %v6672_v22  ;;  %v1038_v22 = vld [vmem:[%s8765_s3 + $0x11] ss:$0 sm:$0xff] }
 0xcd4   :  { %6223 = vmatprep.subr.bf16.mxu1 %v6673_v23 }
 0xcd7   :  { %6224 = vmatpush3.bf16.msra.mxu1 %v6674_v24  ;;  %v1039_v24 = vld [vmem:[%s8765_s3 + $0x12] ss:$0 sm:$0xff] }
 0xcd8   :  { %6225 = vmatprep.subr.bf16.mxu1 %v6675_v25 }
 0xcdb   :  { %6226 = vmatpush3.bf16.msra.mxu1 %v6676_v26 }
 0xcdc   :  { %6227 = vmatprep.subr.bf16.mxu1 %v6677_v27  ;;  %v6696_v27 = vld [vmem:[#allocation2 + $0x300] ss:$8 sps:$4 sm:$0xff]  }
 0xcdf   :  { %6228 = vmatpush3.bf16.msra.mxu1 %v6678_v29 }
 0xce0   :  { %6229 = vmatprep.subr.bf16.mxu1 %v6679_v30  ;;  %v6697_v30 = vld [vmem:[#allocation2 + $0x390] ss:$8 sps:$4 sm:$0xff]  }
 0xce3   :  { %6230 = vmatpush3.bf16.msra.mxu1 %v6680_v28  ;;  %v6698_v28 = vld [vmem:[#allocation2 + $0x310] ss:$8 sps:$4 sm:$0xff]  }
 0xce4   :  { %6231 = vmatprep.subr.bf16.mxu1 %v6681_v31  ;;  %v6699_v31 = vld [vmem:[#allocation2 + $0x3a0] ss:$8 sps:$4 sm:$0xff]  }
 0xce7   :  { %6232 = vmatpush3.bf16.msra.mxu1 %v6682_v32  ;;  %v6700_v32 = vld [vmem:[#allocation2 + $0x320] ss:$8 sps:$4 sm:$0xff]  }
 0xce8   :  { %6466 = vmatprep.subr.bf16.mxu1 %v7196_v9 }
 0xd9d   :  { %v849_v36 = vpop.f32.mrb[4].mxu1 }
 0xd9e   :  { %v850_v37 = vadd.f32 %v849_v36, %v765_v35  ;;  %v851_v38 = vpop.f32.mrb[5].mxu1  ;;  %v6702_v35 = vld [vmem:[#allocation2 + $0x330] ss:$8 sps:$4 sm:$0xff]   ;;  %v6704_v36 = vld [vmem:[#allocation2 + $0x340] ss:$8 sps:$4 sm:$0xff]  }
 0xd9f   :  { %v852_v39 = vadd.f32 %v851_v38, %v769_v33  ;;  %v853_v40 = vpop.f32.mrb[6].mxu1  ;;  %v6703_v33 = vld [vmem:[#allocation2 + $0x3c0] ss:$8 sps:$4 sm:$0xff]   ;;  %v6706_v38 = vld [vmem:[#allocation2 + $0x350] ss:$8 sps:$4 sm:$0xff]  }
 0xda0   :  { %v858_v41 = vmul.f32 0.70710677, %v850_v37  ;;  %v854_v42 = vpop.f32.mrb[7].mxu1  ;;  %v856_v46 = vmul.f32 0.5, %v850_v37  ;;  %v6705_v37 = vld [vmem:[#allocation2 + $0x3d0] ss:$8 sps:$4 sm:$0xff]  }
 0xda1   :  { %v859_v43 = vmul.f32 0.70710677, %v852_v39  ;;  %v857_v48 = vmul.f32 0.5, %v852_v39  ;;  %v6707_v39 = vld [vmem:[#allocation2 + $0x3e0] ss:$8 sps:$4 sm:$0xff]  }
 0xda2   :  { %7035 = verf.f32 %v858_v41  ;;  %v6708_v40 = vld [vmem:[#allocation2 + $0x360] ss:$8 sps:$4 sm:$0xff]   ;;  %v6709_v41 = vld [vmem:[#allocation2 + $0x3f0] ss:$8 sps:$4 sm:$0xff]  }
 0xda3   :  { %7037 = verf.f32 %v859_v43  ;;  %v6710_v42 = vld [vmem:[#allocation2 + $0x370] ss:$8 sps:$4 sm:$0xff]  }
 0xda4   :  { %v5656_v43 = vld [vmem:[%s8765_s3 + $0x13] ss:$8 sm:$0x3] }
 0xdac   :  { %v7036_v44 = vpop.eup %7035 }
 0xdad   :  { %v7038_v45 = vpop.eup %7037  ;;  %v862_v47 = vadd.f32 1.0, %v7036_v44  ;;  %v1070_v44 = vrot.slane %v5656_v43, %v7321_v63 }
 0xdae   :  { %v863_v49 = vadd.f32 1.0, %v7038_v45  ;;  %v1074_v45 = vrot.slane %v5656_v43, %v7323_v0 }
 0xdaf   :  { %v864_v50 = vmul.f32 %v862_v47, %v856_v46 }
 0xdb0   :  { %v865_v51 = vmul.f32 %v863_v49, %v857_v48 }
 0xdb1   :  { %v898_v54 = vpack.c.bf16 %v864_v50, %v864_v50 }
 0xdb2   :  { %v899_v52 = vpack.c.bf16 %v865_v51, %v865_v51 }
 0xdb4   :  { %1029 = vmatprep.mubr.bf16.mxu1 %v899_v52 }
 0xdb5   :  { %1030 = vmatmul.mubr.bf16.vlgmr.msra.gmra.mrb[8].mxu1 %v898_v54 }
 0xdb6   :  { %6474 = vmatprep.mubr.msk.bf16.mxu1 %vm7197_vm3, %v7196_v9 }
 0xe88   :  { %v6233_v56 = vpop.f32.mrb[8].mxu1 }
 0xe89   :  { %v6234_v58 = vpop.f32.mrb[9].mxu1 }
 0xe8a   :  { %v6235_v59 = vadd.f32 %v6234_v58, %v6233_v56  ;;  %v6236_v60 = vpop.f32.mrb[10].mxu1 }
 0xe8b   :  { %v6237_v61 = vpop.f32.mrb[11].mxu1 }
 0xe8c   :  { %v1032_v1 = vadd.f32 %v6235_v59, %v900_v57 }
 0xe8e   :  { %v1037_v2 = vadd.f32 %v1032_v1, %v7394_v16  ;;  %v6694_v16 = vld [vmem:[#allocation2 + $0x2f4] ss:$8 sps:$4 sm:$0xff]  }
 0xe8f   :  { %1126 = vmatprep.subr.bf16.mxu0 %v6694_v16 }
 0xe90   :  { %v1040_v3 = vsel %vm429_vm4, %v1037_v2, 0.0  ;;  %1127 = vmatpush1.bf16.msra.mxu0 %v6692_v15 }
 0xe91   :  { %1041 = vadd.xlane.f32.xlu1 %v1040_v3  ;;  %6239 = vmatprep.subr.bf16.mxu0 %v6695_v17 }
 0xf1e   :  { %v1042_v4 = vpop.xlane.xlu1 %1041 }
 0xf1f   :  { %v1043_v5 = vmul.f32 0.015625, %v1042_v4 }
 0xf21   :  { %v1044_v6 = vsub.f32 %v1037_v2, %v1043_v5 }
 0xf23   :  { %v1045_v7 = vmul.f32 %v1044_v6, %v1044_v6 }
 0xf25   :  { %v1046_v8 = vsel %vm429_vm4, %v1045_v7, 0.0 }
 0xf26   :  { %1047 = vadd.xlane.f32.xlu1 %v1046_v8 }
 0xfb3   :  { %v1048_v18 = vpop.xlane.xlu1 %1047 }
 0xfb4   :  { %v1049_v19 = vmul.f32 0.015625, %v1048_v18 }
 0xfb6   :  { %v1050_v20 = vadd.f32 1e-05, %v1049_v19  ;;  %v6711_v19 = vld [vmem:[#allocation2 + $0x400] ss:$8 sps:$4 sm:$0xff]  }
 0xfb7   :  { %6467 = vmatpush3.bf16.msra.mxu1 %v6711_v19  ;;  %v6720_v19 = vld [vmem:[%s8766_s4 + $0x30] ss:$8 sps:$4 sm:$0xff]  }
 0xfb8   :  { %7039 = vrsqrt.f32 %v1050_v20  ;;  %6468 = vmatprep.subr.bf16.mxu1 %v7196_v9  ;;  %v6712_v20 = vld [vmem:[#allocation2 + $0x410] ss:$8 sps:$4 sm:$0xff]  }
 0xfbb   :  { %6469 = vmatpush3.bf16.msra.mxu1 %v6712_v20  ;;  %v6725_v20 = vld [vmem:[%s8766_s4 + $0x44] ss:$8 sps:$4 sm:$0xff]  }
 0xfbc   :  { %6470 = vmatprep.subr.bf16.mxu1 %v7196_v9 }
 0xfc2   :  { %v7040_v21 = vpop.eup %7039 }
 0xfc3   :  { %v1052_v23 = vmul.f32 %v7040_v21, %v1044_v6  ;;  %v1205_v6 = vld [vmem:[%s8765_s3 + $0x14] ss:$0 sm:$0xff]  ;;  %v6713_v21 = vld [vmem:[#allocation2 + $0x420] ss:$8 sps:$4 sm:$0xff]  }
 0xfc4   :  { %6471 = vmatpush3.bf16.msra.mxu1 %v6713_v21  ;;  %v6723_v21 = vld [vmem:[%s8766_s4 + $0x40] ss:$8 sps:$4 sm:$0xff]  }
 0xfc5   :  { %v1053_v25 = vmul.f32 %v1052_v23, %v1038_v22  ;;  %v6714_v22 = vld [vmem:[#allocation2 + $0x430] ss:$8 sps:$4 sm:$0xff]   ;;  %6472 = vmatprep.subr.bf16.mxu1 %v7196_v9 }
 0xfc7   :  { %v7419_v26 = vadd.f32 %v1053_v25, %v1039_v24 }
 0xfc8   :  { %6473 = vmatpush3.bf16.msra.mxu1 %v6714_v22  ;;  %v6726_v22 = vld [vmem:[%s8766_s4 + $0x50] ss:$8 sps:$4 sm:$0xff]  }
 0xfc9   :  { %v1063_v29 = vpack.c.bf16 %v7419_v26, %v7419_v26  ;;  %6478 = vmatprep.subr.bf16.mxu1 %v7196_v9 }
 0xfcb   :  { %5665 = vmatmul.mubr.msk.bf16.vlgmr.msra.gmra.mrb[8].mxu0 %vm65_vm0, %v1063_v29 }
 0xfcc   :  { %6240 = vmatpush3.bf16.msra.mxu0 %v6696_v27  ;;  %v1343_v27 = vld [vmem:[%s8765_s3 + $0x15] ss:$0 sm:$0xff] }
 0xfcd   :  { %6241 = vmatprep.subr.bf16.mxu0 %v6697_v30  ;;  %v1344_v30 = vld [vmem:[%s8765_s3 + $0x16] ss:$0 sm:$0xff] }
 0xfd0   :  { %6242 = vmatpush3.bf16.msra.mxu0 %v6698_v28 }
 0xfd1   :  { %6243 = vmatprep.subr.bf16.mxu0 %v6699_v31 }
 0xfd4   :  { %6244 = vmatpush3.bf16.msra.mxu0 %v6700_v32 }
 0xfd5   :  { %6245 = vmatprep.subr.bf16.mxu0 %v6701_v34  ;;  %v1369_v34 = vld [vmem:[%s8765_s3 + $0x17] ss:$0 sm:$0xff] }
 0xfd8   :  { %6246 = vmatpush3.bf16.msra.mxu0 %v6702_v35 }
 0xfd9   :  { %6247 = vmatprep.subr.bf16.mxu0 %v6703_v33 }
 0xfdc   :  { %6248 = vmatpush3.bf16.msra.mxu0 %v6704_v36 }
 0xfdd   :  { %6249 = vmatprep.subr.bf16.mxu0 %v6705_v37 }
 0xfe0   :  { %6250 = vmatpush3.bf16.msra.mxu0 %v6706_v38 }
 0xfe1   :  { %6251 = vmatprep.subr.bf16.mxu0 %v6707_v39 }
 0xfe4   :  { %6252 = vmatpush3.bf16.msra.mxu0 %v6708_v40 }
 0xfe5   :  { %6253 = vmatprep.subr.bf16.mxu0 %v6709_v41 }
 0xfe8   :  { %6254 = vmatpush3.bf16.msra.mxu0 %v6710_v42 }
0x109e   :  { %v1154_v46 = vpop.f32.mrb[8].mxu0 }
0x109f   :  { %v1155_v47 = vadd.f32 %v1154_v46, %v1070_v44  ;;  %v1156_v48 = vpop.f32.mrb[9].mxu0 }
0x10a0   :  { %v1157_v49 = vadd.f32 %v1156_v48, %v1074_v45  ;;  %v1158_v50 = vpop.f32.mrb[10].mxu0 }
0x10a1   :  { %v1163_v51 = vmul.f32 0.70710677, %v1155_v47  ;;  %v1159_v52 = vpop.f32.mrb[11].mxu0  ;;  %v1161_v58 = vmul.f32 0.5, %v1155_v47 }
0x10a2   :  { %v1164_v54 = vmul.f32 0.70710677, %v1157_v49  ;;  %v1162_v60 = vmul.f32 0.5, %v1157_v49  ;;  %v1437_v49 = vld [vmem:[%s8765_s3 + $0x20] ss:$0 sm:$0xff] }
0x10a3   :  { %7041 = verf.f32 %v1163_v51  ;;  %v1438_v51 = vld [vmem:[%s8765_s3 + $0x21] ss:$0 sm:$0xff] }
0x10a4   :  { %7043 = verf.f32 %v1164_v54 }
0x10ad   :  { %v7042_v56 = vpop.eup %7041 }
0x10ae   :  { %v7044_v57 = vpop.eup %7043  ;;  %v1167_v59 = vadd.f32 1.0, %v7042_v56 }
0x10af   :  { %v1168_v61 = vadd.f32 1.0, %v7044_v57 }
0x10b0   :  { %v1169_v1 = vmul.f32 %v1167_v59, %v1161_v58  ;;  %v6715_v58 = vld [vmem:[%s8766_s4] ss:$8 sps:$4 sm:$0xff]   ;;  %v6716_v59 = vld [vmem:[%s8766_s4 + $0x10] ss:$8 sps:$4 sm:$0xff]  }
0x10b1   :  { %v1170_v2 = vmul.f32 %v1168_v61, %v1162_v60 }
0x10b2   :  { %v1203_v4 = vpack.c.bf16 %v1169_v1, %v1169_v1 }
0x10b3   :  { %v1204_v3 = vpack.c.bf16 %v1170_v2, %v1170_v2 }
0x10b5   :  { %1334 = vmatprep.mubr.bf16.mxu0 %v1204_v3 }
0x10b6   :  { %1335 = vmatmul.mubr.bf16.vlgmr.msra.gmra.mrb[12].mxu0 %v1203_v4  ;;  %v1468_v4 = vld [vmem:[%s8767_s5] ss:$0 sm:$0xff] }
0x1189   :  { %v6255_v5 = vpop.f32.mrb[12].mxu0 }
0x118a   :  { %v6256_v7 = vpop.f32.mrb[13].mxu0 }
0x118b   :  { %v6257_v8 = vadd.f32 %v6256_v7, %v6255_v5  ;;  %v6258_v55 = vpop.f32.mrb[14].mxu0 }
0x118c   :  { %v6259_v10 = vpop.f32.mrb[15].mxu0 }
0x118d   :  { %v1337_v11 = vadd.f32 %v6257_v8, %v1205_v6 }
0x118f   :  { %v1342_v12 = vadd.f32 %v1337_v11, %v7419_v26 }
0x1191   :  { %v1345_v13 = vsel %vm429_vm4, %v1342_v12, 0.0 }
0x1192   :  { %1346 = vadd.xlane.f32.xlu1 %v1345_v13 }
0x121f   :  { %v1347_v14 = vpop.xlane.xlu1 %1346 }
0x1220   :  { %v1348_v15 = vmul.f32 0.015625, %v1347_v14 }
0x1222   :  { %v1349_v16 = vsub.f32 %v1342_v12, %v1348_v15 }
0x1224   :  { %v1350_v17 = vmul.f32 %v1349_v16, %v1349_v16 }
0x1226   :  { %v1351_v18 = vsel %vm429_vm4, %v1350_v17, 0.0  ;;  %v6717_v17 = vld [vmem:[%s8766_s4 + $0x20] ss:$8 sps:$4 sm:$0xff]  }
0x1227   :  { %1352 = vadd.xlane.f32.xlu1 %v1351_v18  ;;  %v6722_v18 = vld [vmem:[%s8766_s4 + $0x34] ss:$8 sps:$4 sm:$0xff]  }
0x12b4   :  { %v1353_v23 = vpop.xlane.xlu1 %1352 }
0x12b5   :  { %v1354_v24 = vmul.f32 0.015625, %v1353_v23  ;;  %v6728_v23 = vld [vmem:[%s8766_s4 + $0x54] ss:$8 sps:$4 sm:$0xff]  }
0x12b7   :  { %v1355_v25 = vadd.f32 1e-05, %v1354_v24  ;;  %v6729_v24 = vld [vmem:[%s8766_s4 + $0xe0] ss:$8 sps:$4 sm:$0xff]  }
0x12b8   :  { %6269 = vmatprep.subr.bf16.mxu0 %v6729_v24 }
0x12b9   :  { %7045 = vrsqrt.f32 %v1355_v25  ;;  %v6730_v25 = vld [vmem:[%s8766_s4 + $0x60] ss:$8 sps:$4 sm:$0xff]  }
0x12ba   :  { %6270 = vmatpush3.bf16.msra.mxu0 %v6730_v25 }
0x12c3   :  { %v7046_v26 = vpop.eup %7045 }
0x12c4   :  { %v1357_v29 = vmul.f32 %v7046_v26, %v1349_v16  ;;  %v6719_v16 = vld [vmem:[%s8766_s4 + $0x24] ss:$8 sps:$4 sm:$0xff]   ;;  %v6731_v26 = vld [vmem:[%s8766_s4 + $0xf0] ss:$8 sps:$4 sm:$0xff]  }
0x12c5   :  { %6271 = vmatprep.subr.bf16.mxu0 %v6731_v26  ;;  %v6747_v26 = vld [vmem:[%s8766_s4 + $0x164] ss:$8 sps:$4 sm:$0xff]  }
0x12c6   :  { %v1358_v28 = vmul.f32 %v1357_v29, %v1343_v27  ;;  %v6732_v27 = vld [vmem:[%s8766_s4 + $0x70] ss:$8 sps:$4 sm:$0xff]  }
0x12c7   :  { %6272 = vmatpush3.bf16.msra.mxu0 %v6732_v27  ;;  %v6745_v27 = vld [vmem:[%s8766_s4 + $0x160] ss:$8 sps:$4 sm:$0xff]  }
0x12c8   :  { %v1359_v31 = vadd.f32 %v1358_v28, %v1344_v30 }
0x12ca   :  { %v1368_v32 = vpack.c.bf16 %v1359_v31, %v1359_v31 }
0x12cc   :  { %6475 = vmatmul.mubr.msk.bf16.vlgmr.msra.gmra.mrb[12].mxu1 %vm65_vm0, %v1368_v32  ;;  %v1525_v32 = vld [vmem:[%s8767_s5 + $0x1] ss:$0 sm:$0xff] }
0x12cd   :  { %6482 = vmatprep.mubr.msk.bf16.mxu1 %vm7197_vm3, %v7196_v9  ;;  %6479 = vmatpush3.bf16.msra.mxu1 %v6715_v58 }
0x12ce   :  { %6480 = vmatprep.subr.bf16.mxu1 %v7196_v9 }
0x12d1   :  { %6481 = vmatpush3.bf16.msra.mxu1 %v6716_v59 }
0x12d2   :  { %1607 = vmatprep.subr.bf16.mxu1 %v6719_v16 }
0x139f   :  { %v1431_v35 = vpop.f32.mrb[12].mxu1 }
0x13a0   :  { %v1432_v33 = vadd.f32 %v1431_v35, %v1369_v34  ;;  %v6476_v36 = vpop.f32.mrb[13].mxu1  ;;  %v1526_v35 = vld [vmem:[%s8767_s5 + $0x2] ss:$0 sm:$0xff] }
0x13a1   :  { %v1434_v37 = vpop.f32.mrb[14].mxu1 }
0x13a2   :  { %v6477_v38 = vpop.f32.mrb[15].mxu1  ;;  %v1440_v39 = vsel %vm1439_vm5, %v1432_v33, 0.0 }
0x13a3   :  { %1441 = vadd.xlane.f32.xlu1 %v1440_v39  ;;  %v6733_v38 = vld [vmem:[%s8766_s4 + $0x100] ss:$8 sps:$4 sm:$0xff]  }
0x13a4   :  { %v6734_v39 = vld [vmem:[%s8766_s4 + $0x80] ss:$8 sps:$4 sm:$0xff]   ;;  %6273 = vmatprep.subr.bf16.mxu0 %v6733_v38 }
0x13a5   :  { %6274 = vmatpush3.bf16.msra.mxu0 %v6734_v39  ;;  %v1830_v39 = vld [vmem:[%s8767_s5 + $0x5] ss:$0 sm:$0xff] }
0x1430   :  { %v1442_v40 = vpop.xlane.xlu1 %1441 }
0x1431   :  { %v1444_v41 = vmul.f32 0.03125, %v1442_v40  ;;  %v6735_v40 = vld [vmem:[%s8766_s4 + $0x110] ss:$8 sps:$4 sm:$0xff]  }
0x1432   :  { %6275 = vmatprep.subr.bf16.mxu0 %v6735_v40 }
0x1433   :  { %v1445_v42 = vsub.f32 %v1432_v33, %v1444_v41  ;;  %v6736_v41 = vld [vmem:[%s8766_s4 + $0x90] ss:$8 sps:$4 sm:$0xff]  }
0x1434   :  { %6276 = vmatpush3.bf16.msra.mxu0 %v6736_v41  ;;  %v1831_v41 = vld [vmem:[%s8767_s5 + $0x6] ss:$0 sm:$0xff] }
0x1435   :  { %v1446_v43 = vmul.f32 %v1445_v42, %v1445_v42 }
0x1437   :  { %v1447_v44 = vsel %vm1439_vm5, %v1446_v43, 0.0  ;;  %v6738_v43 = vld [vmem:[%s8766_s4 + $0xa0] ss:$8 sps:$4 sm:$0xff]  }
0x1438   :  { %1448 = vadd.xlane.f32.xlu0 %v1447_v44  ;;  %v6739_v44 = vld [vmem:[%s8766_s4 + $0x130] ss:$8 sps:$4 sm:$0xff]  }
0x14c5   :  { %v1449_v45 = vpop.xlane.xlu0 %1448 }
0x14c6   :  { %v1450_v46 = vmul.f32 0.03125, %v1449_v45  ;;  %v6740_v45 = vld [vmem:[%s8766_s4 + $0xb0] ss:$8 sps:$4 sm:$0xff]  }
0x14c8   :  { %v1451_v47 = vadd.f32 1e-05, %v1450_v46  ;;  %v6741_v46 = vld [vmem:[%s8766_s4 + $0x140] ss:$8 sps:$4 sm:$0xff]  }
0x14ca   :  { %7047 = vrsqrt.f32 %v1451_v47  ;;  %v6742_v47 = vld [vmem:[%s8766_s4 + $0xc0] ss:$8 sps:$4 sm:$0xff]  }
0x14d4   :  { %v7048_v48 = vpop.eup %7047 }
0x14d5   :  { %v1453_v50 = vmul.f32 %v7048_v48, %v1445_v42  ;;  %v6737_v42 = vld [vmem:[%s8766_s4 + $0x120] ss:$8 sps:$4 sm:$0xff]   ;;  %v6743_v48 = vld [vmem:[%s8766_s4 + $0x150] ss:$8 sps:$4 sm:$0xff]  }
0x14d6   :  { %6277 = vmatprep.subr.bf16.mxu0 %v6737_v42 }
0x14d7   :  { %v1454_v52 = vmul.f32 %v1453_v50, %v1437_v49  ;;  %6278 = vmatpush3.bf16.msra.mxu0 %v6738_v43  ;;  %v6744_v49 = vld [vmem:[%s8766_s4 + $0xd0] ss:$8 sps:$4 sm:$0xff]   ;;  %v5690_v50 = vld [vmem:[%s8767_s5 + $0x3] ss:$8 sm:$0x3] }
0x14d8   :  { %6279 = vmatprep.subr.bf16.mxu0 %v6739_v44  ;;  %v6758_v44 = vld [vmem:[%s8766_s4 + $0x1a0] ss:$8 sps:$4 sm:$0xff]  }
0x14d9   :  { %v1455_v54 = vadd.f32 %v1454_v52, %v1438_v51  ;;  %v1557_v51 = vrot.slane %v5690_v50, %v7321_v63  ;;  %v1561_v52 = vrot.slane %v5690_v50, %v7323_v0  ;;  %v6763_v50 = vld [vmem:[%s8766_s4 + $0x250] ss:$8 sps:$4 sm:$0xff]  }
0x14db   :  { %v1456_v56 = vmul.f32 %v1455_v54, %v1455_v54  ;;  %6280 = vmatpush3.bf16.msra.mxu0 %v6740_v45 }
0x14dc   :  { %6281 = vmatprep.subr.bf16.mxu0 %v6741_v46  ;;  %v6759_v46 = vld [vmem:[%s8766_s4 + $0x230] ss:$8 sps:$4 sm:$0xff]  }
0x14dd   :  { %v1457_v57 = vsel %vm1439_vm5, %v1456_v56, 0.0 }
0x14de   :  { %1458 = vadd.xlane.f32.xlu1 %v1457_v57 }
0x14df   :  { %6282 = vmatpush3.bf16.msra.mxu0 %v6742_v47  ;;  %v6760_v47 = vld [vmem:[%s8766_s4 + $0x1b0] ss:$8 sps:$4 sm:$0xff]  }
0x14e0   :  { %6283 = vmatprep.subr.bf16.mxu0 %v6743_v48  ;;  %v6761_v48 = vld [vmem:[%s8766_s4 + $0x240] ss:$8 sps:$4 sm:$0xff]  }
0x14e3   :  { %6284 = vmatpush3.bf16.msra.mxu0 %v6744_v49  ;;  %v6762_v49 = vld [vmem:[%s8766_s4 + $0x1c0] ss:$8 sps:$4 sm:$0xff]  }
0x14e4   :  { %6486 = vmatprep.subr.bf16.mxu0 %v7196_v9 }
0x156b   :  { %v1459_v60 = vpop.xlane.xlu1 %1458 }
0x156c   :  { %v1460_v61 = vmax.f32 %v1459_v60, 1e-24 }
0x156e   :  { %7049 = vrsqrt.f32 %v1460_v61 }
0x1578   :  { %v7050_v1 = vpop.eup %7049 }
0x1579   :  { %v1462_v2 = vmul.f32 %v7050_v1, %v1455_v54 }
0x157b   :  { %v1467_v3 = vpack.c.bf16 %v1462_v2, %v1462_v2 }
0x157d   :  { %6483 = vmatmul.mubr.msk.bf16.vlgmr.msra.gmra.mrb[16].mxu1 %vm1481_vm6, %v1467_v3 }
0x157e   :  { %1639 = vmatprep.mubr.bf16.mxu1 %v7195_v62  ;;  %1608 = vmatpush1.bf16.msra.mxu1 %v6717_v17 }
0x157f   :  { %1609 = vmatprep.subr.bf16.mxu1 %v6722_v18 }
0x1582   :  { %1610 = vmatpush1.bf16.msra.mxu1 %v6720_v19 }
0x1583   :  { %1611 = vmatprep.subr.bf16.mxu1 %v6725_v20 }
0x1586   :  { %1612 = vmatpush1.bf16.msra.mxu1 %v6723_v21 }
0x1587   :  { %1613 = vmatprep.subr.bf16.mxu1 %v6728_v23 }
0x158a   :  { %1614 = vmatpush1.bf16.msra.mxu1 %v6726_v22 }
0x158b   :  { %1912 = vmatprep.subr.bf16.mxu1 %v6747_v26 }
0x1650   :  { %v1519_v5 = vpop.f32.mrb[16].mxu1 }
0x1651   :  { %v1520_v6 = vadd.f32 %v1519_v5, %v1468_v4  ;;  %v6484_v7 = vpop.f32.mrb[17].mxu1 }
0x1652   :  { %v1522_v8 = vpop.f32.mrb[18].mxu1 }
0x1653   :  { %v6485_v55 = vpop.f32.mrb[19].mxu1  ;;  %v1527_v10 = vsel %vm429_vm4, %v1520_v6, 0.0 }
0x1654   :  { %1528 = vadd.xlane.f32.xlu0 %v1527_v10 }
0x16e1   :  { %v1529_v11 = vpop.xlane.xlu0 %1528 }
0x16e2   :  { %v1530_v12 = vmul.f32 0.015625, %v1529_v11  ;;  %v7564_v11 = vld [vmem:[#allocation5] sm:$0xff] }
0x16e4   :  { %v1531_v13 = vsub.f32 %v1520_v6, %v1530_v12 }
0x16e6   :  { %v1532_v14 = vmul.f32 %v1531_v13, %v1531_v13 }
0x16e8   :  { %v1533_v15 = vsel %vm429_vm4, %v1532_v14, 0.0 }
0x16e9   :  { %1534 = vadd.xlane.f32.xlu1 %v1533_v15 }
0x1776   :  { %v1535_v29 = vpop.xlane.xlu1 %1534 }
0x1777   :  { %v1536_v30 = vmul.f32 0.015625, %v1535_v29  ;;  %v6750_v29 = vld [vmem:[%s8766_s4 + $0x174] ss:$8 sps:$4 sm:$0xff]  }
0x1779   :  { %v1537_v28 = vadd.f32 1e-05, %v1536_v30  ;;  %v6748_v30 = vld [vmem:[%s8766_s4 + $0x170] ss:$8 sps:$4 sm:$0xff]  }
0x177b   :  { %7051 = vrsqrt.f32 %v1537_v28  ;;  %v6753_v28 = vld [vmem:[%s8766_s4 + $0x184] ss:$8 sps:$4 sm:$0xff]  }
0x1785   :  { %v7052_v31 = vpop.eup %7051 }
0x1786   :  { %v1539_v34 = vmul.f32 %v7052_v31, %v1531_v13  ;;  %v1692_v13 = vld [vmem:[%s8767_s5 + $0x4] ss:$0 sm:$0xff]  ;;  %v6751_v31 = vld [vmem:[%s8766_s4 + $0x180] ss:$8 sps:$4 sm:$0xff]  }
0x1788   :  { %v1540_v33 = vmul.f32 %v1539_v34, %v1525_v32  ;;  %v6754_v32 = vld [vmem:[%s8766_s4 + $0x190] ss:$8 sps:$4 sm:$0xff]   ;;  %v6756_v34 = vld [vmem:[%s8766_s4 + $0x194] ss:$8 sps:$4 sm:$0xff]  }
0x178a   :  { %v7516_v36 = vadd.f32 %v1540_v33, %v1526_v35  ;;  %v6757_v35 = vld [vmem:[%s8766_s4 + $0x220] ss:$8 sps:$4 sm:$0xff]  }
0x178c   :  { %v1550_v37 = vpack.c.bf16 %v7516_v36, %v7516_v36 }
0x178e   :  { %5699 = vmatmul.mubr.msk.bf16.vlgmr.msra.gmra.mrb[20].mxu1 %vm65_vm0, %v1550_v37 }
0x178f   :  { %1944 = vmatprep.mubr.bf16.mxu1 %v7195_v62  ;;  %1913 = vmatpush1.bf16.msra.mxu1 %v6745_v27 }
0x1790   :  { %1914 = vmatprep.subr.bf16.mxu1 %v6750_v29 }
0x1793   :  { %1915 = vmatpush1.bf16.msra.mxu1 %v6748_v30 }
0x1794   :  { %1916 = vmatprep.subr.bf16.mxu1 %v6753_v28 }
0x1797   :  { %1917 = vmatpush1.bf16.msra.mxu1 %v6751_v31  ;;  %v2254_v31 = vld [vmem:[%s8768_s6] sm:$0x3] }
0x1798   :  { %1918 = vmatprep.subr.bf16.mxu1 %v6756_v34  ;;  %v2255_v34 = vld [vmem:[%s8769_s7] sm:$0x3] }
0x179b   :  { %1919 = vmatpush1.bf16.msra.mxu1 %v6754_v32  ;;  %v2259_v32 = vrot.slane %v2254_v31, %v7321_v63 }
0x179c   :  { %6291 = vmatprep.subr.bf16.mxu1 %v6757_v35  ;;  %v2286_v35 = vrot.slane %v2255_v34, %v7323_v0 }
0x1861   :  { %v1641_v54 = vpop.f32.mrb[20].mxu1 }
0x1862   :  { %v1642_v56 = vadd.f32 %v1641_v54, %v1557_v51  ;;  %v1643_v57 = vpop.f32.mrb[21].mxu1  ;;  %v6764_v51 = vld [vmem:[%s8766_s4 + $0x1d0] ss:$8 sps:$4 sm:$0xff]   ;;  %v6766_v54 = vld [vmem:[%s8766_s4 + $0x1e0] ss:$8 sps:$4 sm:$0xff]  }
0x1863   :  { %v1644_v58 = vadd.f32 %v1643_v57, %v1561_v52  ;;  %v1645_v59 = vpop.f32.mrb[22].mxu1  ;;  %v6765_v52 = vld [vmem:[%s8766_s4 + $0x260] ss:$8 sps:$4 sm:$0xff]   ;;  %v6768_v57 = vld [vmem:[%s8766_s4 + $0x1f0] ss:$8 sps:$4 sm:$0xff]  }
0x1864   :  { %v1650_v60 = vmul.f32 0.70710677, %v1642_v56  ;;  %v1646_v61 = vpop.f32.mrb[23].mxu1  ;;  %v1648_v3 = vmul.f32 0.5, %v1642_v56  ;;  %v6767_v56 = vld [vmem:[%s8766_s4 + $0x270] ss:$8 sps:$4 sm:$0xff]  }
0x1865   :  { %v1651_v1 = vmul.f32 0.70710677, %v1644_v58  ;;  %v1649_v5 = vmul.f32 0.5, %v1644_v58  ;;  %v6769_v58 = vld [vmem:[%s8766_s4 + $0x280] ss:$8 sps:$4 sm:$0xff]  }
0x1866   :  { %7053 = verf.f32 %v1650_v60  ;;  %v6770_v59 = vld [vmem:[%s8766_s4 + $0x200] ss:$8 sps:$4 sm:$0xff]   ;;  %v6771_v60 = vld [vmem:[%s8766_s4 + $0x290] ss:$8 sps:$4 sm:$0xff]  }
0x1867   :  { %7055 = verf.f32 %v1651_v1  ;;  %v6772_v61 = vld [vmem:[%s8766_s4 + $0x210] ss:$8 sps:$4 sm:$0xff]   ;;  %v5716_v1 = vld [vmem:[%s8767_s5 + $0x7] ss:$8 sm:$0x3] }
0x1870   :  { %v7054_v2 = vpop.eup %7053 }
0x1871   :  { %v7056_v9 = vpop.eup %7055  ;;  %v1654_v4 = vadd.f32 1.0, %v7054_v2  ;;  %v1862_v2 = vrot.slane %v5716_v1, %v7321_v63 }
0x1872   :  { %v1655_v6 = vadd.f32 1.0, %v7056_v9  ;;  %v1866_v9 = vrot.slane %v5716_v1, %v7323_v0 }
0x1873   :  { %v1656_v7 = vmul.f32 %v1654_v4, %v1648_v3 }
0x1874   :  { %v1657_v8 = vmul.f32 %v1655_v6, %v1649_v5 }
0x1875   :  { %v1690_v10 = vpack.c.bf16 %v1656_v7, %v1656_v7 }
0x1876   :  { %v1691_v55 = vpack.c.bf16 %v1657_v8, %v1657_v8 }
0x1878   :  { %1821 = vmatprep.mubr.bf16.mxu0 %v1691_v55 }
0x1879   :  { %1822 = vmatmul.mubr.bf16.vlgmr.msra.gmra.mrb[16].mxu0 %v1690_v10 }
0x187a   :  { %6494 = vmatprep.mubr.msk.bf16.mxu0 %vm7197_vm3, %v7564_v11 }
0x194c   :  { %v6285_v12 = vpop.f32.mrb[16].mxu0 }
0x194d   :  { %v6286_v14 = vpop.f32.mrb[17].mxu0 }
0x194e   :  { %v6287_v15 = vadd.f32 %v6286_v14, %v6285_v12  ;;  %v6288_v16 = vpop.f32.mrb[18].mxu0 }
0x194f   :  { %v6289_v17 = vpop.f32.mrb[19].mxu0 }
0x1950   :  { %v1824_v18 = vadd.f32 %v6287_v15, %v1692_v13 }
0x1952   :  { %v1829_v19 = vadd.f32 %v1824_v18, %v7516_v36 }
0x1954   :  { %v1832_v20 = vsel %vm429_vm4, %v1829_v19, 0.0 }
0x1955   :  { %1833 = vadd.xlane.f32.xlu0 %v1832_v20 }
0x19e2   :  { %v1834_v21 = vpop.xlane.xlu0 %1833 }
0x19e3   :  { %v1835_v22 = vmul.f32 0.015625, %v1834_v21 }
0x19e5   :  { %v1836_v23 = vsub.f32 %v1829_v19, %v1835_v22 }
0x19e7   :  { %v1837_v24 = vmul.f32 %v1836_v23, %v1836_v23 }
0x19e9   :  { %v1838_v25 = vsel %vm429_vm4, %v1837_v24, 0.0 }
0x19ea   :  { %1839 = vadd.xlane.f32.xlu1 %v1838_v25 }
0x1a77   :  { %v1840_v33 = vpop.xlane.xlu1 %1839 }
0x1a78   :  { %v1841_v36 = vmul.f32 0.015625, %v1840_v33 }
0x1a7a   :  { %v1842_v37 = vadd.f32 1e-05, %v1841_v36 }
0x1a7c   :  { %7057 = vrsqrt.f32 %v1842_v37 }
0x1a86   :  { %v7058_v38 = vpop.eup %7057 }
0x1a87   :  { %v1844_v40 = vmul.f32 %v7058_v38, %v1836_v23  ;;  %v1997_v23 = vld [vmem:[%s8767_s5 + $0x10] ss:$0 sm:$0xff] }
0x1a89   :  { %v1845_v42 = vmul.f32 %v1844_v40, %v1830_v39  ;;  %v2266_v40 = vrot.slane %v2254_v31, %v7323_v0 }
0x1a8b   :  { %v7607_v43 = vadd.f32 %v1845_v42, %v1831_v41  ;;  %v2279_v41 = vrot.slane %v2255_v34, %v7321_v63  ;;  %v6773_v42 = vld [vmem:[%s8766_s4 + $0x2a0] ss:$8 sps:$4 sm:$0xff]  }
0x1a8c   :  { %6487 = vmatpush3.bf16.msra.mxu0 %v6773_v42 }
0x1a8d   :  { %v1855_v45 = vpack.c.bf16 %v7607_v43, %v7607_v43  ;;  %6488 = vmatprep.subr.bf16.mxu0 %v7564_v11 }
0x1a8f   :  { %5725 = vmatmul.mubr.msk.bf16.vlgmr.msra.gmra.mrb[24].mxu1 %vm65_vm0, %v1855_v45  ;;  %v6776_v45 = vld [vmem:[%s8766_s4 + $0x2d0] ss:$8 sps:$4 sm:$0xff]  }
0x1a90   :  { %6292 = vmatpush3.bf16.msra.mxu1 %v6758_v44  ;;  %v6775_v44 = vld [vmem:[%s8766_s4 + $0x2c0] ss:$8 sps:$4 sm:$0xff]  }
0x1a91   :  { %6293 = vmatprep.subr.bf16.mxu1 %v6759_v46  ;;  %v2308_v46 = vsel %vm2307_vm7, %v2255_v34, 0.0 }
0x1a94   :  { %6294 = vmatpush3.bf16.msra.mxu1 %v6760_v47 }
0x1a95   :  { %6295 = vmatprep.subr.bf16.mxu1 %v6761_v48 }
0x1a98   :  { %6296 = vmatpush3.bf16.msra.mxu1 %v6762_v49 }
0x1a99   :  { %6297 = vmatprep.subr.bf16.mxu1 %v6763_v50 }
0x1a9c   :  { %6298 = vmatpush3.bf16.msra.mxu1 %v6764_v51 }
0x1a9d   :  { %6299 = vmatprep.subr.bf16.mxu1 %v6765_v52 }
0x1aa0   :  { %6300 = vmatpush3.bf16.msra.mxu1 %v6766_v54 }
0x1aa1   :  { %6301 = vmatprep.subr.bf16.mxu1 %v6767_v56 }
0x1aa4   :  { %6302 = vmatpush3.bf16.msra.mxu1 %v6768_v57 }
0x1aa5   :  { %6303 = vmatprep.subr.bf16.mxu1 %v6769_v58 }
0x1aa8   :  { %6304 = vmatpush3.bf16.msra.mxu1 %v6770_v59 }
0x1aa9   :  { %6305 = vmatprep.subr.bf16.mxu1 %v6771_v60 }
0x1aac   :  { %6306 = vmatpush3.bf16.msra.mxu1 %v6772_v61 }
0x1aad   :  { %6516 = vmatprep.subr.bf16.mxu1 %v7564_v11 }
0x1b62   :  { %v1946_v3 = vpop.f32.mrb[24].mxu1 }
0x1b63   :  { %v1947_v4 = vadd.f32 %v1946_v3, %v1862_v2  ;;  %v1948_v5 = vpop.f32.mrb[25].mxu1  ;;  %v2135_v3 = vld [vmem:[%s8767_s5 + $0x11] ss:$0 sm:$0xff] }
0x1b64   :  { %v1949_v6 = vadd.f32 %v1948_v5, %v1866_v9  ;;  %v1950_v7 = vpop.f32.mrb[26].mxu1  ;;  %v2136_v5 = vld [vmem:[%s8767_s5 + $0x12] ss:$0 sm:$0xff] }
0x1b65   :  { %v1955_v8 = vmul.f32 0.70710677, %v1947_v4  ;;  %v1951_v55 = vpop.f32.mrb[27].mxu1  ;;  %v1953_v14 = vmul.f32 0.5, %v1947_v4 }
0x1b66   :  { %v1956_v10 = vmul.f32 0.70710677, %v1949_v6  ;;  %v1954_v16 = vmul.f32 0.5, %v1949_v6 }
0x1b67   :  { %7059 = verf.f32 %v1955_v8 }
0x1b68   :  { %7061 = verf.f32 %v1956_v10  ;;  %v6777_v10 = vld [vmem:[%s8770_s8] sm:$0xff]  }
0x1b71   :  { %v7060_v12 = vpop.eup %7059 }
0x1b72   :  { %v7062_v13 = vpop.eup %7061  ;;  %v1959_v15 = vadd.f32 1.0, %v7060_v12 }
0x1b73   :  { %v1960_v17 = vadd.f32 1.0, %v7062_v13 }
0x1b74   :  { %v1961_v18 = vmul.f32 %v1959_v15, %v1953_v14  ;;  %v6778_v15 = vld [vmem:[%s8770_s8 + $0x8] sm:$0xff]  }
0x1b75   :  { %v1962_v19 = vmul.f32 %v1960_v17, %v1954_v16 }
0x1b76   :  { %v1995_v21 = vpack.c.bf16 %v1961_v18, %v1961_v18  ;;  %v6779_v18 = vld [vmem:[%s8770_s8 + $0x10] sm:$0xff]  }
0x1b77   :  { %v1996_v20 = vpack.c.bf16 %v1962_v19, %v1962_v19 }
0x1b79   :  { %2126 = vmatprep.mubr.bf16.mxu1 %v1996_v20 }
0x1b7a   :  { %2127 = vmatmul.mubr.bf16.vlgmr.msra.gmra.mrb[28].mxu1 %v1995_v21  ;;  %v6780_v21 = vld [vmem:[%s8770_s8 + $0x18] sm:$0xff]  }
0x1b7b   :  { %6522 = vmatprep.mubr.msk.bf16.mxu1 %vm7197_vm3, %v7564_v11 }
0x1c4d   :  { %v6307_v22 = vpop.f32.mrb[28].mxu1 }
0x1c4e   :  { %v6308_v24 = vpop.f32.mrb[29].mxu1 }
0x1c4f   :  { %v6309_v25 = vadd.f32 %v6308_v24, %v6307_v22  ;;  %v6310_v26 = vpop.f32.mrb[30].mxu1  ;;  %v6781_v24 = vld [vmem:[%s8770_s8 + $0x20] sm:$0xff]  }
0x1c50   :  { %v6311_v27 = vpop.f32.mrb[31].mxu1 }
0x1c51   :  { %v2129_v29 = vadd.f32 %v6309_v25, %v1997_v23  ;;  %v6782_v27 = vld [vmem:[%s8770_s8 + $0x28] sm:$0xff]  }
0x1c53   :  { %v2134_v30 = vadd.f32 %v2129_v29, %v7607_v43  ;;  %v6774_v43 = vld [vmem:[%s8766_s4 + $0x2b0] ss:$8 sps:$4 sm:$0xff]  }
0x1c54   :  { %6489 = vmatpush3.bf16.msra.mxu0 %v6774_v43  ;;  %v6783_v29 = vld [vmem:[%s8770_s8 + $0x30] ss:$0 sps:$4 sm:$0x33]  }
0x1c55   :  { %v2137_v28 = vsel %vm429_vm4, %v2134_v30, 0.0  ;;  %6490 = vmatprep.subr.bf16.mxu0 %v7564_v11  ;;  %v2378_v31 = vsel %vm2376_vm11, %v6783_v29, 0  ;;  %v6805_v29 = vld [vmem:[%s8771_s9 + $0xf0] ss:$8 sps:$4 sm:$0xff]  }
0x1c56   :  { %2138 = vadd.xlane.f32.xlu0 %v2137_v28 }
0x1c58   :  { %6491 = vmatpush3.bf16.msra.mxu0 %v6775_v44 }
0x1c59   :  { %6492 = vmatprep.subr.bf16.mxu0 %v7564_v11 }
0x1c5c   :  { %6493 = vmatpush3.bf16.msra.mxu0 %v6776_v45 }
0x1c5d   :  { %6498 = vmatprep.subr.bf16.mxu0 %v7564_v11 }
0x1c6c   :  { %2261 = vbcast.lane.b32.xlu0 %v2259_v32, 256 }
0x1c70   :  { %2288 = vbcast.lane.b32.xlu0 %v2286_v35, 256  ;;  %v6784_v35 = vld [vmem:[%s8771_s9] ss:$8 sps:$4 sm:$0xff]  }
0x1c71   :  { %6517 = vmatpush3.bf16.msra.mxu1 %v6784_v35 }
0x1c72   :  { %6518 = vmatprep.subr.bf16.mxu1 %v7564_v11 }
0x1ce3   :  { %v2139_v33 = vpop.xlane.xlu0 %2138 }
0x1ce4   :  { %v2140_v36 = vmul.f32 0.015625, %v2139_v33  ;;  %v6785_v33 = vld [vmem:[%s8771_s9 + $0x10] ss:$8 sps:$4 sm:$0xff]  }
0x1ce5   :  { %6519 = vmatpush3.bf16.msra.mxu1 %v6785_v33 }
0x1ce6   :  { %v2141_v37 = vsub.f32 %v2134_v30, %v2140_v36  ;;  %6520 = vmatprep.subr.bf16.mxu1 %v7564_v11  ;;  %v6786_v36 = vld [vmem:[%s8771_s9 + $0x20] ss:$8 sps:$4 sm:$0xff]  }
0x1ce7   :  { %v2262_v47 = vpop.permute.xlu0 %2261 }
0x1ce8   :  { %v2142_v38 = vmul.f32 %v2141_v37, %v2141_v37  ;;  %vm2270_vm8 = vcmp.eq.s32.totalorder %v7309_v53, %v2262_v47 }
0x1ce9   :  { %v5747_v54 = vsel %vm2270_vm8, 1.0, %v7564_v11  ;;  %6521 = vmatpush3.bf16.msra.mxu1 %v6786_v36 }
0x1cea   :  { %v2143_v39 = vsel %vm429_vm4, %v2142_v38, 0.0 }
0x1ceb   :  { %2144 = vadd.xlane.f32.xlu1 %v2143_v39  ;;  %v2289_v52 = vpop.permute.xlu0 %2288 }
0x1cfc   :  { %2268 = vbcast.lane.b32.xlu1 %v2266_v40, 256 }
0x1d00   :  { %2281 = vbcast.lane.b32.xlu1 %v2279_v41, 256 }
0x1d24   :  { %2309 = vadd.xlane.f32.xlu1 %v2308_v46 }
0x1d78   :  { %v2145_v48 = vpop.xlane.xlu1 %2144 }
0x1d79   :  { %v2146_v49 = vmul.f32 0.015625, %v2145_v48 }
0x1d7b   :  { %v2147_v50 = vadd.f32 1e-05, %v2146_v49 }
0x1d7c   :  { %v2269_v51 = vpop.permute.xlu1 %2268 }
0x1d7d   :  { %7063 = vrsqrt.f32 %v2147_v50  ;;  %vm2271_vm9 = vcmp.eq.s32.totalorder %v7309_v53, %v2269_v51  ;;  %v2429_v50 = vld [vmem:[%s8772_s10] ss:$0 sm:$0xff] }
0x1d7e   :  { %v5748_v56 = vsel %vm2271_vm9, 1.0, %v7564_v11 }
0x1d7f   :  { %v2291_v58 = vmul.f32 %v5748_v56, %v2289_v52 }
0x1d80   :  { %v2282_v57 = vpop.permute.xlu1 %2281 }
0x1d81   :  { %v2290_v59 = vmul.f32 %v5747_v54, %v2282_v57  ;;  %v2300_v61 = vsel %vm2292_vm10, %v2291_v58, 0.0 }
0x1d82   :  { %v2301_v9 = vrot.slane %v2300_v61, 4 }
0x1d83   :  { %v2293_v60 = vsel %vm2292_vm10, %v2290_v59, 0.0 }
0x1d84   :  { %v2294_v2 = vrot.slane %v2293_v60, 4  ;;  %v2302_v8 = vadd.f32 %v2301_v9, %v2300_v61  ;;  %v6789_v9 = vld [vmem:[%s8771_s9 + $0x34] ss:$8 sps:$4 sm:$0xff]  }
0x1d85   :  { %2564 = vmatprep.subr.bf16.mxu1 %v6789_v9 }
0x1d86   :  { %v2295_v7 = vadd.f32 %v2294_v2, %v2293_v60  ;;  %v2303_v14 = vrot.slane %v2302_v8, 2 }
0x1d87   :  { %v7064_v1 = vpop.eup %7063 }
0x1d88   :  { %v2149_v4 = vmul.f32 %v7064_v1, %v2141_v37  ;;  %v2296_v13 = vrot.slane %v2295_v7, 2  ;;  %v2304_v17 = vadd.f32 %v2303_v14, %v2302_v8  ;;  %v6796_v8 = vld [vmem:[%s8771_s9 + $0x60] ss:$8 sps:$4 sm:$0xff]   ;;  %v6801_v14 = vld [vmem:[%s8771_s9 + $0xb0] ss:$8 sps:$4 sm:$0xff]  }
0x1d8a   :  { %v2150_v6 = vmul.f32 %v2149_v4, %v2135_v3  ;;  %v2297_v16 = vadd.f32 %v2296_v13, %v2295_v7  ;;  %v2305_v20 = vrot.slane %v2304_v17, 1  ;;  %v6787_v3 = vld [vmem:[%s8771_s9 + $0x30] ss:$8 sps:$4 sm:$0xff]   ;;  %v6792_v4 = vld [vmem:[%s8771_s9 + $0x44] ss:$8 sps:$4 sm:$0xff]  }
0x1d8b   :  { %v6795_v7 = vld [vmem:[%s8771_s9 + $0x54] ss:$8 sps:$4 sm:$0xff]   ;;  %v6800_v13 = vld [vmem:[%s8771_s9 + $0xa0] ss:$8 sps:$4 sm:$0xff]  }
0x1d8c   :  { %v2151_v55 = vadd.f32 %v2150_v6, %v2136_v5  ;;  %v2298_v19 = vrot.slane %v2297_v16, 1  ;;  %v2306_v23 = vadd.f32 %v2305_v20, %v2304_v17  ;;  %v6790_v5 = vld [vmem:[%s8771_s9 + $0x40] ss:$8 sps:$4 sm:$0xff]   ;;  %v6793_v6 = vld [vmem:[%s8771_s9 + $0x50] ss:$8 sps:$4 sm:$0xff]  }
0x1d8e   :  { %v2160_v12 = vpack.c.bf16 %v2151_v55, %v2151_v55  ;;  %v2299_v22 = vadd.f32 %v2298_v19, %v2297_v16  ;;  %v2326_v26 = vpack.c.bf16 %v2306_v23, %v2306_v23  ;;  %v6797_v55 = vld [vmem:[%s8771_s9 + $0x70] ss:$8 sps:$4 sm:$0xff]   ;;  %v2492_v19 = vld [vmem:[%s8772_s10 + $0x1] ss:$0 sm:$0xff] }
0x1d90   :  { %6495 = vmatmul.mubr.msk.bf16.vlgmr.msra.gmra.mrb[20].mxu0 %vm65_vm0, %v2160_v12  ;;  %v2325_v25 = vpack.c.bf16 %v2299_v22, %v2299_v22  ;;  %v2330_v28 = vunpack.c.l.b16 %v2326_v26  ;;  %v6799_v12 = vld [vmem:[%s8771_s9 + $0x90] ss:$8 sps:$4 sm:$0xff]  }
0x1d91   :  { %6499 = vmatpush3.bf16.msra.mxu0 %v6777_v10  ;;  %6512 = vmatprep.mubr.msk.bf16.mxu0 %vm7197_vm3, %v7564_v11  ;;  %v6798_v10 = vld [vmem:[%s8771_s9 + $0x80] ss:$8 sps:$4 sm:$0xff]   ;;  %v6803_v26 = vld [vmem:[%s8771_s9 + $0xd0] ss:$8 sps:$4 sm:$0xff]  }
0x1d92   :  { %6500 = vmatprep.subr.bf16.mxu0 %v7564_v11  ;;  %v2329_v30 = vunpack.c.l.b16 %v2325_v25  ;;  %v6802_v25 = vld [vmem:[%s8771_s9 + $0xc0] ss:$8 sps:$4 sm:$0xff]  }
0x1d94   :  { %v2331_v32 = vsel %vm146_vm1, %v2330_v28, %v2329_v30  ;;  %v6806_v30 = vld [vmem:[%s8771_s9 + $0x100] ss:$8 sps:$4 sm:$0xff]   ;;  %v6807_v28 = vld [vmem:[%s8771_s9 + $0x110] ss:$8 sps:$4 sm:$0xff]  }
0x1d95   :  { %6501 = vmatpush3.bf16.msra.mxu0 %v6778_v15  ;;  %v2332_v34 = vpack.c.b16 %v2331_v32, %v2331_v32 }
0x1d96   :  { %6502 = vmatprep.subr.bf16.mxu0 %v7564_v11 }
0x1d99   :  { %6503 = vmatpush3.bf16.msra.mxu0 %v6779_v18 }
0x1d9a   :  { %6504 = vmatprep.subr.bf16.mxu0 %v7564_v11 }
0x1d9d   :  { %6505 = vmatpush3.bf16.msra.mxu0 %v6780_v21  ;;  %v2493_v21 = vld [vmem:[%s8772_s10 + $0x2] ss:$0 sm:$0xff] }
0x1d9e   :  { %6506 = vmatprep.subr.bf16.mxu0 %v7564_v11 }
0x1da1   :  { %6507 = vmatpush3.bf16.msra.mxu0 %v6781_v24 }
0x1da2   :  { %6508 = vmatprep.subr.bf16.mxu0 %v7564_v11 }
0x1da5   :  { %6509 = vmatpush3.bf16.msra.mxu0 %v6782_v27  ;;  %v6804_v27 = vld [vmem:[%s8771_s9 + $0xe0] ss:$8 sps:$4 sm:$0xff]  }
0x1da6   :  { %6510 = vmatprep.subr.bf16.mxu0 %v7564_v11 }
0x1da9   :  { %6511 = vmatpush3.bf16.msra.mxu0 %v2378_v31  ;;  %v5761_v31 = vld [vmem:[%s8772_s10 + $0x3] ss:$8 sm:$0x3] }
0x1daa   :  { %2717 = vmatprep.subr.bf16.mxu0 %v7195_v62  ;;  %v2524_v32 = vrot.slane %v5761_v31, %v7321_v63 }
0x1dac   :  { %6513 = vmatmul.mubr.msk.bf16.vlgmr.msra.gmra.mrb[24].mxu0 %vm2372_vm12, %v2332_v34  ;;  %v2528_v34 = vrot.slane %v5761_v31, %v7323_v0  ;;  %v6825_v31 = vld [vmem:[%s8771_s9 + $0x1d0] ss:$8 sps:$4 sm:$0xff]  }
0x1dad   :  { %2718 = vmatpush1.bf16.msra.mxu0 %v6796_v8  ;;  %v6813_v8 = vld [vmem:[%s8771_s9 + $0x134] ss:$8 sps:$4 sm:$0xff]  }
0x1dae   :  { %2719 = vmatprep.subr.bf16.mxu0 %v7195_v62 }
0x1db1   :  { %v2310_v41 = vpop.xlane.xlu1 %2309  ;;  %2720 = vmatpush1.bf16.msra.mxu0 %v6797_v55  ;;  %v6811_v55 = vld [vmem:[%s8771_s9 + $0x130] ss:$8 sps:$4 sm:$0xff]  }
0x1db2   :  { %v2311_v42 = vmax.f32 %v2310_v41, 1.0  ;;  %2721 = vmatprep.subr.bf16.mxu0 %v7195_v62 }
0x1db4   :  { %7065 = vrcp.f32 %v2311_v42 }
0x1db5   :  { %2722 = vmatpush1.bf16.msra.mxu0 %v6798_v10  ;;  %v6814_v10 = vld [vmem:[%s8771_s9 + $0x140] ss:$8 sps:$4 sm:$0xff]  }
0x1db6   :  { %2723 = vmatprep.subr.bf16.mxu0 %v7195_v62 }
0x1db9   :  { %2724 = vmatpush1.bf16.msra.mxu0 %v6799_v12  ;;  %v6816_v12 = vld [vmem:[%s8771_s9 + $0x144] ss:$8 sps:$4 sm:$0xff]  }
0x1dba   :  { %2725 = vmatprep.subr.bf16.mxu0 %v7195_v62 }
0x1dbd   :  { %2726 = vmatpush1.bf16.msra.mxu0 %v6800_v13 }
0x1dbe   :  { %v7066_v43 = vpop.eup %7065  ;;  %2727 = vmatprep.subr.bf16.mxu0 %v7195_v62 }
0x1dc1   :  { %2728 = vmatpush1.bf16.msra.mxu0 %v6801_v14 }
0x1dc2   :  { %2729 = vmatprep.subr.bf16.mxu0 %v7195_v62 }
0x1dc5   :  { %2730 = vmatpush1.bf16.msra.mxu0 %v6802_v25  ;;  %v6819_v25 = vld [vmem:[%s8771_s9 + $0x170] ss:$8 sps:$4 sm:$0xff]  }
0x1dc6   :  { %2731 = vmatprep.subr.bf16.mxu0 %v7195_v62 }
0x1dc9   :  { %2732 = vmatpush1.bf16.msra.mxu0 %v6803_v26  ;;  %v6820_v26 = vld [vmem:[%s8771_s9 + $0x180] ss:$8 sps:$4 sm:$0xff]  }
0x1dca   :  { %2733 = vmatprep.subr.bf16.mxu0 %v7195_v62 }
0x1dcd   :  { %2734 = vmatpush1.bf16.msra.mxu0 %v6804_v27  ;;  %v6821_v27 = vld [vmem:[%s8771_s9 + $0x190] ss:$8 sps:$4 sm:$0xff]  }
0x1dce   :  { %2735 = vmatprep.subr.bf16.mxu0 %v7195_v62 }
0x1dd1   :  { %2736 = vmatpush1.bf16.msra.mxu0 %v6805_v29  ;;  %v6822_v29 = vld [vmem:[%s8771_s9 + $0x1a0] ss:$8 sps:$4 sm:$0xff]  }
0x1dd2   :  { %2737 = vmatprep.subr.bf16.mxu0 %v7195_v62 }
0x1dd5   :  { %2738 = vmatpush1.bf16.msra.mxu0 %v6806_v30  ;;  %v6823_v30 = vld [vmem:[%s8771_s9 + $0x1b0] ss:$8 sps:$4 sm:$0xff]  }
0x1dd6   :  { %2739 = vmatprep.subr.bf16.mxu0 %v7195_v62 }
0x1dd9   :  { %2740 = vmatpush1.bf16.msra.mxu0 %v6807_v28  ;;  %v6824_v28 = vld [vmem:[%s8771_s9 + $0x1c0] ss:$8 sps:$4 sm:$0xff]  }
0x1dda   :  { %6526 = vmatprep.subr.bf16.mxu0 %v7564_v11 }
0x1e63   :  { %v7755_v37 = vpop.f32.mrb[20].mxu0 }
0x1e64   :  { %v6496_v38 = vpop.f32.mrb[21].mxu0 }
0x1e65   :  { %v2226_v39 = vpop.f32.mrb[22].mxu0 }
0x1e66   :  { %v6497_v40 = vpop.f32.mrb[23].mxu0 }
0x1e7f   :  { %v2414_v44 = vpop.f32.mrb[24].mxu0 }
0x1e80   :  { %v2421_v45 = vmul.f32 %v7066_v43, %v2414_v44  ;;  %v6514_v46 = vpop.f32.mrb[25].mxu0 }
0x1e81   :  { %v2417_v47 = vpop.f32.mrb[26].mxu0 }
0x1e82   :  { %v2428_v48 = vpack.c.bf16 %v2421_v45, %v2421_v45  ;;  %v6515_v49 = vpop.f32.mrb[27].mxu0 }
0x1e84   :  { %6523 = vmatmul.mubr.msk.bf16.vlgmr.msra.gmra.mrb[32].mxu1 %vm2448_vm13, %v2428_v48 }
0x1e85   :  { %2596 = vmatprep.mubr.bf16.mxu1 %v7195_v62  ;;  %2565 = vmatpush1.bf16.msra.mxu1 %v6787_v3 }
0x1e86   :  { %2566 = vmatprep.subr.bf16.mxu1 %v6792_v4 }
0x1e89   :  { %2567 = vmatpush1.bf16.msra.mxu1 %v6790_v5 }
0x1e8a   :  { %2568 = vmatprep.subr.bf16.mxu1 %v6795_v7  ;;  %v6808_v7 = vld [vmem:[%s8771_s9 + $0x120] ss:$8 sps:$4 sm:$0xff]  }
0x1e8d   :  { %2569 = vmatpush1.bf16.msra.mxu1 %v6793_v6  ;;  %v6810_v6 = vld [vmem:[%s8771_s9 + $0x124] ss:$8 sps:$4 sm:$0xff]  }
0x1e8e   :  { %2828 = vmatprep.subr.bf16.mxu1 %v6810_v6 }
0x1f57   :  { %v2486_v51 = vpop.f32.mrb[32].mxu1 }
0x1f58   :  { %v2487_v52 = vadd.f32 %v2486_v51, %v2429_v50  ;;  %v6524_v54 = vpop.f32.mrb[33].mxu1 }
0x1f59   :  { %v2489_v56 = vpop.f32.mrb[34].mxu1  ;;  %v2641_v54 = vld [vmem:[%s8772_s10 + $0x4] ss:$0 sm:$0xff] }
0x1f5a   :  { %v6525_v57 = vpop.f32.mrb[35].mxu1  ;;  %v2495_v58 = vsel %vm2494_vm14, %v2487_v52, 0.0 }
0x1f5b   :  { %2496 = vadd.xlane.f32.xlu0 %v2495_v58 }
0x1fe8   :  { %v2497_v59 = vpop.xlane.xlu0 %2496 }
0x1fe9   :  { %v2499_v60 = vmul.f32 0.020833334, %v2497_v59 }
0x1feb   :  { %v2500_v61 = vsub.f32 %v2487_v52, %v2499_v60 }
0x1fed   :  { %v2501_v1 = vmul.f32 %v2500_v61, %v2500_v61 }
0x1fef   :  { %v2502_v2 = vsel %vm2494_vm14, %v2501_v1, 0.0 }
0x1ff0   :  { %2503 = vadd.xlane.f32.xlu0 %v2502_v2 }
0x207d   :  { %v2504_v15 = vpop.xlane.xlu0 %2503 }
0x207e   :  { %v2505_v16 = vmul.f32 0.020833334, %v2504_v15 }
0x2080   :  { %v2506_v17 = vadd.f32 1e-05, %v2505_v16 }
0x2082   :  { %7067 = vrsqrt.f32 %v2506_v17  ;;  %v2758_v17 = vld [vmem:[%s8772_s10 + $0x5] ss:$0 sm:$0xff] }
0x208c   :  { %v7068_v18 = vpop.eup %7067 }
0x208d   :  { %v2508_v20 = vmul.f32 %v7068_v18, %v2500_v61 }
0x208f   :  { %v2509_v22 = vmul.f32 %v2508_v20, %v2492_v19  ;;  %v2759_v19 = vld [vmem:[%s8772_s10 + $0x6] ss:$0 sm:$0xff] }
0x2091   :  { %v2510_v23 = vadd.f32 %v2509_v22, %v2493_v21  ;;  %v6817_v22 = vld [vmem:[%s8771_s9 + $0x150] ss:$8 sps:$4 sm:$0xff]  }
0x2093   :  { %v2517_v24 = vpack.c.bf16 %v2510_v23, %v2510_v23 }
0x2095   :  { %5768 = vmatmul.mubr.msk.bf16.vlgmr.msra.gmra.mrb[36].mxu1 %vm2448_vm13, %v2517_v24  ;;  %v6818_v24 = vld [vmem:[%s8771_s9 + $0x160] ss:$8 sps:$4 sm:$0xff]  }
0x2096   :  { %2860 = vmatprep.mubr.bf16.mxu1 %v7195_v62  ;;  %2829 = vmatpush1.bf16.msra.mxu1 %v6808_v7 }
0x2097   :  { %2830 = vmatprep.subr.bf16.mxu1 %v6813_v8 }
0x209a   :  { %2831 = vmatpush1.bf16.msra.mxu1 %v6811_v55 }
0x209b   :  { %2832 = vmatprep.subr.bf16.mxu1 %v6816_v12  ;;  %v6830_v12 = vld [vmem:[%s8771_s9 + $0x220] ss:$8 sps:$4 sm:$0xff]  }
0x209e   :  { %2833 = vmatpush1.bf16.msra.mxu1 %v6814_v10  ;;  %v6829_v10 = vld [vmem:[%s8771_s9 + $0x210] ss:$8 sps:$4 sm:$0xff]  }
0x209f   :  { %2981 = vmatprep.subr.bf16.mxu1 %v7195_v62 }
0x2168   :  { %v2598_v35 = vpop.f32.mrb[36].mxu1 }
0x2169   :  { %v2599_v33 = vadd.f32 %v2598_v35, %v2524_v32  ;;  %v2600_v36 = vpop.f32.mrb[37].mxu1  ;;  %v6826_v32 = vld [vmem:[%s8771_s9 + $0x1e0] ss:$8 sps:$4 sm:$0xff]  }
0x216a   :  { %v2601_v38 = vadd.f32 %v2600_v36, %v2528_v34  ;;  %v2602_v39 = vpop.f32.mrb[38].mxu1  ;;  %v6827_v34 = vld [vmem:[%s8771_s9 + $0x1f0] ss:$8 sps:$4 sm:$0xff]   ;;  %v6828_v35 = vld [vmem:[%s8771_s9 + $0x200] ss:$8 sps:$4 sm:$0xff]  }
0x216b   :  { %v2607_v40 = vmul.f32 0.70710677, %v2599_v33  ;;  %v2603_v41 = vpop.f32.mrb[39].mxu1  ;;  %v2605_v45 = vmul.f32 0.5, %v2599_v33 }
0x216c   :  { %v2608_v42 = vmul.f32 0.70710677, %v2601_v38  ;;  %v2606_v47 = vmul.f32 0.5, %v2601_v38  ;;  %v5782_v33 = vld [vmem:[%s8772_s10 + $0x7] ss:$8 sm:$0x3] }
0x216d   :  { %7069 = verf.f32 %v2607_v40  ;;  %v2788_v36 = vrot.slane %v5782_v33, %v7321_v63  ;;  %v2792_v38 = vrot.slane %v5782_v33, %v7323_v0 }
0x216e   :  { %7071 = verf.f32 %v2608_v42 }
0x2177   :  { %v7070_v43 = vpop.eup %7069 }
0x2178   :  { %v7072_v44 = vpop.eup %7071  ;;  %v2611_v46 = vadd.f32 1.0, %v7070_v43 }
0x2179   :  { %v2612_v48 = vadd.f32 1.0, %v7072_v44 }
0x217a   :  { %v2613_v49 = vmul.f32 %v2611_v46, %v2605_v45 }
0x217b   :  { %v2614_v50 = vmul.f32 %v2612_v48, %v2606_v47 }
0x217c   :  { %v2639_v52 = vpack.c.bf16 %v2613_v49, %v2613_v49 }
0x217d   :  { %v2640_v51 = vpack.c.bf16 %v2614_v50, %v2614_v50 }
0x217f   :  { %5781 = vmatprep.mubr.msk.bf16.mxu0 %vm65_vm0, %v2640_v51 }
0x2180   :  { %2750 = vmatmul.mubr.bf16.vlgmr.msra.gmra.mrb[28].mxu0 %v2639_v52 }
0x2181   :  { %6532 = vmatprep.mubr.msk.bf16.mxu0 %vm7197_vm3, %v7564_v11  ;;  %6527 = vmatpush3.bf16.msra.mxu0 %v6829_v10  ;;  %v6848_v10 = vld [vmem:[%s8773_s11 + $0xf0] ss:$8 sps:$4 sm:$0xff]  }
0x2182   :  { %6528 = vmatprep.subr.bf16.mxu0 %v7564_v11 }
0x2185   :  { %6529 = vmatpush3.bf16.msra.mxu0 %v6830_v12  ;;  %v6849_v12 = vld [vmem:[%s8773_s11 + $0x70] ss:$8 sps:$4 sm:$0xff]  }
0x2186   :  { %6530 = vmatprep.subr.bf16.mxu0 %v7564_v11 }
0x2253   :  { %v2751_v56 = vpop.f32.mrb[28].mxu0 }
0x2254   :  { %v2752_v57 = vadd.f32 %v2751_v56, %v2641_v54  ;;  %v2753_v58 = vpop.f32.mrb[29].mxu0 }
0x2255   :  { %v2754_v59 = vpop.f32.mrb[30].mxu0 }
0x2256   :  { %v2755_v60 = vpop.f32.mrb[31].mxu0  ;;  %v2757_v61 = vadd.f32 %v2752_v57, %v2510_v23  ;;  %v2905_v59 = vld [vmem:[%s8772_s10 + $0x10] ss:$0 sm:$0xff] }
0x2258   :  { %v2760_v1 = vsel %vm2494_vm14, %v2757_v61, 0.0 }
0x2259   :  { %2761 = vadd.xlane.f32.xlu1 %v2760_v1 }
0x22e6   :  { %v2762_v2 = vpop.xlane.xlu1 %2761 }
0x22e7   :  { %v2763_v9 = vmul.f32 0.020833334, %v2762_v2 }
0x22e9   :  { %v2764_v3 = vsub.f32 %v2757_v61, %v2763_v9 }
0x22eb   :  { %v2765_v4 = vmul.f32 %v2764_v3, %v2764_v3 }
0x22ed   :  { %v2766_v5 = vsel %vm2494_vm14, %v2765_v4, 0.0 }
0x22ee   :  { %2767 = vadd.xlane.f32.xlu0 %v2766_v5 }
0x237b   :  { %v2768_v13 = vpop.xlane.xlu0 %2767 }
0x237c   :  { %v2769_v14 = vmul.f32 0.020833334, %v2768_v13  ;;  %v6831_v13 = vld [vmem:[%s8771_s9 + $0x230] ss:$8 sps:$4 sm:$0xff]  }
0x237d   :  { %6531 = vmatpush3.bf16.msra.mxu0 %v6831_v13 }
0x237e   :  { %v2770_v15 = vadd.f32 1e-05, %v2769_v14 }
0x2380   :  { %7073 = vrsqrt.f32 %v2770_v15 }
0x238a   :  { %v7074_v16 = vpop.eup %7073 }
0x238b   :  { %v2772_v18 = vmul.f32 %v7074_v16, %v2764_v3 }
0x238d   :  { %v2773_v20 = vmul.f32 %v2772_v18, %v2758_v17  ;;  %v3022_v18 = vld [vmem:[%s8772_s10 + $0x11] ss:$0 sm:$0xff] }
0x238f   :  { %v7876_v21 = vadd.f32 %v2773_v20, %v2759_v19  ;;  %v3023_v20 = vld [vmem:[%s8772_s10 + $0x12] ss:$0 sm:$0xff] }
0x2391   :  { %v2781_v23 = vpack.c.bf16 %v7876_v21, %v7876_v21 }
0x2393   :  { %5789 = vmatmul.mubr.msk.bf16.vlgmr.msra.gmra.mrb[40].mxu1 %vm2448_vm13, %v2781_v23 }
0x2394   :  { %2982 = vmatpush1.bf16.msra.mxu1 %v6817_v22 }
0x2395   :  { %2983 = vmatprep.subr.bf16.mxu1 %v7195_v62 }
0x2398   :  { %2984 = vmatpush1.bf16.msra.mxu1 %v6818_v24  ;;  %v3046_v24 = vld [vmem:[%s8772_s10 + $0x13] ss:$0 sm:$0xff] }
0x2399   :  { %2985 = vmatprep.subr.bf16.mxu1 %v7195_v62 }
0x239c   :  { %2986 = vmatpush1.bf16.msra.mxu1 %v6819_v25 }
0x239d   :  { %2987 = vmatprep.subr.bf16.mxu1 %v7195_v62 }
0x23a0   :  { %2988 = vmatpush1.bf16.msra.mxu1 %v6820_v26 }
0x23a1   :  { %2989 = vmatprep.subr.bf16.mxu1 %v7195_v62 }
0x23a4   :  { %2990 = vmatpush1.bf16.msra.mxu1 %v6821_v27 }
0x23a5   :  { %2991 = vmatprep.subr.bf16.mxu1 %v7195_v62 }
0x23a8   :  { %2992 = vmatpush1.bf16.msra.mxu1 %v6822_v29 }
0x23a9   :  { %2993 = vmatprep.subr.bf16.mxu1 %v7195_v62 }
0x23ac   :  { %2994 = vmatpush1.bf16.msra.mxu1 %v6823_v30 }
0x23ad   :  { %2995 = vmatprep.subr.bf16.mxu1 %v7195_v62 }
0x23b0   :  { %2996 = vmatpush1.bf16.msra.mxu1 %v6824_v28 }
0x23b1   :  { %2997 = vmatprep.subr.bf16.mxu1 %v7195_v62 }
0x23b4   :  { %2998 = vmatpush1.bf16.msra.mxu1 %v6825_v31 }
0x23b5   :  { %2999 = vmatprep.subr.bf16.mxu1 %v7195_v62 }
0x23b8   :  { %3000 = vmatpush1.bf16.msra.mxu1 %v6826_v32 }
0x23b9   :  { %3001 = vmatprep.subr.bf16.mxu1 %v7195_v62 }
0x23bc   :  { %3002 = vmatpush1.bf16.msra.mxu1 %v6827_v34 }
0x23bd   :  { %3003 = vmatprep.subr.bf16.mxu1 %v7195_v62 }
0x23c0   :  { %3004 = vmatpush1.bf16.msra.mxu1 %v6828_v35 }
0x23c1   :  { %6536 = vmatprep.subr.bf16.mxu1 %v7564_v11 }
0x2466   :  { %v2862_v39 = vpop.f32.mrb[40].mxu1 }
0x2467   :  { %v2863_v40 = vadd.f32 %v2862_v39, %v2788_v36  ;;  %v2864_v41 = vpop.f32.mrb[41].mxu1  ;;  %v6832_v36 = vld [vmem:[%s8773_s11] ss:$8 sps:$4 sm:$0xff]  }
0x2468   :  { %v2865_v42 = vadd.f32 %v2864_v41, %v2792_v38  ;;  %v2866_v43 = vpop.f32.mrb[42].mxu1  ;;  %v6833_v38 = vld [vmem:[%s8773_s11 + $0x10] ss:$8 sps:$4 sm:$0xff]  }
0x2469   :  { %v2871_v44 = vmul.f32 0.70710677, %v2863_v40  ;;  %v2867_v45 = vpop.f32.mrb[43].mxu1  ;;  %v2869_v49 = vmul.f32 0.5, %v2863_v40  ;;  %v3108_v43 = vld [vmem:[%s8772_s10 + $0x14] ss:$0 sm:$0xff] }
0x246a   :  { %v2872_v46 = vmul.f32 0.70710677, %v2865_v42  ;;  %v2870_v51 = vmul.f32 0.5, %v2865_v42  ;;  %v3109_v45 = vld [vmem:[%s8772_s10 + $0x15] ss:$0 sm:$0xff] }
0x246b   :  { %7075 = verf.f32 %v2871_v44 }
0x246c   :  { %7077 = verf.f32 %v2872_v46 }
0x2475   :  { %v7076_v47 = vpop.eup %7075 }
0x2476   :  { %v7078_v48 = vpop.eup %7077  ;;  %v2875_v50 = vadd.f32 1.0, %v7076_v47 }
0x2477   :  { %v2876_v52 = vadd.f32 1.0, %v7078_v48 }
0x2478   :  { %v2877_v54 = vmul.f32 %v2875_v50, %v2869_v49 }
0x2479   :  { %v2878_v56 = vmul.f32 %v2876_v52, %v2870_v51 }
0x247a   :  { %v2903_v58 = vpack.c.bf16 %v2877_v54, %v2877_v54 }
0x247b   :  { %v2904_v57 = vpack.c.bf16 %v2878_v56, %v2878_v56 }
0x247d   :  { %5802 = vmatprep.mubr.msk.bf16.mxu1 %vm65_vm0, %v2904_v57 }
0x247e   :  { %3014 = vmatmul.mubr.bf16.vlgmr.msra.gmra.mrb[44].mxu1 %v2903_v58 }
0x247f   :  { %6540 = vmatprep.mubr.msk.bf16.mxu1 %vm7197_vm3, %v7564_v11  ;;  %6537 = vmatpush3.bf16.msra.mxu1 %v6832_v36  ;;  %v5810_v36 = vld [vmem:[%s8774_s12 + $0x3] ss:$8 sm:$0x3] }
0x2480   :  { %6538 = vmatprep.subr.bf16.mxu1 %v7564_v11  ;;  %v3130_v11 = vld [vmem:[%s8774_s12] ss:$0 sm:$0xff] }
0x2483   :  { %6539 = vmatpush3.bf16.msra.mxu1 %v6833_v38  ;;  %v3218_v38 = vrot.slane %v5810_v36, %v7321_v63 }
0x2551   :  { %v3015_v60 = vpop.f32.mrb[44].mxu1 }
0x2552   :  { %v3016_v61 = vadd.f32 %v3015_v60, %v2905_v59  ;;  %v3017_v1 = vpop.f32.mrb[45].mxu1 }
0x2553   :  { %v3018_v2 = vpop.f32.mrb[46].mxu1  ;;  %v6836_v1 = vld [vmem:[%s8773_s11 + $0x24] ss:$8 sps:$4 sm:$0xff]  }
0x2554   :  { %v3019_v9 = vpop.f32.mrb[47].mxu1  ;;  %v3021_v3 = vadd.f32 %v3016_v61, %v7876_v21  ;;  %v6834_v2 = vld [vmem:[%s8773_s11 + $0x20] ss:$8 sps:$4 sm:$0xff]   ;;  %3268 = vmatprep.subr.bf16.mxu1 %v6836_v1 }
0x2555   :  { %v6839_v9 = vld [vmem:[%s8773_s11 + $0x34] ss:$8 sps:$4 sm:$0xff]  }
0x2556   :  { %v3024_v4 = vsel %vm2494_vm14, %v3021_v3, 0.0 }
0x2557   :  { %3025 = vadd.xlane.f32.xlu1 %v3024_v4  ;;  %v6842_v4 = vld [vmem:[%s8773_s11 + $0x44] ss:$8 sps:$4 sm:$0xff]  }
0x25e4   :  { %v3026_v5 = vpop.xlane.xlu1 %3025 }
0x25e5   :  { %v3027_v6 = vmul.f32 0.020833334, %v3026_v5  ;;  %v6840_v5 = vld [vmem:[%s8773_s11 + $0x40] ss:$8 sps:$4 sm:$0xff]  }
0x25e7   :  { %v3028_v7 = vsub.f32 %v3021_v3, %v3027_v6  ;;  %v6837_v3 = vld [vmem:[%s8773_s11 + $0x30] ss:$8 sps:$4 sm:$0xff]  }
0x25e8   :  { %v6843_v6 = vld [vmem:[%s8773_s11 + $0x50] ss:$8 sps:$4 sm:$0xff]  }
0x25e9   :  { %v3029_v8 = vmul.f32 %v3028_v7, %v3028_v7 }
0x25eb   :  { %v3030_v55 = vsel %vm2494_vm14, %v3029_v8, 0.0  ;;  %v6846_v8 = vld [vmem:[%s8773_s11 + $0xe0] ss:$8 sps:$4 sm:$0xff]  }
0x25ec   :  { %3031 = vadd.xlane.f32.xlu0 %v3030_v55  ;;  %v6847_v55 = vld [vmem:[%s8773_s11 + $0x60] ss:$8 sps:$4 sm:$0xff]   ;;  %6337 = vmatprep.subr.bf16.mxu0 %v6846_v8 }
0x2679   :  { %v3032_v14 = vpop.xlane.xlu0 %3031 }
0x267a   :  { %v3033_v15 = vmul.f32 0.020833334, %v3032_v14 }
0x267c   :  { %v3034_v16 = vadd.f32 1e-05, %v3033_v15 }
0x267e   :  { %7079 = vrsqrt.f32 %v3034_v16 }
0x2688   :  { %v7080_v17 = vpop.eup %7079 }
0x2689   :  { %v3036_v19 = vmul.f32 %v7080_v17, %v3028_v7  ;;  %v6845_v7 = vld [vmem:[%s8773_s11 + $0x54] ss:$8 sps:$4 sm:$0xff]   ;;  %v3186_v17 = vld [vmem:[%s8774_s12 + $0x1] ss:$0 sm:$0xff] }
0x268b   :  { %v3037_v21 = vmul.f32 %v3036_v19, %v3022_v18  ;;  %v3187_v19 = vld [vmem:[%s8774_s12 + $0x2] ss:$0 sm:$0xff] }
0x268d   :  { %v3038_v22 = vadd.f32 %v3037_v21, %v3023_v20 }
0x268f   :  { %v3045_v23 = vpack.c.bf16 %v3038_v22, %v3038_v22 }
0x2691   :  { %6533 = vmatmul.mubr.msk.bf16.vlgmr.msra.gmra.mrb[32].mxu0 %vm2448_vm13, %v3045_v23  ;;  %v6850_v23 = vld [vmem:[%s8773_s11 + $0x100] ss:$8 sps:$4 sm:$0xff]  }
0x2692   :  { %6338 = vmatpush3.bf16.msra.mxu0 %v6847_v55 }
0x2693   :  { %6339 = vmatprep.subr.bf16.mxu0 %v6848_v10 }
0x2696   :  { %6340 = vmatpush3.bf16.msra.mxu0 %v6849_v12  ;;  %v6864_v12 = vld [vmem:[%s8773_s11 + $0x164] ss:$8 sps:$4 sm:$0xff]  }
0x2697   :  { %6341 = vmatprep.subr.bf16.mxu0 %v6850_v23 }
0x2764   :  { %v3102_v25 = vpop.f32.mrb[32].mxu0 }
0x2765   :  { %v3103_v26 = vadd.f32 %v3102_v25, %v3046_v24  ;;  %v6534_v27 = vpop.f32.mrb[33].mxu0  ;;  %v6851_v24 = vld [vmem:[%s8773_s11 + $0x80] ss:$8 sps:$4 sm:$0xff]   ;;  %v6852_v25 = vld [vmem:[%s8773_s11 + $0x110] ss:$8 sps:$4 sm:$0xff]  }
0x2766   :  { %v3105_v29 = vpop.f32.mrb[34].mxu0  ;;  %6342 = vmatpush3.bf16.msra.mxu0 %v6851_v24  ;;  %v6854_v27 = vld [vmem:[%s8773_s11 + $0x120] ss:$8 sps:$4 sm:$0xff]  }
0x2767   :  { %v6535_v30 = vpop.f32.mrb[35].mxu0  ;;  %v3110_v28 = vsel %vm1439_vm5, %v3103_v26, 0.0  ;;  %6343 = vmatprep.subr.bf16.mxu0 %v6852_v25  ;;  %v6855_v29 = vld [vmem:[%s8773_s11 + $0xa0] ss:$8 sps:$4 sm:$0xff]   ;;  %v3491_v25 = vld [vmem:[%s8774_s12 + $0x5] ss:$0 sm:$0xff] }
0x2768   :  { %3111 = vadd.xlane.f32.xlu1 %v3110_v28  ;;  %v6856_v30 = vld [vmem:[%s8773_s11 + $0x130] ss:$8 sps:$4 sm:$0xff]  }
0x2769   :  { %v6857_v28 = vld [vmem:[%s8773_s11 + $0xb0] ss:$8 sps:$4 sm:$0xff]  }
0x27f5   :  { %v3112_v31 = vpop.xlane.xlu1 %3111 }
0x27f6   :  { %v3113_v32 = vmul.f32 0.03125, %v3112_v31  ;;  %v6858_v31 = vld [vmem:[%s8773_s11 + $0x140] ss:$8 sps:$4 sm:$0xff]  }
0x27f8   :  { %v3114_v34 = vsub.f32 %v3103_v26, %v3113_v32  ;;  %v6853_v26 = vld [vmem:[%s8773_s11 + $0x90] ss:$8 sps:$4 sm:$0xff]   ;;  %v6859_v32 = vld [vmem:[%s8773_s11 + $0xc0] ss:$8 sps:$4 sm:$0xff]  }
0x27f9   :  { %6344 = vmatpush3.bf16.msra.mxu0 %v6853_v26 }
0x27fa   :  { %v3115_v35 = vmul.f32 %v3114_v34, %v3114_v34  ;;  %6345 = vmatprep.subr.bf16.mxu0 %v6854_v27  ;;  %v3492_v27 = vld [vmem:[%s8774_s12 + $0x6] ss:$0 sm:$0xff] }
0x27fc   :  { %v3116_v33 = vsel %vm1439_vm5, %v3115_v35, 0.0  ;;  %v6861_v35 = vld [vmem:[%s8773_s11 + $0xd0] ss:$8 sps:$4 sm:$0xff]  }
0x27fd   :  { %3117 = vadd.xlane.f32.xlu0 %v3116_v33  ;;  %6346 = vmatpush3.bf16.msra.mxu0 %v6855_v29  ;;  %v8070_v33 = vld [vmem:[#allocation5] sm:$0xff] }
0x27fe   :  { %6347 = vmatprep.subr.bf16.mxu0 %v6856_v30 }
0x2801   :  { %6348 = vmatpush3.bf16.msra.mxu0 %v6857_v28  ;;  %v6875_v28 = vld [vmem:[%s8773_s11 + $0x1a0] ss:$8 sps:$4 sm:$0xff]  }
0x2802   :  { %6349 = vmatprep.subr.bf16.mxu0 %v6858_v31 }
0x2805   :  { %6350 = vmatpush3.bf16.msra.mxu0 %v6859_v32  ;;  %v6876_v32 = vld [vmem:[%s8773_s11 + $0x230] ss:$8 sps:$4 sm:$0xff]  }
0x288a   :  { %v3118_v39 = vpop.xlane.xlu0 %3117 }
0x288b   :  { %v3119_v40 = vmul.f32 0.03125, %v3118_v39  ;;  %v3222_v39 = vrot.slane %v5810_v36, %v7323_v0  ;;  %v6879_v36 = vld [vmem:[%s8773_s11 + $0x1c0] ss:$8 sps:$4 sm:$0xff]  }
0x288d   :  { %v3120_v41 = vadd.f32 1e-05, %v3119_v40 }
0x288f   :  { %7081 = vrsqrt.f32 %v3120_v41 }
0x2899   :  { %v7082_v42 = vpop.eup %7081 }
0x289a   :  { %v3122_v44 = vmul.f32 %v7082_v42, %v3114_v34  ;;  %v6860_v34 = vld [vmem:[%s8773_s11 + $0x150] ss:$8 sps:$4 sm:$0xff]  }
0x289b   :  { %6351 = vmatprep.subr.bf16.mxu0 %v6860_v34  ;;  %v6877_v34 = vld [vmem:[%s8773_s11 + $0x1b0] ss:$8 sps:$4 sm:$0xff]  }
0x289c   :  { %v3123_v46 = vmul.f32 %v3122_v44, %v3108_v43  ;;  %6352 = vmatpush3.bf16.msra.mxu0 %v6861_v35  ;;  %v6878_v35 = vld [vmem:[%s8773_s11 + $0x240] ss:$8 sps:$4 sm:$0xff]  }
0x289d   :  { %6544 = vmatprep.subr.bf16.mxu0 %v8070_v33 }
0x289e   :  { %v3124_v47 = vadd.f32 %v3123_v46, %v3109_v45 }
0x28a0   :  { %v3129_v48 = vpack.c.bf16 %v3124_v47, %v3124_v47 }
0x28a2   :  { %6541 = vmatmul.mubr.msk.bf16.vlgmr.msra.gmra.mrb[48].mxu1 %vm1481_vm6, %v3129_v48 }
0x28a3   :  { %3300 = vmatprep.mubr.bf16.mxu1 %v7195_v62  ;;  %3269 = vmatpush1.bf16.msra.mxu1 %v6834_v2 }
0x28a4   :  { %3270 = vmatprep.subr.bf16.mxu1 %v6839_v9 }
0x28a7   :  { %3271 = vmatpush1.bf16.msra.mxu1 %v6837_v3 }
0x28a8   :  { %3272 = vmatprep.subr.bf16.mxu1 %v6842_v4 }
0x28ab   :  { %3273 = vmatpush1.bf16.msra.mxu1 %v6840_v5 }
0x28ac   :  { %3274 = vmatprep.subr.bf16.mxu1 %v6845_v7 }
0x28af   :  { %3275 = vmatpush1.bf16.msra.mxu1 %v6843_v6 }
0x28b0   :  { %3573 = vmatprep.subr.bf16.mxu1 %v6864_v12 }
0x2975   :  { %v3180_v49 = vpop.f32.mrb[48].mxu1 }
0x2976   :  { %v3181_v50 = vadd.f32 %v3180_v49, %v3130_v11  ;;  %v6542_v51 = vpop.f32.mrb[49].mxu1 }
0x2977   :  { %v3183_v52 = vpop.f32.mrb[50].mxu1 }
0x2978   :  { %v6543_v54 = vpop.f32.mrb[51].mxu1  ;;  %v3188_v56 = vsel %vm429_vm4, %v3181_v50, 0.0 }
0x2979   :  { %3189 = vadd.xlane.f32.xlu1 %v3188_v56 }
0x2a06   :  { %v3190_v57 = vpop.xlane.xlu1 %3189 }
0x2a07   :  { %v3191_v58 = vmul.f32 0.015625, %v3190_v57 }
0x2a09   :  { %v3192_v59 = vsub.f32 %v3181_v50, %v3191_v58 }
0x2a0b   :  { %v3193_v60 = vmul.f32 %v3192_v59, %v3192_v59 }
0x2a0d   :  { %v3194_v61 = vsel %vm429_vm4, %v3193_v60, 0.0  ;;  %v3353_v60 = vld [vmem:[%s8774_s12 + $0x4] ss:$0 sm:$0xff] }
0x2a0e   :  { %3195 = vadd.xlane.f32.xlu0 %v3194_v61 }
0x2a9b   :  { %v3196_v13 = vpop.xlane.xlu0 %3195 }
0x2a9c   :  { %v3197_v14 = vmul.f32 0.015625, %v3196_v13  ;;  %v6862_v13 = vld [vmem:[%s8773_s11 + $0x160] ss:$8 sps:$4 sm:$0xff]  }
0x2a9e   :  { %v3198_v15 = vadd.f32 1e-05, %v3197_v14  ;;  %v6867_v14 = vld [vmem:[%s8773_s11 + $0x174] ss:$8 sps:$4 sm:$0xff]  }
0x2aa0   :  { %7083 = vrsqrt.f32 %v3198_v15  ;;  %v6865_v15 = vld [vmem:[%s8773_s11 + $0x170] ss:$8 sps:$4 sm:$0xff]  }
0x2aaa   :  { %v7084_v16 = vpop.eup %7083 }
0x2aab   :  { %v3200_v18 = vmul.f32 %v7084_v16, %v3192_v59  ;;  %v6870_v16 = vld [vmem:[%s8773_s11 + $0x184] ss:$8 sps:$4 sm:$0xff]  }
0x2aad   :  { %v3201_v20 = vmul.f32 %v3200_v18, %v3186_v17  ;;  %v6868_v17 = vld [vmem:[%s8773_s11 + $0x180] ss:$8 sps:$4 sm:$0xff]   ;;  %v6871_v18 = vld [vmem:[%s8773_s11 + $0x190] ss:$8 sps:$4 sm:$0xff]  }
0x2aaf   :  { %v8028_v21 = vadd.f32 %v3201_v20, %v3187_v19  ;;  %v6873_v19 = vld [vmem:[%s8773_s11 + $0x194] ss:$8 sps:$4 sm:$0xff]   ;;  %v6874_v20 = vld [vmem:[%s8773_s11 + $0x220] ss:$8 sps:$4 sm:$0xff]  }
0x2ab1   :  { %v3211_v22 = vpack.c.bf16 %v8028_v21, %v8028_v21 }
0x2ab3   :  { %5819 = vmatmul.mubr.msk.bf16.vlgmr.msra.gmra.mrb[52].mxu1 %vm65_vm0, %v3211_v22 }
0x2ab4   :  { %3605 = vmatprep.mubr.bf16.mxu1 %v7195_v62  ;;  %3574 = vmatpush1.bf16.msra.mxu1 %v6862_v13 }
0x2ab5   :  { %3575 = vmatprep.subr.bf16.mxu1 %v6867_v14 }
0x2ab8   :  { %3576 = vmatpush1.bf16.msra.mxu1 %v6865_v15 }
0x2ab9   :  { %3577 = vmatprep.subr.bf16.mxu1 %v6870_v16 }
0x2abc   :  { %3578 = vmatpush1.bf16.msra.mxu1 %v6868_v17 }
0x2abd   :  { %3579 = vmatprep.subr.bf16.mxu1 %v6873_v19  ;;  %v5868_v19 = vld [vmem:[%s8769_s7 + $0x2] sm:$0x3] }
0x2ac0   :  { %3580 = vmatpush1.bf16.msra.mxu1 %v6871_v18  ;;  %v5867_v18 = vld [vmem:[%s8768_s6 + $0x2] sm:$0x3] }
0x2ac1   :  { %6359 = vmatprep.subr.bf16.mxu1 %v6874_v20  ;;  %v3922_v20 = vrot.slane %v5867_v18, %v7321_v63 }
0x2b86   :  { %v3302_v40 = vpop.f32.mrb[52].mxu1 }
0x2b87   :  { %v3303_v41 = vadd.f32 %v3302_v40, %v3218_v38  ;;  %v3304_v42 = vpop.f32.mrb[53].mxu1  ;;  %v6880_v38 = vld [vmem:[%s8773_s11 + $0x250] ss:$8 sps:$4 sm:$0xff]   ;;  %v6882_v40 = vld [vmem:[%s8773_s11 + $0x260] ss:$8 sps:$4 sm:$0xff]  }
0x2b88   :  { %v3305_v43 = vadd.f32 %v3304_v42, %v3222_v39  ;;  %v3306_v44 = vpop.f32.mrb[54].mxu1  ;;  %v6881_v39 = vld [vmem:[%s8773_s11 + $0x1d0] ss:$8 sps:$4 sm:$0xff]  }
0x2b89   :  { %v3311_v45 = vmul.f32 0.70710677, %v3303_v41  ;;  %v3307_v46 = vpop.f32.mrb[55].mxu1  ;;  %v3309_v49 = vmul.f32 0.5, %v3303_v41  ;;  %v6883_v41 = vld [vmem:[%s8773_s11 + $0x1e0] ss:$8 sps:$4 sm:$0xff]  }
0x2b8a   :  { %v3312_v47 = vmul.f32 0.70710677, %v3305_v43  ;;  %v3310_v51 = vmul.f32 0.5, %v3305_v43  ;;  %v6884_v42 = vld [vmem:[%s8773_s11 + $0x270] ss:$8 sps:$4 sm:$0xff]  }
0x2b8b   :  { %7085 = verf.f32 %v3311_v45  ;;  %v6885_v43 = vld [vmem:[%s8773_s11 + $0x1f0] ss:$8 sps:$4 sm:$0xff]   ;;  %v6886_v44 = vld [vmem:[%s8773_s11 + $0x280] ss:$8 sps:$4 sm:$0xff]  }
0x2b8c   :  { %7087 = verf.f32 %v3312_v47  ;;  %v6887_v45 = vld [vmem:[%s8773_s11 + $0x200] ss:$8 sps:$4 sm:$0xff]   ;;  %v6888_v46 = vld [vmem:[%s8773_s11 + $0x290] ss:$8 sps:$4 sm:$0xff]  }
0x2b8d   :  { %v6889_v47 = vld [vmem:[%s8773_s11 + $0x210] ss:$8 sps:$4 sm:$0xff]  }
0x2b95   :  { %v7086_v48 = vpop.eup %7085 }
0x2b96   :  { %v7088_v11 = vpop.eup %7087  ;;  %v3315_v50 = vadd.f32 1.0, %v7086_v48  ;;  %v5836_v48 = vld [vmem:[%s8774_s12 + $0x7] ss:$8 sm:$0x3] }
0x2b97   :  { %v3316_v52 = vadd.f32 1.0, %v7088_v11  ;;  %v3523_v11 = vrot.slane %v5836_v48, %v7321_v63 }
0x2b98   :  { %v3317_v54 = vmul.f32 %v3315_v50, %v3309_v49  ;;  %v3527_v49 = vrot.slane %v5836_v48, %v7323_v0 }
0x2b99   :  { %v3318_v56 = vmul.f32 %v3316_v52, %v3310_v51 }
0x2b9a   :  { %v3351_v58 = vpack.c.bf16 %v3317_v54, %v3317_v54 }
0x2b9b   :  { %v3352_v57 = vpack.c.bf16 %v3318_v56, %v3318_v56 }
0x2b9d   :  { %3482 = vmatprep.mubr.bf16.mxu0 %v3352_v57 }
0x2b9e   :  { %3483 = vmatmul.mubr.bf16.vlgmr.msra.gmra.mrb[36].mxu0 %v3351_v58 }
0x2b9f   :  { %6552 = vmatprep.mubr.msk.bf16.mxu0 %vm7197_vm3, %v8070_v33 }
0x2c71   :  { %v6353_v59 = vpop.f32.mrb[36].mxu0 }
0x2c72   :  { %v6354_v61 = vpop.f32.mrb[37].mxu0 }
0x2c73   :  { %v6355_v1 = vadd.f32 %v6354_v61, %v6353_v59  ;;  %v6356_v2 = vpop.f32.mrb[38].mxu0 }
0x2c74   :  { %v6357_v9 = vpop.f32.mrb[39].mxu0 }
0x2c75   :  { %v3485_v3 = vadd.f32 %v6355_v1, %v3353_v60 }
0x2c77   :  { %v3490_v4 = vadd.f32 %v3485_v3, %v8028_v21 }
0x2c79   :  { %v3493_v5 = vsel %vm429_vm4, %v3490_v4, 0.0 }
0x2c7a   :  { %3494 = vadd.xlane.f32.xlu1 %v3493_v5 }
0x2d07   :  { %v3495_v6 = vpop.xlane.xlu1 %3494 }
0x2d08   :  { %v3496_v7 = vmul.f32 0.015625, %v3495_v6 }
0x2d0a   :  { %v3497_v8 = vsub.f32 %v3490_v4, %v3496_v7 }
0x2d0c   :  { %v3498_v55 = vmul.f32 %v3497_v8, %v3497_v8 }
0x2d0e   :  { %v3499_v10 = vsel %vm429_vm4, %v3498_v55, 0.0  ;;  %v3658_v55 = vld [vmem:[%s8774_s12 + $0x10] ss:$0 sm:$0xff] }
0x2d0f   :  { %3500 = vadd.xlane.f32.xlu0 %v3499_v10 }
0x2d9c   :  { %v3501_v21 = vpop.xlane.xlu0 %3500 }
0x2d9d   :  { %v3502_v22 = vmul.f32 0.015625, %v3501_v21  ;;  %v3942_v21 = vrot.slane %v5868_v19, %v7321_v63 }
0x2d9f   :  { %v3503_v23 = vadd.f32 1e-05, %v3502_v22  ;;  %v3949_v22 = vrot.slane %v5868_v19, %v7323_v0 }
0x2da1   :  { %7089 = vrsqrt.f32 %v3503_v23 }
0x2dab   :  { %v7090_v24 = vpop.eup %7089 }
0x2dac   :  { %v3505_v26 = vmul.f32 %v7090_v24, %v3497_v8 }
0x2dae   :  { %v3506_v29 = vmul.f32 %v3505_v26, %v3491_v25 }
0x2db0   :  { %v8119_v30 = vadd.f32 %v3506_v29, %v3492_v27  ;;  %v3929_v29 = vrot.slane %v5867_v18, %v7323_v0 }
0x2db2   :  { %v3516_v31 = vpack.c.bf16 %v8119_v30, %v8119_v30 }
0x2db4   :  { %5845 = vmatmul.mubr.msk.bf16.vlgmr.msra.gmra.mrb[56].mxu1 %vm65_vm0, %v3516_v31  ;;  %v6892_v31 = vld [vmem:[%s8773_s11 + $0x2c0] ss:$8 sps:$4 sm:$0xff]  }
0x2db5   :  { %6360 = vmatpush3.bf16.msra.mxu1 %v6875_v28  ;;  %v6891_v28 = vld [vmem:[%s8773_s11 + $0x2b0] ss:$8 sps:$4 sm:$0xff]  }
0x2db6   :  { %6361 = vmatprep.subr.bf16.mxu1 %v6876_v32  ;;  %v6893_v32 = vld [vmem:[%s8773_s11 + $0x2d0] ss:$8 sps:$4 sm:$0xff]  }
0x2db9   :  { %6362 = vmatpush3.bf16.msra.mxu1 %v6877_v34  ;;  %v3969_v34 = vsel %vm2307_vm7, %v5868_v19, 0.0 }
0x2dba   :  { %6363 = vmatprep.subr.bf16.mxu1 %v6878_v35 }
0x2dbd   :  { %6364 = vmatpush3.bf16.msra.mxu1 %v6879_v36 }
0x2dbe   :  { %6365 = vmatprep.subr.bf16.mxu1 %v6880_v38 }
0x2dc1   :  { %6366 = vmatpush3.bf16.msra.mxu1 %v6881_v39 }
0x2dc2   :  { %6367 = vmatprep.subr.bf16.mxu1 %v6882_v40 }
0x2dc5   :  { %6368 = vmatpush3.bf16.msra.mxu1 %v6883_v41 }
0x2dc6   :  { %6369 = vmatprep.subr.bf16.mxu1 %v6884_v42 }
0x2dc9   :  { %6370 = vmatpush3.bf16.msra.mxu1 %v6885_v43 }
0x2dca   :  { %6371 = vmatprep.subr.bf16.mxu1 %v6886_v44 }
0x2dcd   :  { %6372 = vmatpush3.bf16.msra.mxu1 %v6887_v45 }
0x2dce   :  { %6373 = vmatprep.subr.bf16.mxu1 %v6888_v46 }
0x2dd1   :  { %6374 = vmatpush3.bf16.msra.mxu1 %v6889_v47 }
0x2dd2   :  { %6574 = vmatprep.subr.bf16.mxu1 %v8070_v33 }
0x2e87   :  { %v3607_v50 = vpop.f32.mrb[56].mxu1 }
0x2e88   :  { %v3608_v51 = vadd.f32 %v3607_v50, %v3523_v11  ;;  %v3609_v52 = vpop.f32.mrb[57].mxu1 }
0x2e89   :  { %v3610_v54 = vadd.f32 %v3609_v52, %v3527_v49  ;;  %v3611_v56 = vpop.f32.mrb[58].mxu1 }
0x2e8a   :  { %v3616_v57 = vmul.f32 0.70710677, %v3608_v51  ;;  %v3612_v58 = vpop.f32.mrb[59].mxu1  ;;  %v3614_v1 = vmul.f32 0.5, %v3608_v51  ;;  %v3796_v51 = vld [vmem:[%s8774_s12 + $0x11] ss:$0 sm:$0xff] }
0x2e8b   :  { %v3617_v59 = vmul.f32 0.70710677, %v3610_v54  ;;  %v3615_v9 = vmul.f32 0.5, %v3610_v54 }
0x2e8c   :  { %7091 = verf.f32 %v3616_v57 }
0x2e8d   :  { %7093 = verf.f32 %v3617_v59  ;;  %v6894_v59 = vld [vmem:[%s8770_s8 + $0x34] sm:$0xff]  }
0x2e96   :  { %v7092_v60 = vpop.eup %7091 }
0x2e97   :  { %v7094_v61 = vpop.eup %7093  ;;  %v3620_v2 = vadd.f32 1.0, %v7092_v60 }
0x2e98   :  { %v3621_v3 = vadd.f32 1.0, %v7094_v61 }
0x2e99   :  { %v3622_v4 = vmul.f32 %v3620_v2, %v3614_v1  ;;  %v6895_v2 = vld [vmem:[%s8770_s8 + $0x3c] sm:$0xff]  }
0x2e9a   :  { %v3623_v5 = vmul.f32 %v3621_v3, %v3615_v9 }
0x2e9b   :  { %v3656_v7 = vpack.c.bf16 %v3622_v4, %v3622_v4  ;;  %v6896_v4 = vld [vmem:[%s8770_s8 + $0x44] sm:$0xff]  }
0x2e9c   :  { %v3657_v6 = vpack.c.bf16 %v3623_v5, %v3623_v5 }
0x2e9e   :  { %3787 = vmatprep.mubr.bf16.mxu1 %v3657_v6 }
0x2e9f   :  { %3788 = vmatmul.mubr.bf16.vlgmr.msra.gmra.mrb[60].mxu1 %v3656_v7  ;;  %v6897_v7 = vld [vmem:[%s8770_s8 + $0x4c] sm:$0xff]  }
0x2ea0   :  { %6580 = vmatprep.mubr.msk.bf16.mxu1 %vm7197_vm3, %v8070_v33 }
0x2f72   :  { %v6375_v8 = vpop.f32.mrb[60].mxu1 }
0x2f73   :  { %v6376_v10 = vpop.f32.mrb[61].mxu1 }
0x2f74   :  { %v6377_v12 = vadd.f32 %v6376_v10, %v6375_v8  ;;  %v6378_v13 = vpop.f32.mrb[62].mxu1  ;;  %v6898_v10 = vld [vmem:[%s8770_s8 + $0x54] sm:$0xff]  }
0x2f75   :  { %v6379_v14 = vpop.f32.mrb[63].mxu1 }
0x2f76   :  { %v3790_v15 = vadd.f32 %v6377_v12, %v3658_v55  ;;  %v6899_v14 = vld [vmem:[%s8770_s8 + $0x5c] sm:$0xff]  }
0x2f78   :  { %v3795_v16 = vadd.f32 %v3790_v15, %v8119_v30  ;;  %v6890_v30 = vld [vmem:[%s8773_s11 + $0x2a0] ss:$8 sps:$4 sm:$0xff]   ;;  %v6900_v15 = vld [vmem:[%s8770_s8 + $0x64] ss:$0 sps:$4 sm:$0x33]  }
0x2f79   :  { %6545 = vmatpush3.bf16.msra.mxu0 %v6890_v30  ;;  %v4038_v18 = vsel %vm2376_vm11, %v6900_v15, 0  ;;  %v6922_v15 = vld [vmem:[%s8771_s9 + $0x330] ss:$8 sps:$4 sm:$0xff]  }
0x2f7a   :  { %v3798_v17 = vsel %vm429_vm4, %v3795_v16, 0.0  ;;  %6546 = vmatprep.subr.bf16.mxu0 %v8070_v33 }
0x2f7b   :  { %3799 = vadd.xlane.f32.xlu1 %v3798_v17 }
0x2f7d   :  { %6547 = vmatpush3.bf16.msra.mxu0 %v6891_v28 }
0x2f7e   :  { %6548 = vmatprep.subr.bf16.mxu0 %v8070_v33 }
0x2f81   :  { %6549 = vmatpush3.bf16.msra.mxu0 %v6892_v31 }
0x2f82   :  { %6550 = vmatprep.subr.bf16.mxu0 %v8070_v33 }
0x2f85   :  { %6551 = vmatpush3.bf16.msra.mxu0 %v6893_v32 }
0x2f86   :  { %6556 = vmatprep.subr.bf16.mxu0 %v8070_v33 }
0x2f8c   :  { %3924 = vbcast.lane.b32.xlu1 %v3922_v20, 256 }
0x2f90   :  { %3944 = vbcast.lane.b32.xlu1 %v3942_v21, 256  ;;  %v6901_v21 = vld [vmem:[%s8771_s9 + $0x240] ss:$8 sps:$4 sm:$0xff]  }
0x2f91   :  { %6575 = vmatpush3.bf16.msra.mxu1 %v6901_v21 }
0x2f92   :  { %6576 = vmatprep.subr.bf16.mxu1 %v8070_v33 }
0x2f94   :  { %3951 = vbcast.lane.b32.xlu1 %v3949_v22, 256  ;;  %v6902_v22 = vld [vmem:[%s8771_s9 + $0x250] ss:$8 sps:$4 sm:$0xff]  }
0x2f95   :  { %6577 = vmatpush3.bf16.msra.mxu1 %v6902_v22 }
0x2f96   :  { %6578 = vmatprep.subr.bf16.mxu1 %v8070_v33 }
0x3008   :  { %v3800_v23 = vpop.xlane.xlu1 %3799 }
0x3009   :  { %v3801_v24 = vmul.f32 0.015625, %v3800_v23  ;;  %v6903_v23 = vld [vmem:[%s8771_s9 + $0x260] ss:$8 sps:$4 sm:$0xff]  }
0x300a   :  { %6579 = vmatpush3.bf16.msra.mxu1 %v6903_v23 }
0x300b   :  { %v3802_v25 = vsub.f32 %v3795_v16, %v3801_v24 }
0x300c   :  { %v3925_v35 = vpop.permute.xlu1 %3924 }
0x300d   :  { %v3803_v26 = vmul.f32 %v3802_v25, %v3802_v25  ;;  %vm3933_vm15 = vcmp.eq.s32.totalorder %v7309_v53, %v3925_v35 }
0x300e   :  { %v5869_v42 = vsel %vm3933_vm15, 1.0, %v8070_v33 }
0x300f   :  { %v3804_v27 = vsel %vm429_vm4, %v3803_v26, 0.0 }
0x3010   :  { %3805 = vadd.xlane.f32.xlu0 %v3804_v27  ;;  %v3945_v36 = vpop.permute.xlu1 %3944 }
0x3011   :  { %v3953_v45 = vmul.f32 %v5869_v42, %v3945_v36 }
0x3013   :  { %v3955_v47 = vsel %vm2292_vm10, %v3953_v45, 0.0 }
0x3014   :  { %v3952_v43 = vpop.permute.xlu1 %3951  ;;  %v3956_v49 = vrot.slane %v3955_v47, 4 }
0x3016   :  { %v3957_v56 = vadd.f32 %v3956_v49, %v3955_v47 }
0x3018   :  { %v3958_v61 = vrot.slane %v3957_v56, 2 }
0x301a   :  { %v3959_v9 = vadd.f32 %v3958_v61, %v3957_v56  ;;  %v6912_v56 = vld [vmem:[%s8771_s9 + $0x294] ss:$8 sps:$4 sm:$0xff]   ;;  %v6917_v61 = vld [vmem:[%s8771_s9 + $0x2e0] ss:$8 sps:$4 sm:$0xff]  }
0x301c   :  { %v3960_v5 = vrot.slane %v3959_v9, 1 }
0x301e   :  { %v3961_v8 = vadd.f32 %v3960_v5, %v3959_v9  ;;  %v5903_v5 = vld [vmem:[%s8772_s10 + $0x21] ss:$0 sm:$0xff] }
0x3020   :  { %v3987_v12 = vpack.c.bf16 %v3961_v8, %v3961_v8 }
0x3022   :  { %v3991_v16 = vunpack.c.l.b16 %v3987_v12  ;;  %v6919_v12 = vld [vmem:[%s8771_s9 + $0x300] ss:$8 sps:$4 sm:$0xff]  }
0x3026   :  { %3931 = vbcast.lane.b32.xlu0 %v3929_v29, 256 }
0x3045   :  { %3970 = vadd.xlane.f32.xlu0 %v3969_v34 }
0x309d   :  { %v3806_v38 = vpop.xlane.xlu0 %3805 }
0x309e   :  { %v3807_v39 = vmul.f32 0.015625, %v3806_v38 }
0x30a0   :  { %v3808_v40 = vadd.f32 1e-05, %v3807_v39  ;;  %v5898_v39 = vld [vmem:[%s8772_s10 + $0x20] ss:$0 sm:$0xff] }
0x30a1   :  { %v3932_v41 = vpop.permute.xlu0 %3931 }
0x30a2   :  { %7095 = vrsqrt.f32 %v3808_v40  ;;  %vm3934_vm2 = vcmp.eq.s32.totalorder %v7309_v53, %v3932_v41  ;;  %v3797_v53 = vld [vmem:[%s8774_s12 + $0x12] ss:$0 sm:$0xff] }
0x30a3   :  { %v5870_v44 = vsel %vm3934_vm2, 1.0, %v8070_v33 }
0x30a4   :  { %v3954_v46 = vmul.f32 %v5870_v44, %v3952_v43 }
0x30a6   :  { %v3962_v48 = vsel %vm2292_vm10, %v3954_v46, 0.0 }
0x30a7   :  { %v3963_v50 = vrot.slane %v3962_v48, 4 }
0x30a9   :  { %v3964_v57 = vadd.f32 %v3963_v50, %v3962_v48  ;;  %v6906_v50 = vld [vmem:[%s8771_s9 + $0x274] ss:$8 sps:$4 sm:$0xff]  }
0x30aa   :  { %4223 = vmatprep.subr.bf16.mxu1 %v6906_v50 }
0x30ab   :  { %v3965_v1 = vrot.slane %v3964_v57, 2 }
0x30ac   :  { %v7096_v11 = vpop.eup %7095 }
0x30ad   :  { %v3810_v52 = vmul.f32 %v7096_v11, %v3802_v25  ;;  %v3966_v3 = vadd.f32 %v3965_v1, %v3964_v57  ;;  %v6913_v57 = vld [vmem:[%s8771_s9 + $0x2a0] ss:$8 sps:$4 sm:$0xff]   ;;  %v6918_v1 = vld [vmem:[%s8771_s9 + $0x2f0] ss:$8 sps:$4 sm:$0xff]  }
0x30af   :  { %v3811_v54 = vmul.f32 %v3810_v52, %v3796_v51  ;;  %v3967_v6 = vrot.slane %v3966_v3, 1  ;;  %v6904_v51 = vld [vmem:[%s8771_s9 + $0x270] ss:$8 sps:$4 sm:$0xff]   ;;  %v6909_v52 = vld [vmem:[%s8771_s9 + $0x284] ss:$8 sps:$4 sm:$0xff]  }
0x30b1   :  { %v3812_v58 = vadd.f32 %v3811_v54, %v3797_v53  ;;  %v3968_v55 = vadd.f32 %v3967_v6, %v3966_v3  ;;  %v6907_v53 = vld [vmem:[%s8771_s9 + $0x280] ss:$8 sps:$4 sm:$0xff]   ;;  %v6910_v54 = vld [vmem:[%s8771_s9 + $0x290] ss:$8 sps:$4 sm:$0xff]  }
0x30b3   :  { %v3821_v60 = vpack.c.bf16 %v3812_v58, %v3812_v58  ;;  %v3988_v13 = vpack.c.bf16 %v3968_v55, %v3968_v55  ;;  %v6914_v58 = vld [vmem:[%s8771_s9 + $0x2b0] ss:$8 sps:$4 sm:$0xff]  }
0x30b5   :  { %6553 = vmatmul.mubr.msk.bf16.vlgmr.msra.gmra.mrb[40].mxu0 %vm65_vm0, %v3821_v60  ;;  %v3992_v17 = vunpack.c.l.b16 %v3988_v13  ;;  %v6916_v60 = vld [vmem:[%s8771_s9 + $0x2d0] ss:$8 sps:$4 sm:$0xff]  }
0x30b6   :  { %6557 = vmatpush3.bf16.msra.mxu0 %v6894_v59  ;;  %6570 = vmatprep.mubr.msk.bf16.mxu0 %vm7197_vm3, %v8070_v33  ;;  %v6915_v59 = vld [vmem:[%s8771_s9 + $0x2c0] ss:$8 sps:$4 sm:$0xff]   ;;  %v6920_v13 = vld [vmem:[%s8771_s9 + $0x310] ss:$8 sps:$4 sm:$0xff]  }
0x30b7   :  { %6558 = vmatprep.subr.bf16.mxu0 %v8070_v33  ;;  %v3993_v19 = vsel %vm146_vm1, %v3992_v17, %v3991_v16  ;;  %v6923_v16 = vld [vmem:[%s8771_s9 + $0x340] ss:$8 sps:$4 sm:$0xff]   ;;  %v6924_v17 = vld [vmem:[%s8771_s9 + $0x350] ss:$8 sps:$4 sm:$0xff]  }
0x30b8   :  { %v3994_v20 = vpack.c.b16 %v3993_v19, %v3993_v19 }
0x30ba   :  { %6559 = vmatpush3.bf16.msra.mxu0 %v6895_v2 }
0x30bb   :  { %6560 = vmatprep.subr.bf16.mxu0 %v8070_v33 }
0x30be   :  { %6561 = vmatpush3.bf16.msra.mxu0 %v6896_v4 }
0x30bf   :  { %6562 = vmatprep.subr.bf16.mxu0 %v8070_v33 }
0x30c2   :  { %6563 = vmatpush3.bf16.msra.mxu0 %v6897_v7  ;;  %v5904_v7 = vld [vmem:[%s8772_s10 + $0x22] ss:$0 sm:$0xff] }
0x30c3   :  { %6564 = vmatprep.subr.bf16.mxu0 %v8070_v33 }
0x30c6   :  { %6565 = vmatpush3.bf16.msra.mxu0 %v6898_v10 }
0x30c7   :  { %6566 = vmatprep.subr.bf16.mxu0 %v8070_v33 }
0x30ca   :  { %6567 = vmatpush3.bf16.msra.mxu0 %v6899_v14  ;;  %v6921_v14 = vld [vmem:[%s8771_s9 + $0x320] ss:$8 sps:$4 sm:$0xff]  }
0x30cb   :  { %6568 = vmatprep.subr.bf16.mxu0 %v8070_v33 }
0x30ce   :  { %6569 = vmatpush3.bf16.msra.mxu0 %v4038_v18  ;;  %v5911_v18 = vld [vmem:[%s8772_s10 + $0x23] ss:$8 sm:$0x3] }
0x30cf   :  { %4376 = vmatprep.subr.bf16.mxu0 %v7195_v62  ;;  %v4183_v19 = vrot.slane %v5911_v18, %v7321_v63 }
0x30d1   :  { %6571 = vmatmul.mubr.msk.bf16.vlgmr.msra.gmra.mrb[44].mxu0 %vm2372_vm12, %v3994_v20  ;;  %v4187_v20 = vrot.slane %v5911_v18, %v7323_v0  ;;  %v6942_v18 = vld [vmem:[%s8771_s9 + $0x410] ss:$8 sps:$4 sm:$0xff]  }
0x30d2   :  { %v3971_v29 = vpop.xlane.xlu0 %3970  ;;  %4377 = vmatpush1.bf16.msra.mxu0 %v6913_v57  ;;  %v6930_v57 = vld [vmem:[%s8771_s9 + $0x374] ss:$8 sps:$4 sm:$0xff]  }
0x30d3   :  { %v3972_v30 = vmax.f32 %v3971_v29, 1.0  ;;  %4378 = vmatprep.subr.bf16.mxu0 %v7195_v62 }
0x30d5   :  { %7097 = vrcp.f32 %v3972_v30 }
0x30d6   :  { %4379 = vmatpush1.bf16.msra.mxu0 %v6914_v58  ;;  %v6928_v58 = vld [vmem:[%s8771_s9 + $0x370] ss:$8 sps:$4 sm:$0xff]  }
0x30d7   :  { %4380 = vmatprep.subr.bf16.mxu0 %v7195_v62 }
0x30da   :  { %4381 = vmatpush1.bf16.msra.mxu0 %v6915_v59  ;;  %v6931_v59 = vld [vmem:[%s8771_s9 + $0x380] ss:$8 sps:$4 sm:$0xff]  }
0x30db   :  { %4382 = vmatprep.subr.bf16.mxu0 %v7195_v62 }
0x30de   :  { %4383 = vmatpush1.bf16.msra.mxu0 %v6916_v60  ;;  %v6933_v60 = vld [vmem:[%s8771_s9 + $0x384] ss:$8 sps:$4 sm:$0xff]  }
0x30df   :  { %v7098_v28 = vpop.eup %7097  ;;  %4384 = vmatprep.subr.bf16.mxu0 %v7195_v62 }
0x30e2   :  { %4385 = vmatpush1.bf16.msra.mxu0 %v6917_v61 }
0x30e3   :  { %4386 = vmatprep.subr.bf16.mxu0 %v7195_v62 }
0x30e6   :  { %4387 = vmatpush1.bf16.msra.mxu0 %v6918_v1 }
0x30e7   :  { %4388 = vmatprep.subr.bf16.mxu0 %v7195_v62 }
0x30ea   :  { %4389 = vmatpush1.bf16.msra.mxu0 %v6919_v12  ;;  %v6936_v12 = vld [vmem:[%s8771_s9 + $0x3b0] ss:$8 sps:$4 sm:$0xff]  }
0x30eb   :  { %4390 = vmatprep.subr.bf16.mxu0 %v7195_v62 }
0x30ee   :  { %4391 = vmatpush1.bf16.msra.mxu0 %v6920_v13  ;;  %v6937_v13 = vld [vmem:[%s8771_s9 + $0x3c0] ss:$8 sps:$4 sm:$0xff]  }
0x30ef   :  { %4392 = vmatprep.subr.bf16.mxu0 %v7195_v62 }
0x30f2   :  { %4393 = vmatpush1.bf16.msra.mxu0 %v6921_v14  ;;  %v6938_v14 = vld [vmem:[%s8771_s9 + $0x3d0] ss:$8 sps:$4 sm:$0xff]  }
0x30f3   :  { %4394 = vmatprep.subr.bf16.mxu0 %v7195_v62 }
0x30f6   :  { %4395 = vmatpush1.bf16.msra.mxu0 %v6922_v15  ;;  %v6939_v15 = vld [vmem:[%s8771_s9 + $0x3e0] ss:$8 sps:$4 sm:$0xff]  }
0x30f7   :  { %4396 = vmatprep.subr.bf16.mxu0 %v7195_v62 }
0x30fa   :  { %4397 = vmatpush1.bf16.msra.mxu0 %v6923_v16  ;;  %v6940_v16 = vld [vmem:[%s8771_s9 + $0x3f0] ss:$8 sps:$4 sm:$0xff]  }
0x30fb   :  { %4398 = vmatprep.subr.bf16.mxu0 %v7195_v62 }
0x30fe   :  { %4399 = vmatpush1.bf16.msra.mxu0 %v6924_v17  ;;  %v6941_v17 = vld [vmem:[%s8771_s9 + $0x400] ss:$8 sps:$4 sm:$0xff]  }
0x30ff   :  { %6584 = vmatprep.subr.bf16.mxu0 %v8070_v33 }
0x3188   :  { %v8267_v24 = vpop.f32.mrb[40].mxu0 }
0x3189   :  { %v6554_v25 = vpop.f32.mrb[41].mxu0 }
0x318a   :  { %v3887_v26 = vpop.f32.mrb[42].mxu0 }
0x318b   :  { %v6555_v27 = vpop.f32.mrb[43].mxu0 }
0x31a4   :  { %v4074_v31 = vpop.f32.mrb[44].mxu0 }
0x31a5   :  { %v4081_v32 = vmul.f32 %v7098_v28, %v4074_v31  ;;  %v6572_v34 = vpop.f32.mrb[45].mxu0 }
0x31a6   :  { %v4077_v35 = vpop.f32.mrb[46].mxu0 }
0x31a7   :  { %v4089_v36 = vpack.c.bf16 %v4081_v32, %v4081_v32  ;;  %v6573_v38 = vpop.f32.mrb[47].mxu0 }
0x31a9   :  { %6581 = vmatmul.mubr.msk.bf16.vlgmr.msra.gmra.mrb[64].mxu1 %vm2448_vm13, %v4089_v36 }
0x31aa   :  { %4255 = vmatprep.mubr.bf16.mxu1 %v7195_v62  ;;  %4224 = vmatpush1.bf16.msra.mxu1 %v6904_v51 }
0x31ab   :  { %4225 = vmatprep.subr.bf16.mxu1 %v6909_v52 }
0x31ae   :  { %4226 = vmatpush1.bf16.msra.mxu1 %v6907_v53 }
0x31af   :  { %4227 = vmatprep.subr.bf16.mxu1 %v6912_v56  ;;  %v6925_v56 = vld [vmem:[%s8771_s9 + $0x360] ss:$8 sps:$4 sm:$0xff]  }
0x31b2   :  { %4228 = vmatpush1.bf16.msra.mxu1 %v6910_v54  ;;  %v6927_v54 = vld [vmem:[%s8771_s9 + $0x364] ss:$8 sps:$4 sm:$0xff]  }
0x31b3   :  { %4487 = vmatprep.subr.bf16.mxu1 %v6927_v54 }
0x327c   :  { %v4147_v40 = vpop.f32.mrb[64].mxu1 }
0x327d   :  { %v4148_v41 = vadd.f32 %v5898_v39, %v4147_v40  ;;  %v6582_v42 = vpop.f32.mrb[65].mxu1 }
0x327e   :  { %v4150_v43 = vpop.f32.mrb[66].mxu1  ;;  %v5943_v42 = vld [vmem:[%s8772_s10 + $0x24] ss:$0 sm:$0xff] }
0x327f   :  { %v6583_v44 = vpop.f32.mrb[67].mxu1  ;;  %v4155_v45 = vsel %vm2494_vm14, %v4148_v41, 0.0 }
0x3280   :  { %4156 = vadd.xlane.f32.xlu1 %v4155_v45 }
0x330d   :  { %v4157_v46 = vpop.xlane.xlu1 %4156 }
0x330e   :  { %v4158_v47 = vmul.f32 0.020833334, %v4157_v46 }
0x3310   :  { %v4159_v48 = vsub.f32 %v4148_v41, %v4158_v47 }
0x3312   :  { %v4160_v11 = vmul.f32 %v4159_v48, %v4159_v48 }
0x3314   :  { %v4161_v49 = vsel %vm2494_vm14, %v4160_v11, 0.0 }
0x3315   :  { %4162 = vadd.xlane.f32.xlu0 %v4161_v49 }
0x33a2   :  { %v4163_v2 = vpop.xlane.xlu0 %4162 }
0x33a3   :  { %v4164_v9 = vmul.f32 0.020833334, %v4163_v2 }
0x33a5   :  { %v4165_v3 = vadd.f32 1e-05, %v4164_v9 }
0x33a7   :  { %7099 = vrsqrt.f32 %v4165_v3  ;;  %v5957_v3 = vld [vmem:[%s8772_s10 + $0x25] ss:$0 sm:$0xff] }
0x33b1   :  { %v7100_v4 = vpop.eup %7099 }
0x33b2   :  { %v4167_v6 = vmul.f32 %v7100_v4, %v4159_v48 }
0x33b4   :  { %v4168_v8 = vmul.f32 %v5903_v5, %v4167_v6  ;;  %v5958_v5 = vld [vmem:[%s8772_s10 + $0x26] ss:$0 sm:$0xff] }
0x33b6   :  { %v4169_v55 = vadd.f32 %v5904_v7, %v4168_v8  ;;  %v6934_v8 = vld [vmem:[%s8771_s9 + $0x390] ss:$8 sps:$4 sm:$0xff]  }
0x33b8   :  { %v4176_v10 = vpack.c.bf16 %v4169_v55, %v4169_v55 }
0x33ba   :  { %5918 = vmatmul.mubr.msk.bf16.vlgmr.msra.gmra.mrb[68].mxu1 %vm2448_vm13, %v4176_v10  ;;  %v6935_v10 = vld [vmem:[%s8771_s9 + $0x3a0] ss:$8 sps:$4 sm:$0xff]  }
0x33bb   :  { %4519 = vmatprep.mubr.bf16.mxu1 %v7195_v62  ;;  %4488 = vmatpush1.bf16.msra.mxu1 %v6925_v56 }
0x33bc   :  { %4489 = vmatprep.subr.bf16.mxu1 %v6930_v57 }
0x33bf   :  { %4490 = vmatpush1.bf16.msra.mxu1 %v6928_v58 }
0x33c0   :  { %4491 = vmatprep.subr.bf16.mxu1 %v6933_v60  ;;  %v6947_v60 = vld [vmem:[%s8771_s9 + $0x460] ss:$8 sps:$4 sm:$0xff]  }
0x33c3   :  { %4492 = vmatpush1.bf16.msra.mxu1 %v6931_v59  ;;  %v6946_v59 = vld [vmem:[%s8771_s9 + $0x450] ss:$8 sps:$4 sm:$0xff]  }
0x33c4   :  { %4640 = vmatprep.subr.bf16.mxu1 %v7195_v62 }
0x348d   :  { %v4257_v21 = vpop.f32.mrb[68].mxu1 }
0x348e   :  { %v4258_v22 = vadd.f32 %v4257_v21, %v4183_v19  ;;  %v4259_v23 = vpop.f32.mrb[69].mxu1  ;;  %v6943_v19 = vld [vmem:[%s8771_s9 + $0x420] ss:$8 sps:$4 sm:$0xff]  }
0x348f   :  { %v4260_v25 = vadd.f32 %v4259_v23, %v4187_v20  ;;  %v4261_v26 = vpop.f32.mrb[70].mxu1  ;;  %v6944_v20 = vld [vmem:[%s8771_s9 + $0x430] ss:$8 sps:$4 sm:$0xff]   ;;  %v6945_v21 = vld [vmem:[%s8771_s9 + $0x440] ss:$8 sps:$4 sm:$0xff]  }
0x3490   :  { %v4266_v27 = vmul.f32 0.70710677, %v4258_v22  ;;  %v4262_v29 = vpop.f32.mrb[71].mxu1  ;;  %v4264_v32 = vmul.f32 0.5, %v4258_v22 }
0x3491   :  { %v4267_v30 = vmul.f32 0.70710677, %v4260_v25  ;;  %v4265_v35 = vmul.f32 0.5, %v4260_v25  ;;  %v5965_v22 = vld [vmem:[%s8772_s10 + $0x27] ss:$8 sm:$0x3] }
0x3492   :  { %7101 = verf.f32 %v4266_v27  ;;  %v4447_v23 = vrot.slane %v5965_v22, %v7321_v63  ;;  %v4451_v25 = vrot.slane %v5965_v22, %v7323_v0 }
0x3493   :  { %7103 = verf.f32 %v4267_v30 }
0x349c   :  { %v7102_v28 = vpop.eup %7101 }
0x349d   :  { %v7104_v31 = vpop.eup %7103  ;;  %v4270_v34 = vadd.f32 1.0, %v7102_v28 }
0x349e   :  { %v4271_v36 = vadd.f32 1.0, %v7104_v31 }
0x349f   :  { %v4272_v38 = vmul.f32 %v4270_v34, %v4264_v32 }
0x34a0   :  { %v4273_v39 = vmul.f32 %v4271_v36, %v4265_v35 }
0x34a1   :  { %v4298_v41 = vpack.c.bf16 %v4272_v38, %v4272_v38 }
0x34a2   :  { %v4299_v40 = vpack.c.bf16 %v4273_v39, %v4273_v39 }
0x34a4   :  { %5956 = vmatprep.mubr.msk.bf16.mxu0 %vm65_vm0, %v4299_v40 }
0x34a5   :  { %4409 = vmatmul.mubr.bf16.vlgmr.msra.gmra.mrb[48].mxu0 %v4298_v41 }
0x34a6   :  { %6590 = vmatprep.mubr.msk.bf16.mxu0 %vm7197_vm3, %v8070_v33  ;;  %6585 = vmatpush3.bf16.msra.mxu0 %v6946_v59  ;;  %v6964_v59 = vld [vmem:[%s8773_s11 + $0x340] ss:$8 sps:$4 sm:$0xff]  }
0x34a7   :  { %6586 = vmatprep.subr.bf16.mxu0 %v8070_v33 }
0x34aa   :  { %6587 = vmatpush3.bf16.msra.mxu0 %v6947_v60  ;;  %v6965_v60 = vld [vmem:[%s8773_s11 + $0x3d0] ss:$8 sps:$4 sm:$0xff]  }
0x34ab   :  { %6588 = vmatprep.subr.bf16.mxu0 %v8070_v33 }
0x3578   :  { %v4410_v43 = vpop.f32.mrb[48].mxu0 }
0x3579   :  { %v4411_v44 = vadd.f32 %v5943_v42, %v4410_v43  ;;  %v4412_v45 = vpop.f32.mrb[49].mxu0 }
0x357a   :  { %v4413_v46 = vpop.f32.mrb[50].mxu0 }
0x357b   :  { %v4414_v47 = vpop.f32.mrb[51].mxu0  ;;  %v4416_v48 = vadd.f32 %v4411_v44, %v4169_v55  ;;  %v5997_v46 = vld [vmem:[%s8772_s10 + $0x30] ss:$0 sm:$0xff] }
0x357d   :  { %v4419_v11 = vsel %vm2494_vm14, %v4416_v48, 0.0 }
0x357e   :  { %4420 = vadd.xlane.f32.xlu0 %v4419_v11 }
0x360b   :  { %v4421_v49 = vpop.xlane.xlu0 %4420 }
0x360c   :  { %v4422_v50 = vmul.f32 0.020833334, %v4421_v49 }
0x360e   :  { %v4423_v51 = vsub.f32 %v4416_v48, %v4422_v50 }
0x3610   :  { %v4424_v52 = vmul.f32 %v4423_v51, %v4423_v51 }
0x3612   :  { %v4425_v53 = vsel %vm2494_vm14, %v4424_v52, 0.0 }
0x3613   :  { %4426 = vadd.xlane.f32.xlu1 %v4425_v53 }
0x36a0   :  { %v4427_v61 = vpop.xlane.xlu1 %4426 }
0x36a1   :  { %v4428_v1 = vmul.f32 0.020833334, %v4427_v61  ;;  %v6948_v61 = vld [vmem:[%s8771_s9 + $0x470] ss:$8 sps:$4 sm:$0xff]  }
0x36a2   :  { %6589 = vmatpush3.bf16.msra.mxu0 %v6948_v61  ;;  %v6966_v61 = vld [vmem:[%s8773_s11 + $0x350] ss:$8 sps:$4 sm:$0xff]  }
0x36a3   :  { %v4429_v2 = vadd.f32 1e-05, %v4428_v1  ;;  %6594 = vmatprep.subr.bf16.mxu0 %v8070_v33 }
0x36a5   :  { %7105 = vrsqrt.f32 %v4429_v2 }
0x36af   :  { %v7106_v9 = vpop.eup %7105 }
0x36b0   :  { %v4431_v4 = vmul.f32 %v7106_v9, %v4423_v51 }
0x36b2   :  { %v4432_v6 = vmul.f32 %v5957_v3, %v4431_v4  ;;  %v6011_v4 = vld [vmem:[%s8772_s10 + $0x31] ss:$0 sm:$0xff] }
0x36b4   :  { %v8388_v7 = vadd.f32 %v5958_v5, %v4432_v6  ;;  %v6012_v6 = vld [vmem:[%s8772_s10 + $0x32] ss:$0 sm:$0xff] }
0x36b6   :  { %v4440_v55 = vpack.c.bf16 %v8388_v7, %v8388_v7 }
0x36b8   :  { %5972 = vmatmul.mubr.msk.bf16.vlgmr.msra.gmra.mrb[72].mxu1 %vm2448_vm13, %v4440_v55 }
0x36b9   :  { %4641 = vmatpush1.bf16.msra.mxu1 %v6934_v8 }
0x36ba   :  { %4642 = vmatprep.subr.bf16.mxu1 %v7195_v62 }
0x36bd   :  { %4643 = vmatpush1.bf16.msra.mxu1 %v6935_v10  ;;  %v6019_v10 = vld [vmem:[%s8772_s10 + $0x33] ss:$0 sm:$0xff] }
0x36be   :  { %4644 = vmatprep.subr.bf16.mxu1 %v7195_v62 }
0x36c1   :  { %4645 = vmatpush1.bf16.msra.mxu1 %v6936_v12 }
0x36c2   :  { %4646 = vmatprep.subr.bf16.mxu1 %v7195_v62 }
0x36c5   :  { %4647 = vmatpush1.bf16.msra.mxu1 %v6937_v13 }
0x36c6   :  { %4648 = vmatprep.subr.bf16.mxu1 %v7195_v62 }
0x36c9   :  { %4649 = vmatpush1.bf16.msra.mxu1 %v6938_v14 }
0x36ca   :  { %4650 = vmatprep.subr.bf16.mxu1 %v7195_v62 }
0x36cd   :  { %4651 = vmatpush1.bf16.msra.mxu1 %v6939_v15 }
0x36ce   :  { %4652 = vmatprep.subr.bf16.mxu1 %v7195_v62 }
0x36d1   :  { %4653 = vmatpush1.bf16.msra.mxu1 %v6940_v16 }
0x36d2   :  { %4654 = vmatprep.subr.bf16.mxu1 %v7195_v62 }
0x36d5   :  { %4655 = vmatpush1.bf16.msra.mxu1 %v6941_v17 }
0x36d6   :  { %4656 = vmatprep.subr.bf16.mxu1 %v7195_v62 }
0x36d9   :  { %4657 = vmatpush1.bf16.msra.mxu1 %v6942_v18 }
0x36da   :  { %4658 = vmatprep.subr.bf16.mxu1 %v7195_v62 }
0x36dd   :  { %4659 = vmatpush1.bf16.msra.mxu1 %v6943_v19 }
0x36de   :  { %4660 = vmatprep.subr.bf16.mxu1 %v7195_v62 }
0x36e1   :  { %4661 = vmatpush1.bf16.msra.mxu1 %v6944_v20 }
0x36e2   :  { %4662 = vmatprep.subr.bf16.mxu1 %v7195_v62 }
0x36e5   :  { %4663 = vmatpush1.bf16.msra.mxu1 %v6945_v21 }
0x378b   :  { %v4521_v26 = vpop.f32.mrb[72].mxu1 }
0x378c   :  { %v4522_v27 = vadd.f32 %v4521_v26, %v4447_v23  ;;  %v4523_v29 = vpop.f32.mrb[73].mxu1  ;;  %v6950_v23 = vld [vmem:[%s8773_s11 + $0x2f0] ss:$8 sps:$4 sm:$0xff]  }
0x378d   :  { %v4524_v30 = vadd.f32 %v4523_v29, %v4451_v25  ;;  %v4525_v28 = vpop.f32.mrb[74].mxu1  ;;  %v8484_v25 = vld [vmem:[#allocation5] sm:$0xff] }
0x378e   :  { %v4530_v31 = vmul.f32 0.70710677, %v4522_v27  ;;  %v4526_v32 = vpop.f32.mrb[75].mxu1  ;;  %v4528_v38 = vmul.f32 0.5, %v4522_v27  ;;  %v6024_v28 = vld [vmem:[%s8772_s10 + $0x34] ss:$0 sm:$0xff] }
0x378f   :  { %v4531_v34 = vmul.f32 0.70710677, %v4524_v30  ;;  %v4529_v40 = vmul.f32 0.5, %v4524_v30  ;;  %v6025_v32 = vld [vmem:[%s8772_s10 + $0x35] ss:$0 sm:$0xff] }
0x3790   :  { %7107 = verf.f32 %v4530_v31 }
0x3791   :  { %7109 = verf.f32 %v4531_v34 }
0x379a   :  { %v7108_v35 = vpop.eup %7107 }
0x379b   :  { %v7110_v36 = vpop.eup %7109  ;;  %v4534_v39 = vadd.f32 1.0, %v7108_v35 }
0x379c   :  { %v4535_v41 = vadd.f32 1.0, %v7110_v36 }
0x379d   :  { %v4536_v42 = vmul.f32 %v4534_v39, %v4528_v38  ;;  %v6030_v38 = vld [vmem:[%s8774_s12 + $0x20] ss:$0 sm:$0xff] }
0x379e   :  { %v4537_v43 = vmul.f32 %v4535_v41, %v4529_v40 }
0x379f   :  { %v4562_v45 = vpack.c.bf16 %v4536_v42, %v4536_v42 }
0x37a0   :  { %v4563_v44 = vpack.c.bf16 %v4537_v43, %v4537_v43 }
0x37a2   :  { %6010 = vmatprep.mubr.msk.bf16.mxu1 %vm65_vm0, %v4563_v44 }
0x37a3   :  { %4673 = vmatmul.mubr.bf16.vlgmr.msra.gmra.mrb[76].mxu1 %v4562_v45 }
0x3876   :  { %v4674_v47 = vpop.f32.mrb[76].mxu1 }
0x3877   :  { %v4675_v48 = vadd.f32 %v5997_v46, %v4674_v47  ;;  %v4676_v11 = vpop.f32.mrb[77].mxu1 }
0x3878   :  { %v4677_v49 = vpop.f32.mrb[78].mxu1 }
0x3879   :  { %v4678_v50 = vpop.f32.mrb[79].mxu1  ;;  %v4680_v51 = vadd.f32 %v4675_v48, %v8388_v7  ;;  %v6953_v49 = vld [vmem:[%s8773_s11 + $0x304] ss:$8 sps:$4 sm:$0xff]  }
0x387a   :  { %v6951_v50 = vld [vmem:[%s8773_s11 + $0x300] ss:$8 sps:$4 sm:$0xff]  }
0x387b   :  { %v4683_v52 = vsel %vm2494_vm14, %v4680_v51, 0.0 }
0x387c   :  { %4684 = vadd.xlane.f32.xlu0 %v4683_v52  ;;  %v6954_v52 = vld [vmem:[%s8773_s11 + $0x310] ss:$8 sps:$4 sm:$0xff]  }
0x3909   :  { %v4685_v53 = vpop.xlane.xlu0 %4684 }
0x390a   :  { %v4686_v54 = vmul.f32 0.020833334, %v4685_v53  ;;  %v6959_v53 = vld [vmem:[%s8773_s11 + $0x324] ss:$8 sps:$4 sm:$0xff]  }
0x390c   :  { %v4687_v56 = vsub.f32 %v4680_v51, %v4686_v54  ;;  %v6956_v51 = vld [vmem:[%s8773_s11 + $0x314] ss:$8 sps:$4 sm:$0xff]   ;;  %v6957_v54 = vld [vmem:[%s8773_s11 + $0x320] ss:$8 sps:$4 sm:$0xff]  }
0x390e   :  { %v4688_v57 = vmul.f32 %v4687_v56, %v4687_v56 }
0x3910   :  { %v4689_v58 = vsel %vm2494_vm14, %v4688_v57, 0.0  ;;  %v6962_v57 = vld [vmem:[%s8773_s11 + $0x334] ss:$8 sps:$4 sm:$0xff]  }
0x3911   :  { %4690 = vadd.xlane.f32.xlu1 %v4689_v58  ;;  %v6963_v58 = vld [vmem:[%s8773_s11 + $0x3c0] ss:$8 sps:$4 sm:$0xff]  }
0x3912   :  { %6405 = vmatprep.subr.bf16.mxu1 %v6963_v58 }
0x3913   :  { %6406 = vmatpush3.bf16.msra.mxu1 %v6964_v59 }
0x3914   :  { %6407 = vmatprep.subr.bf16.mxu1 %v6965_v60  ;;  %v6981_v60 = vld [vmem:[%s8773_s11 + $0x444] ss:$8 sps:$4 sm:$0xff]  }
0x3917   :  { %6408 = vmatpush3.bf16.msra.mxu1 %v6966_v61  ;;  %v6979_v61 = vld [vmem:[%s8773_s11 + $0x440] ss:$8 sps:$4 sm:$0xff]  }
0x399e   :  { %v4691_v1 = vpop.xlane.xlu1 %4690 }
0x399f   :  { %v4692_v2 = vmul.f32 0.020833334, %v4691_v1 }
0x39a1   :  { %v4693_v9 = vadd.f32 1e-05, %v4692_v2 }
0x39a3   :  { %7111 = vrsqrt.f32 %v4693_v9 }
0x39ad   :  { %v7112_v3 = vpop.eup %7111 }
0x39ae   :  { %v4695_v5 = vmul.f32 %v7112_v3, %v4687_v56  ;;  %v6960_v56 = vld [vmem:[%s8773_s11 + $0x330] ss:$8 sps:$4 sm:$0xff]  }
0x39b0   :  { %v4696_v7 = vmul.f32 %v6011_v4, %v4695_v5  ;;  %v6034_v4 = vld [vmem:[%s8774_s12 + $0x21] ss:$0 sm:$0xff] }
0x39b2   :  { %v4697_v8 = vadd.f32 %v6012_v6, %v4696_v7  ;;  %v6035_v6 = vld [vmem:[%s8774_s12 + $0x22] ss:$0 sm:$0xff] }
0x39b4   :  { %v4704_v55 = vpack.c.bf16 %v4697_v8, %v4697_v8 }
0x39b6   :  { %6591 = vmatmul.mubr.msk.bf16.vlgmr.msra.gmra.mrb[52].mxu0 %vm2448_vm13, %v4704_v55 }
0x39b7   :  { %6598 = vmatprep.mubr.msk.bf16.mxu0 %vm7197_vm3, %v8070_v33  ;;  %v6949_v33 = vld [vmem:[%s8773_s11 + $0x2e0] ss:$8 sps:$4 sm:$0xff]  }
0x39b8   :  { %6595 = vmatpush3.bf16.msra.mxu0 %v6949_v33 }
0x39b9   :  { %6596 = vmatprep.subr.bf16.mxu0 %v8484_v25 }
0x39bc   :  { %6597 = vmatpush3.bf16.msra.mxu0 %v6950_v23 }
0x39bd   :  { %4929 = vmatprep.subr.bf16.mxu0 %v6953_v49 }
0x3a89   :  { %v4761_v12 = vpop.f32.mrb[52].mxu0 }
0x3a8a   :  { %v4762_v13 = vadd.f32 %v6019_v10, %v4761_v12  ;;  %v6592_v14 = vpop.f32.mrb[53].mxu0  ;;  %v6967_v10 = vld [vmem:[%s8773_s11 + $0x3e0] ss:$8 sps:$4 sm:$0xff]  }
0x3a8b   :  { %v4764_v15 = vpop.f32.mrb[54].mxu0  ;;  %v6968_v12 = vld [vmem:[%s8773_s11 + $0x360] ss:$8 sps:$4 sm:$0xff]   ;;  %6409 = vmatprep.subr.bf16.mxu1 %v6967_v10  ;;  %v6970_v14 = vld [vmem:[%s8773_s11 + $0x370] ss:$8 sps:$4 sm:$0xff]  }
0x3a8c   :  { %v6593_v16 = vpop.f32.mrb[55].mxu0  ;;  %v4769_v17 = vsel %vm1439_vm5, %v4762_v13, 0.0  ;;  %6410 = vmatpush3.bf16.msra.mxu1 %v6968_v12  ;;  %v6972_v15 = vld [vmem:[%s8773_s11 + $0x380] ss:$8 sps:$4 sm:$0xff]   ;;  %v6103_v12 = vld [vmem:[%s8774_s12 + $0x25] ss:$0 sm:$0xff] }
0x3a8d   :  { %4770 = vadd.xlane.f32.xlu0 %v4769_v17  ;;  %v6973_v16 = vld [vmem:[%s8773_s11 + $0x410] ss:$8 sps:$4 sm:$0xff]  }
0x3a8e   :  { %v6974_v17 = vld [vmem:[%s8773_s11 + $0x390] ss:$8 sps:$4 sm:$0xff]  }
0x3b1a   :  { %v4771_v18 = vpop.xlane.xlu0 %4770 }
0x3b1b   :  { %v4772_v19 = vmul.f32 0.03125, %v4771_v18  ;;  %v6975_v18 = vld [vmem:[%s8773_s11 + $0x420] ss:$8 sps:$4 sm:$0xff]  }
0x3b1d   :  { %v4773_v20 = vsub.f32 %v4762_v13, %v4772_v19  ;;  %v6969_v13 = vld [vmem:[%s8773_s11 + $0x3f0] ss:$8 sps:$4 sm:$0xff]   ;;  %v6976_v19 = vld [vmem:[%s8773_s11 + $0x3a0] ss:$8 sps:$4 sm:$0xff]  }
0x3b1e   :  { %6411 = vmatprep.subr.bf16.mxu1 %v6969_v13 }
0x3b1f   :  { %v4774_v21 = vmul.f32 %v4773_v20, %v4773_v20  ;;  %6412 = vmatpush3.bf16.msra.mxu1 %v6970_v14  ;;  %v6104_v14 = vld [vmem:[%s8774_s12 + $0x26] ss:$0 sm:$0xff] }
0x3b21   :  { %v4775_v22 = vsel %vm1439_vm5, %v4774_v21, 0.0  ;;  %v6978_v21 = vld [vmem:[%s8773_s11 + $0x3b0] ss:$8 sps:$4 sm:$0xff]  }
0x3b22   :  { %4776 = vadd.xlane.f32.xlu1 %v4775_v22  ;;  %v6044_v22 = vld [vmem:[%s8774_s12 + $0x23] ss:$8 sm:$0x3] }
0x3b23   :  { %v4879_v33 = vrot.slane %v6044_v22, %v7321_v63  ;;  %v4883_v23 = vrot.slane %v6044_v22, %v7323_v0  ;;  %v6997_v22 = vld [vmem:[%s8773_s11 + $0x530] ss:$8 sps:$4 sm:$0xff]  }
0x3baf   :  { %v4777_v26 = vpop.xlane.xlu1 %4776 }
0x3bb0   :  { %v4778_v27 = vmul.f32 0.03125, %v4777_v26 }
0x3bb2   :  { %v4779_v29 = vadd.f32 1e-05, %v4778_v27 }
0x3bb4   :  { %7113 = vrsqrt.f32 %v4779_v29 }
0x3bbe   :  { %v7114_v30 = vpop.eup %7113 }
0x3bbf   :  { %v4781_v31 = vmul.f32 %v7114_v30, %v4773_v20  ;;  %v6977_v20 = vld [vmem:[%s8773_s11 + $0x430] ss:$8 sps:$4 sm:$0xff]  }
0x3bc1   :  { %v4782_v34 = vmul.f32 %v6024_v28, %v4781_v31 }
0x3bc3   :  { %v4783_v35 = vadd.f32 %v6025_v32, %v4782_v34 }
0x3bc5   :  { %v4789_v36 = vpack.c.bf16 %v4783_v35, %v4783_v35 }
0x3bc7   :  { %6599 = vmatmul.mubr.msk.bf16.vlgmr.msra.gmra.mrb[56].mxu0 %vm1481_vm6, %v4789_v36 }
0x3bc8   :  { %4961 = vmatprep.mubr.bf16.mxu0 %v7195_v62  ;;  %4930 = vmatpush1.bf16.msra.mxu0 %v6951_v50 }
0x3bc9   :  { %4931 = vmatprep.subr.bf16.mxu0 %v6956_v51 }
0x3bcc   :  { %4932 = vmatpush1.bf16.msra.mxu0 %v6954_v52 }
0x3bcd   :  { %4933 = vmatprep.subr.bf16.mxu0 %v6959_v53 }
0x3bd0   :  { %4934 = vmatpush1.bf16.msra.mxu0 %v6957_v54 }
0x3bd1   :  { %4935 = vmatprep.subr.bf16.mxu0 %v6962_v57 }
0x3bd4   :  { %4936 = vmatpush1.bf16.msra.mxu0 %v6960_v56 }
0x3bd5   :  { %5234 = vmatprep.subr.bf16.mxu0 %v6981_v60 }
0x3c9a   :  { %v4841_v39 = vpop.f32.mrb[56].mxu0 }
0x3c9b   :  { %v4842_v40 = vadd.f32 %v6030_v38, %v4841_v39  ;;  %v6600_v41 = vpop.f32.mrb[57].mxu0 }
0x3c9c   :  { %v4844_v42 = vpop.f32.mrb[58].mxu0 }
0x3c9d   :  { %v6601_v43 = vpop.f32.mrb[59].mxu0  ;;  %v4849_v44 = vsel %vm429_vm4, %v4842_v40, 0.0 }
0x3c9e   :  { %4850 = vadd.xlane.f32.xlu0 %v4849_v44 }
0x3d2b   :  { %v4851_v45 = vpop.xlane.xlu0 %4850 }
0x3d2c   :  { %v4852_v46 = vmul.f32 0.015625, %v4851_v45 }
0x3d2e   :  { %v4853_v47 = vsub.f32 %v4842_v40, %v4852_v46 }
0x3d30   :  { %v4854_v48 = vmul.f32 %v4853_v47, %v4853_v47 }
0x3d32   :  { %v4855_v11 = vsel %vm429_vm4, %v4854_v48, 0.0 }
0x3d33   :  { %4856 = vadd.xlane.f32.xlu1 %v4855_v11 }
0x3dc0   :  { %v4857_v1 = vpop.xlane.xlu1 %4856 }
0x3dc1   :  { %v4858_v2 = vmul.f32 0.015625, %v4857_v1  ;;  %v6984_v1 = vld [vmem:[%s8773_s11 + $0x454] ss:$8 sps:$4 sm:$0xff]  }
0x3dc3   :  { %v4859_v9 = vadd.f32 1e-05, %v4858_v2  ;;  %v6982_v2 = vld [vmem:[%s8773_s11 + $0x450] ss:$8 sps:$4 sm:$0xff]  }
0x3dc5   :  { %7115 = vrsqrt.f32 %v4859_v9  ;;  %v6987_v9 = vld [vmem:[%s8773_s11 + $0x464] ss:$8 sps:$4 sm:$0xff]  }
0x3dcf   :  { %v7116_v3 = vpop.eup %7115 }
0x3dd0   :  { %v4861_v5 = vmul.f32 %v7116_v3, %v4853_v47  ;;  %v6086_v47 = vld [vmem:[%s8774_s12 + $0x24] ss:$0 sm:$0xff]  ;;  %v6985_v3 = vld [vmem:[%s8773_s11 + $0x460] ss:$8 sps:$4 sm:$0xff]  }
0x3dd2   :  { %v4862_v7 = vmul.f32 %v6034_v4, %v4861_v5  ;;  %v6988_v4 = vld [vmem:[%s8773_s11 + $0x470] ss:$8 sps:$4 sm:$0xff]   ;;  %v6990_v5 = vld [vmem:[%s8773_s11 + $0x474] ss:$8 sps:$4 sm:$0xff]  }
0x3dd4   :  { %v4863_v8 = vadd.f32 %v6035_v6, %v4862_v7  ;;  %v6991_v6 = vld [vmem:[%s8773_s11 + $0x500] ss:$8 sps:$4 sm:$0xff]  }
0x3dd6   :  { %v4872_v55 = vpack.c.bf16 %v4863_v8, %v4863_v8 }
0x3dd8   :  { %6053 = vmatmul.mubr.msk.bf16.vlgmr.msra.gmra.mrb[60].mxu0 %vm65_vm0, %v4872_v55 }
0x3dd9   :  { %5266 = vmatprep.mubr.bf16.mxu0 %v7195_v62  ;;  %v6971_v62 = vld [vmem:[%s8773_s11 + $0x400] ss:$8 sps:$4 sm:$0xff]   ;;  %5235 = vmatpush1.bf16.msra.mxu0 %v6979_v61  ;;  %v2161_v61 = vld [vmem:[%s8767_s5 + $0x13] ss:$0 sm:$0xff] }
0x3dda   :  { %6413 = vmatprep.subr.bf16.mxu1 %v6971_v62  ;;  %5236 = vmatprep.subr.bf16.mxu0 %v6984_v1 }
0x3ddb   :  { %6414 = vmatpush3.bf16.msra.mxu1 %v6972_v15 }
0x3ddc   :  { %6415 = vmatprep.subr.bf16.mxu1 %v6973_v16  ;;  %v6992_v16 = vld [vmem:[%s8773_s11 + $0x480] ss:$8 sps:$4 sm:$0xff]  }
0x3ddd   :  { %5237 = vmatpush1.bf16.msra.mxu0 %v6982_v2  ;;  %v2224_v2 = vadd.f32 %v7755_v37, %v2161_v61 }
0x3dde   :  { %5238 = vmatprep.subr.bf16.mxu0 %v6987_v9 }
0x3ddf   :  { %6416 = vmatpush3.bf16.msra.mxu1 %v6974_v17 }
0x3de0   :  { %6417 = vmatprep.subr.bf16.mxu1 %v6975_v18  ;;  %v6993_v18 = vld [vmem:[%s8773_s11 + $0x510] ss:$8 sps:$4 sm:$0xff]  }
0x3de1   :  { %5239 = vmatpush1.bf16.msra.mxu0 %v6985_v3  ;;  %v2231_v3 = vsel %vm1439_vm5, %v2224_v2, 0.0 }
0x3de2   :  { %5240 = vmatprep.subr.bf16.mxu0 %v6990_v5 }
0x3de3   :  { %6418 = vmatpush3.bf16.msra.mxu1 %v6976_v19  ;;  %v6994_v19 = vld [vmem:[%s8773_s11 + $0x490] ss:$8 sps:$4 sm:$0xff]  }
0x3de4   :  { %6419 = vmatprep.subr.bf16.mxu1 %v6977_v20  ;;  %v6995_v20 = vld [vmem:[%s8773_s11 + $0x520] ss:$8 sps:$4 sm:$0xff]  }
0x3de5   :  { %5241 = vmatpush1.bf16.msra.mxu0 %v6988_v4 }
0x3de6   :  { %6427 = vmatprep.subr.bf16.mxu0 %v6991_v6 }
0x3de7   :  { %6420 = vmatpush3.bf16.msra.mxu1 %v6978_v21  ;;  %v6996_v21 = vld [vmem:[%s8773_s11 + $0x4a0] ss:$8 sps:$4 sm:$0xff]  }
0x3de8   :  { %6602 = vmatprep.subr.bf16.mxu1 %v8484_v25 }
0x3eab   :  { %v4963_v26 = vpop.f32.mrb[60].mxu0 }
0x3eac   :  { %v4964_v27 = vadd.f32 %v4963_v26, %v4879_v33  ;;  %v4965_v29 = vpop.f32.mrb[61].mxu0  ;;  %v6998_v33 = vld [vmem:[%s8773_s11 + $0x4b0] ss:$8 sps:$4 sm:$0xff]   ;;  %v7000_v26 = vld [vmem:[%s8773_s11 + $0x4c0] ss:$8 sps:$4 sm:$0xff]  }
0x3ead   :  { %v4966_v30 = vadd.f32 %v4965_v29, %v4883_v23  ;;  %v4967_v28 = vpop.f32.mrb[62].mxu0  ;;  %v6999_v23 = vld [vmem:[%s8773_s11 + $0x540] ss:$8 sps:$4 sm:$0xff]   ;;  %v7002_v29 = vld [vmem:[%s8773_s11 + $0x4d0] ss:$8 sps:$4 sm:$0xff]  }
0x3eae   :  { %v4972_v31 = vmul.f32 0.70710677, %v4964_v27  ;;  %v4968_v32 = vpop.f32.mrb[63].mxu0  ;;  %v4970_v38 = vmul.f32 0.5, %v4964_v27  ;;  %v7001_v27 = vld [vmem:[%s8773_s11 + $0x550] ss:$8 sps:$4 sm:$0xff]  }
0x3eaf   :  { %v4973_v34 = vmul.f32 0.70710677, %v4966_v30  ;;  %v4971_v40 = vmul.f32 0.5, %v4966_v30  ;;  %v7003_v30 = vld [vmem:[%s8773_s11 + $0x560] ss:$8 sps:$4 sm:$0xff]  }
0x3eb0   :  { %7117 = verf.f32 %v4972_v31  ;;  %v7004_v28 = vld [vmem:[%s8773_s11 + $0x4e0] ss:$8 sps:$4 sm:$0xff]   ;;  %v7005_v31 = vld [vmem:[%s8773_s11 + $0x570] ss:$8 sps:$4 sm:$0xff]  }
0x3eb1   :  { %7119 = verf.f32 %v4973_v34  ;;  %v7006_v32 = vld [vmem:[%s8773_s11 + $0x4f0] ss:$8 sps:$4 sm:$0xff]   ;;  %v6113_v34 = vld [vmem:[%s8774_s12 + $0x27] ss:$8 sm:$0x3] }
0x3eba   :  { %v7118_v35 = vpop.eup %7117 }
0x3ebb   :  { %v7120_v36 = vpop.eup %7119  ;;  %v4976_v39 = vadd.f32 1.0, %v7118_v35  ;;  %v5184_v35 = vrot.slane %v6113_v34, %v7321_v63 }
0x3ebc   :  { %v4977_v41 = vadd.f32 1.0, %v7120_v36  ;;  %v5188_v36 = vrot.slane %v6113_v34, %v7323_v0 }
0x3ebd   :  { %v4978_v42 = vmul.f32 %v4976_v39, %v4970_v38 }
0x3ebe   :  { %v4979_v43 = vmul.f32 %v4977_v41, %v4971_v40 }
0x3ebf   :  { %v5012_v45 = vpack.c.bf16 %v4978_v42, %v4978_v42 }
0x3ec0   :  { %v5013_v44 = vpack.c.bf16 %v4979_v43, %v4979_v43 }
0x3ec2   :  { %5143 = vmatprep.mubr.bf16.mxu1 %v5013_v44 }
0x3ec3   :  { %5144 = vmatmul.mubr.bf16.vlgmr.msra.gmra.mrb[80].mxu1 %v5012_v45 }
0x3ec4   :  { %6610 = vmatprep.mubr.msk.bf16.mxu1 %vm7197_vm3, %v8484_v25 }
0x3f96   :  { %v6421_v46 = vpop.f32.mrb[80].mxu1 }
0x3f97   :  { %v6422_v48 = vpop.f32.mrb[81].mxu1 }
0x3f98   :  { %v6423_v11 = vadd.f32 %v6422_v48, %v6421_v46  ;;  %v6424_v49 = vpop.f32.mrb[82].mxu1 }
0x3f99   :  { %v6425_v50 = vpop.f32.mrb[83].mxu1 }
0x3f9a   :  { %v5146_v51 = vadd.f32 %v6423_v11, %v6086_v47 }
0x3f9c   :  { %v5151_v52 = vadd.f32 %v5146_v51, %v4863_v8 }
0x3f9e   :  { %v5154_v53 = vsel %vm429_vm4, %v5151_v52, 0.0 }
0x3f9f   :  { %5155 = vadd.xlane.f32.xlu0 %v5154_v53 }
0x402c   :  { %v5156_v54 = vpop.xlane.xlu0 %5155 }
0x402d   :  { %v5157_v56 = vmul.f32 0.015625, %v5156_v54  ;;  %v6155_v54 = vld [vmem:[%s8774_s12 + $0x30] ss:$0 sm:$0xff] }
0x402f   :  { %v5158_v57 = vsub.f32 %v5151_v52, %v5157_v56 }
0x4031   :  { %v5159_v58 = vmul.f32 %v5158_v57, %v5158_v57 }
0x4033   :  { %v5160_v59 = vsel %vm429_vm4, %v5159_v58, 0.0 }
0x4034   :  { %5161 = vadd.xlane.f32.xlu1 %v5160_v59 }
0x40c1   :  { %v5162_v7 = vpop.xlane.xlu1 %5161 }
0x40c2   :  { %v5163_v8 = vmul.f32 0.015625, %v5162_v7  ;;  %v3822_v7 = vld [vmem:[%s8774_s12 + $0x13] ss:$0 sm:$0xff] }
0x40c4   :  { %v5164_v55 = vadd.f32 1e-05, %v5163_v8 }
0x40c6   :  { %7121 = vrsqrt.f32 %v5164_v55 }
0x40d0   :  { %v7122_v10 = vpop.eup %7121 }
0x40d1   :  { %v5166_v13 = vmul.f32 %v7122_v10, %v5158_v57 }
0x40d3   :  { %v5167_v62 = vmul.f32 %v6103_v12, %v5166_v13  ;;  %v3885_v12 = vadd.f32 %v8267_v24, %v3822_v7  ;;  %v7008_v24 = vld [vmem:[%s8773_s11 + $0x590] ss:$8 sps:$4 sm:$0xff]  }
0x40d5   :  { %v8626_v15 = vadd.f32 %v6104_v14, %v5167_v62  ;;  %v3892_v14 = vsel %vm1439_vm5, %v3885_v12, 0.0 }
0x40d7   :  { %v5177_v17 = vpack.c.bf16 %v8626_v15, %v8626_v15 }
0x40d9   :  { %6122 = vmatmul.mubr.msk.bf16.vlgmr.msra.gmra.mrb[64].mxu0 %vm65_vm0, %v5177_v17  ;;  %v7009_v17 = vld [vmem:[%s8773_s11 + $0x5a0] ss:$8 sps:$4 sm:$0xff]  }
0x40da   :  { %6428 = vmatpush3.bf16.msra.mxu0 %v6992_v16  ;;  %v7007_v16 = vld [vmem:[%s8773_s11 + $0x580] ss:$8 sps:$4 sm:$0xff]  }
0x40db   :  { %6429 = vmatprep.subr.bf16.mxu0 %v6993_v18  ;;  %6603 = vmatpush3.bf16.msra.mxu1 %v7007_v16  ;;  %v7010_v18 = vld [vmem:[%s8773_s11 + $0x5b0] ss:$8 sps:$4 sm:$0xff]  }
0x40dc   :  { %6604 = vmatprep.subr.bf16.mxu1 %v8484_v25 }
0x40de   :  { %6430 = vmatpush3.bf16.msra.mxu0 %v6994_v19 }
0x40df   :  { %6431 = vmatprep.subr.bf16.mxu0 %v6995_v20  ;;  %6605 = vmatpush3.bf16.msra.mxu1 %v7008_v24 }
0x40e0   :  { %6606 = vmatprep.subr.bf16.mxu1 %v8484_v25 }
0x40e2   :  { %6432 = vmatpush3.bf16.msra.mxu0 %v6996_v21 }
0x40e3   :  { %6433 = vmatprep.subr.bf16.mxu0 %v6997_v22  ;;  %6607 = vmatpush3.bf16.msra.mxu1 %v7009_v17 }
0x40e4   :  { %6608 = vmatprep.subr.bf16.mxu1 %v8484_v25 }
0x40e6   :  { %6434 = vmatpush3.bf16.msra.mxu0 %v6998_v33  ;;  %v6172_v33 = vld [vmem:[%s8774_s12 + $0x31] ss:$0 sm:$0xff] }
0x40e7   :  { %6435 = vmatprep.subr.bf16.mxu0 %v6999_v23  ;;  %6609 = vmatpush3.bf16.msra.mxu1 %v7010_v18 }
0x40ea   :  { %6436 = vmatpush3.bf16.msra.mxu0 %v7000_v26  ;;  %v6173_v26 = vld [vmem:[%s8774_s12 + $0x32] ss:$0 sm:$0xff] }
0x40eb   :  { %6437 = vmatprep.subr.bf16.mxu0 %v7001_v27 }
0x40ee   :  { %6438 = vmatpush3.bf16.msra.mxu0 %v7002_v29 }
0x40ef   :  { %6439 = vmatprep.subr.bf16.mxu0 %v7003_v30 }
0x40f2   :  { %6440 = vmatpush3.bf16.msra.mxu0 %v7004_v28 }
0x40f3   :  { %6441 = vmatprep.subr.bf16.mxu0 %v7005_v31 }
0x40f6   :  { %6442 = vmatpush3.bf16.msra.mxu0 %v7006_v32 }
0x41ac   :  { %v5268_v38 = vpop.f32.mrb[64].mxu0 }
0x41ad   :  { %v5269_v39 = vadd.f32 %v5268_v38, %v5184_v35  ;;  %v5270_v40 = vpop.f32.mrb[65].mxu0  ;;  %v2229_v38 = vld [vmem:[%s8767_s5 + $0x14] ss:$0 sm:$0xff] }
0x41ae   :  { %v5271_v41 = vadd.f32 %v5270_v40, %v5188_v36  ;;  %v5272_v42 = vpop.f32.mrb[66].mxu0 }
0x41af   :  { %v5277_v43 = vmul.f32 0.70710677, %v5269_v39  ;;  %v5273_v44 = vpop.f32.mrb[67].mxu0  ;;  %v5275_v48 = vmul.f32 0.5, %v5269_v39  ;;  %v6182_v39 = vld [vmem:[%s8774_s12 + $0x33] ss:$0 sm:$0xff] }
0x41b0   :  { %v5278_v45 = vmul.f32 0.70710677, %v5271_v41  ;;  %v5276_v49 = vmul.f32 0.5, %v5271_v41 }
0x41b1   :  { %7123 = verf.f32 %v5277_v43  ;;  %v2230_v43 = vld [vmem:[%s8767_s5 + $0x15] ss:$0 sm:$0xff] }
0x41b2   :  { %7125 = verf.f32 %v5278_v45 }
0x41bb   :  { %v7124_v46 = vpop.eup %7123 }
0x41bc   :  { %v7126_v47 = vpop.eup %7125  ;;  %v5281_v11 = vadd.f32 1.0, %v7124_v46 }
0x41bd   :  { %v5282_v50 = vadd.f32 1.0, %v7126_v47 }
0x41be   :  { %v5283_v51 = vmul.f32 %v5281_v11, %v5275_v48 }
0x41bf   :  { %v5284_v63 = vmul.f32 %v5282_v50, %v5276_v49 }
0x41c0   :  { %v5317_v0 = vpack.c.bf16 %v5283_v51, %v5283_v51 }
0x41c1   :  { %v5318_v52 = vpack.c.bf16 %v5284_v63, %v5284_v63 }
0x41c3   :  { %5448 = vmatprep.mubr.bf16.mxu0 %v5318_v52 }
0x41c4   :  { %5449 = vmatmul.mubr.bf16.vlgmr.msra.gmra.mrb[68].mxu0 %v5317_v0 }
0x4297   :  { %v6443_v53 = vpop.f32.mrb[68].mxu0 }
0x4298   :  { %v6444_v56 = vpop.f32.mrb[69].mxu0 }
0x4299   :  { %v6445_v57 = vadd.f32 %v6444_v56, %v6443_v53  ;;  %v6446_v58 = vpop.f32.mrb[70].mxu0 }
0x429a   :  { %v6447_v59 = vpop.f32.mrb[71].mxu0 }
0x429b   :  { %v5451_v60 = vadd.f32 %v6445_v57, %v6155_v54 }
0x429d   :  { %v5456_v1 = vadd.f32 %v5451_v60, %v8626_v15 }
0x429f   :  { %v5459_v9 = vsel %vm429_vm4, %v5456_v1, 0.0 }
0x42a0   :  { %5460 = vadd.xlane.f32.xlu0 %v5459_v9 }
0x42a4   :  { %2232 = vadd.xlane.f32.xlu0 %v2231_v3 }
0x432d   :  { %v5461_v4 = vpop.xlane.xlu0 %5460 }
0x432e   :  { %v5462_v5 = vmul.f32 0.015625, %v5461_v4  ;;  %v3891_v4 = vld [vmem:[%s8774_s12 + $0x15] ss:$0 sm:$0xff] }
0x4330   :  { %v5463_v6 = vsub.f32 %v5456_v1, %v5462_v5 }
0x4331   :  { %v2233_v8 = vpop.xlane.xlu0 %2232 }
0x4332   :  { %v2234_v55 = vmul.f32 0.03125, %v2233_v8  ;;  %v5464_v10 = vmul.f32 %v5463_v6, %v5463_v6 }
0x4334   :  { %v2235_v13 = vsub.f32 %v2224_v2, %v2234_v55  ;;  %v5465_v37 = vsel %vm429_vm4, %v5464_v10, 0.0  ;;  %v3890_v2 = vld [vmem:[%s8774_s12 + $0x14] ss:$0 sm:$0xff] }
0x4335   :  { %5466 = vadd.xlane.f32.xlu1 %v5465_v37 }
0x4336   :  { %v2236_v62 = vmul.f32 %v2235_v13, %v2235_v13 }
0x4338   :  { %v2237_v15 = vsel %vm1439_vm5, %v2236_v62, 0.0 }
0x4339   :  { %3893 = vadd.xlane.f32.xlu1 %v3892_v14  ;;  %v6188_v14 = vld [vmem:[%s8774_s12 + $0x34] ss:$0 sm:$0xff] }
0x433d   :  { %2238 = vadd.xlane.f32.xlu1 %v2237_v15  ;;  %v6189_v15 = vld [vmem:[%s8774_s12 + $0x35] ss:$0 sm:$0xff]  ;;  %s7166_s12 = scalar_lea.vmem %s5583_s17, 128 }
0x433e   :  { %p7167_p8 = scmp.ne.s32.totalorder %s5583_s17, %s7166_s12  ;;  %p7172_p10 = scmp.lt.s32.totalorder %s7166_s12, %s7166_s12 }
0x4340   :  { %p7173_p11 = por %p7172_p10, %p7171_p9 }
0x4342   :  { %p7174_p12 = pnand %p7173_p11, %p7167_p8 }
0x43c2   :  { %v5467_v19 = vpop.xlane.xlu1 %5466 }
0x43c3   :  { %v5468_v20 = vmul.f32 0.015625, %v5467_v19 }
0x43c5   :  { %v5469_v21 = vadd.f32 1e-05, %v5468_v20 }
0x43c6   :  { %v3894_v25 = vpop.xlane.xlu1 %3893 }
0x43c7   :  { %7127 = vrsqrt.f32 %v5469_v21  ;;  %v3895_v35 = vmul.f32 0.03125, %v3894_v25 }
0x43c9   :  { %v3896_v40 = vsub.f32 %v3885_v12, %v3895_v35 }
0x43ca   :  { %v2239_v28 = vpop.xlane.xlu1 %2238 }
0x43cb   :  { %v2240_v31 = vmul.f32 0.03125, %v2239_v28  ;;  %v3897_v11 = vmul.f32 %v3896_v40, %v3896_v40 }
0x43cd   :  { %v2241_v32 = vadd.f32 1e-05, %v2240_v31  ;;  %v3898_v50 = vsel %vm1439_vm5, %v3897_v11, 0.0 }
0x43cf   :  { %7129 = vrsqrt.f32 %v2241_v32 }
0x43d1   :  { %v7128_v22 = vpop.eup %7127 }
0x43d2   :  { %v5471_v23 = vmul.f32 %v7128_v22, %v5463_v6 }
0x43d4   :  { %v5472_v27 = vmul.f32 %v6172_v33, %v5471_v23 }
0x43d6   :  { %v5473_v29 = vadd.f32 %v6173_v26, %v5472_v27 }
0x43d8   :  { %v5482_v30 = vpack.c.bf16 %v5473_v29, %v5473_v29 }
0x43d9   :  { %v7130_v34 = vpop.eup %7129 }
0x43da   :  { %6611 = vmatmul.mubr.msk.bf16.vlgmr.msra.gmra.mrb[84].mxu1 %vm65_vm0, %v5482_v30  ;;  %v2243_v36 = vmul.f32 %v7130_v34, %v2235_v13 }
0x43dc   :  { %v2244_v41 = vmul.f32 %v2243_v36, %v2229_v38 }
0x43de   :  { %v2245_v49 = vadd.f32 %v2244_v41, %v2230_v43 }
0x43e0   :  { %v2246_v51 = vmul.f32 %v2245_v49, %v2245_v49 }
0x43e2   :  { %v2247_v63 = vsel %vm1439_vm5, %v2246_v51, 0.0 }
0x44ad   :  { %v5545_v42 = vpop.f32.mrb[84].mxu1 }
0x44ae   :  { %v5546_v44 = vadd.f32 %v6182_v39, %v5545_v42  ;;  %v6612_v45 = vpop.f32.mrb[85].mxu1 }
0x44af   :  { %v5548_v46 = vpop.f32.mrb[86].mxu1 }
0x44b0   :  { %v6613_v47 = vpop.f32.mrb[87].mxu1  ;;  %v5553_v48 = vsel %vm1439_vm5, %v5546_v44, 0.0 }
0x44b1   :  { %5554 = vadd.xlane.f32.xlu0 %v5553_v48 }
0x44b5   :  { %3899 = vadd.xlane.f32.xlu0 %v3898_v50 }
0x44b9   :  { %2248 = vadd.xlane.f32.xlu0 %v2247_v63 }
0x453e   :  { %v5555_v52 = vpop.xlane.xlu0 %5554 }
0x453f   :  { %v5556_v0 = vmul.f32 0.03125, %v5555_v52 }
0x4541   :  { %v5557_v53 = vsub.f32 %v5546_v44, %v5556_v0 }
0x4542   :  { %v3900_v54 = vpop.xlane.xlu0 %3899 }
0x4543   :  { %v3901_v56 = vmul.f32 0.03125, %v3900_v54  ;;  %v5558_v57 = vmul.f32 %v5557_v53, %v5557_v53 }
0x4545   :  { %v3902_v58 = vadd.f32 1e-05, %v3901_v56  ;;  %v5559_v59 = vsel %vm1439_vm5, %v5558_v57, 0.0 }
0x4546   :  { %5560 = vadd.xlane.f32.xlu1 %v5559_v59  ;;  %v2249_v60 = vpop.xlane.xlu0 %2248 }
0x4547   :  { %7131 = vrsqrt.f32 %v3902_v58  ;;  %v2250_v61 = vmax.f32 %v2249_v60, 1e-24 }
0x4549   :  { %7133 = vrsqrt.f32 %v2250_v61 }
0x4551   :  { %v7132_v1 = vpop.eup %7131 }
0x4552   :  { %v3904_v9 = vmul.f32 %v7132_v1, %v3896_v40 }
0x4553   :  { %v7134_v3 = vpop.eup %7133 }
0x4554   :  { %v2252_v5 = vmul.f32 %v7134_v3, %v2245_v49  ;;  %v3905_v6 = vmul.f32 %v3904_v9, %v3890_v2 }
0x4556   :  { %2253 = vst.msk [vmem:[#allocation5] sm:$0x3] %vm1439_vm5, %v2252_v5  ;;  %v3906_v7 = vadd.f32 %v3905_v6, %v3891_v4 }
0x4558   :  { %v3907_v8 = vmul.f32 %v3906_v7, %v3906_v7 }
0x455a   :  { %v3908_v55 = vsel %vm1439_vm5, %v3907_v8, 0.0 }
0x455b   :  { %3909 = vadd.xlane.f32.xlu1 %v3908_v55 }
0x45d3   :  { %v5561_v10 = vpop.xlane.xlu1 %5560 }
0x45d4   :  { %v5562_v12 = vmul.f32 0.03125, %v5561_v10 }
0x45d6   :  { %v5563_v13 = vadd.f32 1e-05, %v5562_v12 }
0x45d8   :  { %7135 = vrsqrt.f32 %v5563_v13 }
0x45e2   :  { %v7136_v37 = vpop.eup %7135 }
0x45e3   :  { %v5565_v62 = vmul.f32 %v7136_v37, %v5557_v53 }
0x45e5   :  { %v5566_v16 = vmul.f32 %v6188_v14, %v5565_v62 }
0x45e7   :  { %v5567_v24 = vadd.f32 %v6189_v15, %v5566_v16 }
0x45e8   :  { %v3910_v17 = vpop.xlane.xlu1 %3909 }
0x45e9   :  { %v3911_v18 = vmax.f32 %v3910_v17, 1e-24  ;;  %v5568_v19 = vmul.f32 %v5567_v24, %v5567_v24 }
0x45eb   :  { %7137 = vrsqrt.f32 %v3911_v18  ;;  %v5569_v20 = vsel %vm1439_vm5, %v5568_v19, 0.0 }
0x45ec   :  { %5570 = vadd.xlane.f32.xlu0 %v5569_v20 }
0x45f5   :  { %v7138_v21 = vpop.eup %7137 }
0x45f6   :  { %v3913_v22 = vmul.f32 %v7138_v21, %v3906_v7 }
0x45f8   :  { %3914 = vst.msk [vmem:[#allocation5 + $0x2] sm:$0x3] %vm1439_vm5, %v3913_v22 }
0x4679   :  { %v5571_v33 = vpop.xlane.xlu0 %5570 }
0x467a   :  { %v5572_v23 = vmax.f32 %v5571_v33, 1e-24 }
0x467c   :  { %7139 = vrsqrt.f32 %v5572_v23 }
0x4686   :  { %v7140_v26 = vpop.eup %7139 }
0x4687   :  { %v5574_v27 = vmul.f32 %v7140_v26, %v5567_v24 }
0x4689   :  { %5575 = vst.msk [vmem:[#allocation5 + $0x4] sm:$0x3] %vm1439_vm5, %v5574_v27 }
0x468a   :  { %7177 = shalt.err (!%p7174_p12)
}
0x468b   :  { %s7178_s18 = scalar_lea.hbm %s8775_s13, 128 }
0x468c   :  { %p7179_p13 = scmp.ne.s32.totalorder %s8775_s13, %s7178_s18  ;;  %p7182_p0 = scmp.lt.u32.totalorder %s7178_s18, %s8775_s13 }
0x468e   :  { %p7184_p1 = pnand %p7182_p0, %p7179_p13 }
0x4690   :  { %7187 = shalt.err (!%p7184_p1)
}
0x4691   :  { %5585 = dma.vmem_to_hbm [thread:$0]  %s5583_s17, 128, %s8775_s13, [#allocation4]  }
0x4692   :  { %7190 = dma.done.wait [#allocation4], 128  }
0x4693   :  { %7191 = vsyncadd [#allocation4], 4294967168 }
0x4694   :  { %5589 = vsyncpa [#allocation3], 1 }
0x4695   :  { %5590 = vsyncpa [#allocation4], 1 }

</bundles_post_ra>
